<compile_context>
chip_gen: v7x
topology: tpu7x:2x2x1
jax: 0.10.0
libtpu: 0.0.40
codegen_flags: <defaults>
</compile_context>

<pallas_src>
import functools

import jax
import jax.numpy as jnp
from jax.experimental import pallas as pl
from jax.experimental.pallas import tpu as pltpu

_EPS = 1e-5    # PyTorch InstanceNorm2d default
_LANE = 128    # TPU lane width; channel dim is padded to a multiple of this


def _round_up(v, m):
    return ((v + m - 1) // m) * m


# ---------------------------------------------------------------------------
# Kernel
# ---------------------------------------------------------------------------
def _write_reflect_pad(xpad_ref, img, H, W):
    """Write `img` (H, W, Cp) into xpad_ref (H+2, W+2, Cp) with 1px reflect pad."""
    xpad_ref[1:H + 1, 1:W + 1, :] = img
    # Reflect top/bottom rows (row -1 -> row 1, row H -> row H-2).
    xpad_ref[0:1, 1:W + 1, :] = img[1:2]
    xpad_ref[H + 1:H + 2, 1:W + 1, :] = img[H - 2:H - 1]
    # Reflect left/right columns (incl. corners, rows already written).
    xpad_ref[:, 0:1, :] = xpad_ref[:, 2:3, :]
    xpad_ref[:, W + 1:W + 2, :] = xpad_ref[:, W - 1:W, :]


def _conv3x3(xpad_ref, w_ref, H, W, Cp, matmul_dtype):
    """Valid 3x3 conv on the padded tile: returns (H*W, Cp) float32.

    The kx taps are folded into the contraction dim: 3 matmuls with K = 3*Cp
    (one per ky) instead of 9 matmuls with K = Cp.
    """
    acc = jnp.zeros((H * W, Cp), jnp.float32)
    for ky in range(3):
        # Lane-aligned concat (each piece is a full Cp=128k lanes wide).
        lhs = jnp.concatenate(
            [xpad_ref[ky:ky + H, 0:W, :],
             xpad_ref[ky:ky + H, 1:W + 1, :],
             xpad_ref[ky:ky + H, 2:W + 2, :]],
            axis=-1,
        ).reshape(H * W, 3 * Cp)
        acc += jnp.dot(lhs.astype(matmul_dtype),
                       w_ref[ky].astype(matmul_dtype),
                       preferred_element_type=jnp.float32)
    return acc


def _instance_norm(y):
    """InstanceNorm2d(affine=False): normalize each channel over spatial dims."""
    mean = jnp.mean(y, axis=0, keepdims=True)
    var = jnp.mean(jnp.square(y - mean), axis=0, keepdims=True)
    return (y - mean) * jax.lax.rsqrt(var + _EPS)


def _resnet_block_kernel(x_ref, w1_ref, w2_ref, out_ref, xpad_ref, *,
                         H, W, Cp, matmul_dtype):
    """Fully fused ResnetBlock forward for one batch element (NHWC tile)."""
    x = x_ref[0].astype(jnp.float32)                           # (H, W, Cp)

    # Stage 1: reflect pad -> conv3x3 -> InstanceNorm -> ReLU.
    _write_reflect_pad(xpad_ref, x, H, W)
    h = _conv3x3(xpad_ref, w1_ref, H, W, Cp, matmul_dtype)
    h = jnp.maximum(_instance_norm(h), 0.0).reshape(H, W, Cp)

    # Stage 2: reflect pad -> conv3x3 -> InstanceNorm -> residual add.
    _write_reflect_pad(xpad_ref, h, H, W)
    y = _conv3x3(xpad_ref, w2_ref, H, W, Cp, matmul_dtype)
    y = _instance_norm(y).reshape(H, W, Cp) + x

    out_ref[...] = y[None].astype(out_ref.dtype)


# ---------------------------------------------------------------------------
# Wrappers
# ---------------------------------------------------------------------------
def resnet_block_forward_nhwc(x_nhwc, kparams, *, matmul_dtype=jnp.float32):
    """NHWC in / NHWC out. Preferred entry point (no layout transposes).

    `matmul_dtype=jnp.bfloat16` is recommended on v5e/v6e/v7x for higher MXU
    throughput (accumulation stays f32); default f32 matches PyTorch numerics.
    """
    N, H, W, C = x_nhwc.shape
    Cp = kparams["w1"].shape[-1]                  # channels padded to 128-multiple
    assert Cp >= C and Cp % _LANE == 0, (C, Cp)

    x_in = x_nhwc
    if Cp != C:
        # Zero channel padding: padded channels stay exactly 0 through the block.
        x_in = jnp.pad(x_nhwc, ((0, 0), (0, 0), (0, 0), (0, Cp - C)))

    kernel = functools.partial(_resnet_block_kernel, H=H, W=W, Cp=Cp,
                               matmul_dtype=matmul_dtype)
    img_spec = pl.BlockSpec((1, H, W, Cp), lambda b: (b, 0, 0, 0))
    w_spec = pl.BlockSpec((3, 3 * Cp, Cp), lambda b: (0, 0, 0))

    # TODO(synk): for large C / H*W (v7x 64 MiB VMEM), add a row-stripe spatial
    # grid axis with a 2-row halo and a sum/sumsq-carry InstanceNorm (two-pass
    # normalization) instead of whole-image-per-step, plus vmem_limit_bytes.
    out = pl.pallas_call(
        kernel,
        out_shape=jax.ShapeDtypeStruct((N, H, W, Cp), x_nhwc.dtype),
        grid_spec=pltpu.PrefetchScalarGridSpec(
            num_scalar_prefetch=0,
            grid=(N,),
            in_specs=[img_spec, w_spec, w_spec],
            out_specs=img_spec,
            scratch_shapes=[pltpu.VMEM((H + 2, W + 2, Cp), jnp.float32)],
        ),
        compiler_params=pltpu.CompilerParams(
            dimension_semantics=("parallel",)),
    )(x_in, kparams["w1"], kparams["w2"])

    if Cp != C:
        out = out[..., :C]
    return out


def resnet_block_forward(x_nchw, kparams, *, matmul_dtype=jnp.float32):
    """PyTorch-compatible NCHW in / NCHW out (thin wrapper; prefer the NHWC entry)."""
    x = jnp.transpose(x_nchw, (0, 2, 3, 1))
    y = resnet_block_forward_nhwc(x, kparams, matmul_dtype=matmul_dtype)
    return jnp.transpose(y, (0, 3, 1, 2))


# ---------------------------------------------------------------------------
# Parameters
# ---------------------------------------------------------------------------
def init_params(key, dim):
    """Deterministic synthetic params in PyTorch layout (Conv2d: (Cout,Cin,3,3) + bias)."""
    k1, k2, k3, k4 = jax.random.split(key, 4)
    return {
        "w1": 0.1 * jax.random.normal(k1, (dim, dim, 3, 3), jnp.float32),
        "b1": 0.1 * jax.random.normal(k2, (dim,), jnp.float32),
        "w2": 0.1 * jax.random.normal(k3, (dim, dim, 3, 3), jnp.float32),
        "b2": 0.1 * jax.random.normal(k4, (dim,), jnp.float32),
    }


def prepare_kernel_params(params, dim):
    """One-time conversion of PyTorch conv weights to the kernel layout.

    (Cout, Cin, 3, 3) -> (ky, kx, Cin, Cout) -> zero-pad channels to a multiple
    of 128 -> (3, 3*Cp, Cp): each ky tap is a single (3*Cp, Cp) MXU operand.

    Conv biases are intentionally dropped: a per-channel constant added right
    before a non-affine InstanceNorm is exactly cancelled by the mean
    subtraction, so it does not affect the forward pass.
    """
    cp = _round_up(dim, _LANE)

    def conv_w(w):
        w = jnp.transpose(w, (2, 3, 1, 0))                       # (3,3,Cin,Cout)
        w = jnp.pad(w, ((0, 0), (0, 0), (0, cp - dim), (0, cp - dim)))
        return w.reshape(3, 3 * cp, cp).astype(jnp.float32)

    return {"w1": conv_w(params["w1"]), "w2": conv_w(params["w2"])}


# ---------------------------------------------------------------------------
# Pure-JAX reference (matches the PyTorch module)
# ---------------------------------------------------------------------------
def _reference_forward(x_nchw, params):
    def stage(x, w, b):
        xp = jnp.pad(x, ((0, 0), (0, 0), (1, 1), (1, 1)), mode="reflect")
        y = jax.lax.conv_general_dilated(
            xp, w, window_strides=(1, 1), padding="VALID",
            dimension_numbers=("NCHW", "OIHW", "NCHW"))
        y = y + b[None, :, None, None]
        mean = jnp.mean(y, axis=(2, 3), keepdims=True)
        var = jnp.mean(jnp.square(y - mean), axis=(2, 3), keepdims=True)
        return (y - mean) * jax.lax.rsqrt(var + _EPS)

    h = jnp.maximum(stage(x_nchw, params["w1"], params["b1"]), 0.0)
    return x_nchw + stage(h, params["w2"], params["b2"])


if __name__ == "__main__":
    key = jax.random.PRNGKey(0)
    k_x, k_p = jax.random.split(key)

    N, C, H, W = 2, 4, 16, 16
    x = jax.random.normal(k_x, (N, C, H, W), jnp.float32)   # NCHW, like PyTorch
    params = init_params(k_p, C)
    kparams = prepare_kernel_params(params, C)

    fwd = jax.jit(resnet_block_forward)
    out = fwd(x, kparams)
    jax.block_until_ready(out)
    assert out.shape == (N, C, H, W), out.shape

    ref = _reference_forward(x, params)
    err = float(jnp.max(jnp.abs(out - ref)))
    assert err < 1e-3, f"max abs error vs reference: {err}"

    print("KERNEL_OK")
</pallas_src>

<mosaic_0001>
module attributes {stable_mosaic.version = 11 : i64} {
  func.func @_resnet_block_kernel(%arg0: i32, %arg1: memref<1x16x16x128xf32, #tpu.memory_space<vmem>>, %arg2: memref<3x384x128xf32, #tpu.memory_space<vmem>>, %arg3: memref<3x384x128xf32, #tpu.memory_space<vmem>>, %arg4: memref<1x16x16x128xf32, #tpu.memory_space<vmem>>, %arg5: memref<18x18x128xf32, #tpu.memory_space<vmem>>) attributes {dimension_semantics = [#tpu.dimension_semantics<parallel>], iteration_bounds = array<i64: 2>, scalar_prefetch = 0 : i64, scratch_operands = 1 : i64, tpu.core_type = #tpu.core_type<tc>, window_params = [{transform_indices = @transform_0, window_bounds = array<i64: 1, 16, 16, 128>}, {pipeline_mode = #tpu.pipeline_mode<synchronous>, transform_indices = @transform_1, window_bounds = array<i64: 3, 384, 128>}, {pipeline_mode = #tpu.pipeline_mode<synchronous>, transform_indices = @transform_2, window_bounds = array<i64: 3, 384, 128>}, {transform_indices = @transform_3, window_bounds = array<i64: 1, 16, 16, 128>}]} {
    %c0 = arith.constant 0 : index
    %c0_0 = arith.constant 0 : index
    %c0_1 = arith.constant 0 : index
    %c0_2 = arith.constant 0 : index
    %0 = vector.load %arg1[%c0, %c0_0, %c0_1, %c0_2] : memref<1x16x16x128xf32, #tpu.memory_space<vmem>>, vector<1x16x16x128xf32>
    %1 = vector.shape_cast %0 : vector<1x16x16x128xf32> to vector<16x16x128xf32>
    %c1 = arith.constant 1 : index
    %c1_3 = arith.constant 1 : index
    %c0_4 = arith.constant 0 : index
    %2 = vector.load %arg5[%c1, %c1_3, %c0_4] : memref<18x18x128xf32, #tpu.memory_space<vmem>>, vector<16x16x128xf32>
    tpu.vector_store %arg5[%c1, %c1_3, %c0_4], %1 {strides = array<i32>} : memref<18x18x128xf32, #tpu.memory_space<vmem>>, vector<16x16x128xf32>,
    %3 = vector.extract_strided_slice %1 {offsets = [1, 0, 0], sizes = [1, 16, 128], strides = [1, 1, 1]} : vector<16x16x128xf32> to vector<1x16x128xf32>
    %c0_5 = arith.constant 0 : index
    %c1_6 = arith.constant 1 : index
    %c0_7 = arith.constant 0 : index
    %4 = vector.load %arg5[%c0_5, %c1_6, %c0_7] : memref<18x18x128xf32, #tpu.memory_space<vmem>>, vector<1x16x128xf32>
    tpu.vector_store %arg5[%c0_5, %c1_6, %c0_7], %3 {strides = array<i32>} : memref<18x18x128xf32, #tpu.memory_space<vmem>>, vector<1x16x128xf32>,
    %5 = vector.extract_strided_slice %1 {offsets = [14, 0, 0], sizes = [1, 16, 128], strides = [1, 1, 1]} : vector<16x16x128xf32> to vector<1x16x128xf32>
    %c17 = arith.constant 17 : index
    %c1_8 = arith.constant 1 : index
    %c0_9 = arith.constant 0 : index
    %6 = vector.load %arg5[%c17, %c1_8, %c0_9] : memref<18x18x128xf32, #tpu.memory_space<vmem>>, vector<1x16x128xf32>
    tpu.vector_store %arg5[%c17, %c1_8, %c0_9], %5 {strides = array<i32>} : memref<18x18x128xf32, #tpu.memory_space<vmem>>, vector<1x16x128xf32>,
    %c0_10 = arith.constant 0 : index
    %c2 = arith.constant 2 : index
    %c0_11 = arith.constant 0 : index
    %7 = vector.load %arg5[%c0_10, %c2, %c0_11] : memref<18x18x128xf32, #tpu.memory_space<vmem>>, vector<18x1x128xf32>
    %c0_12 = arith.constant 0 : index
    %c0_13 = arith.constant 0 : index
    %c0_14 = arith.constant 0 : index
    %8 = vector.load %arg5[%c0_12, %c0_13, %c0_14] : memref<18x18x128xf32, #tpu.memory_space<vmem>>, vector<18x1x128xf32>
    tpu.vector_store %arg5[%c0_12, %c0_13, %c0_14], %7 {strides = array<i32>} : memref<18x18x128xf32, #tpu.memory_space<vmem>>, vector<18x1x128xf32>,
    %c0_15 = arith.constant 0 : index
    %c15 = arith.constant 15 : index
    %c0_16 = arith.constant 0 : index
    %9 = vector.load %arg5[%c0_15, %c15, %c0_16] : memref<18x18x128xf32, #tpu.memory_space<vmem>>, vector<18x1x128xf32>
    %c0_17 = arith.constant 0 : index
    %c17_18 = arith.constant 17 : index
    %c0_19 = arith.constant 0 : index
    %10 = vector.load %arg5[%c0_17, %c17_18, %c0_19] : memref<18x18x128xf32, #tpu.memory_space<vmem>>, vector<18x1x128xf32>
    tpu.vector_store %arg5[%c0_17, %c17_18, %c0_19], %9 {strides = array<i32>} : memref<18x18x128xf32, #tpu.memory_space<vmem>>, vector<18x1x128xf32>,
    %cst = arith.constant 0.000000e+00 : f32
    %11 = vector.broadcast %cst : f32 to vector<256x128xf32>
    %c0_20 = arith.constant 0 : index
    %c0_21 = arith.constant 0 : index
    %c0_22 = arith.constant 0 : index
    %12 = vector.load %arg5[%c0_20, %c0_21, %c0_22] : memref<18x18x128xf32, #tpu.memory_space<vmem>>, vector<16x16x128xf32>
    %c0_23 = arith.constant 0 : index
    %c1_24 = arith.constant 1 : index
    %c0_25 = arith.constant 0 : index
    %13 = vector.load %arg5[%c0_23, %c1_24, %c0_25] : memref<18x18x128xf32, #tpu.memory_space<vmem>>, vector<16x16x128xf32>
    %c0_26 = arith.constant 0 : index
    %c2_27 = arith.constant 2 : index
    %c0_28 = arith.constant 0 : index
    %14 = vector.load %arg5[%c0_26, %c2_27, %c0_28] : memref<18x18x128xf32, #tpu.memory_space<vmem>>, vector<16x16x128xf32>
    %15 = tpu.concatenate %12, %13, %14 in 2 : vector<16x16x128xf32>, vector<16x16x128xf32>, vector<16x16x128xf32> -> vector<16x16x384xf32>
    %16 = vector.shape_cast %15 : vector<16x16x384xf32> to vector<256x384xf32>
    %c0_29 = arith.constant 0 : index
    %c0_30 = arith.constant 0 : index
    %c0_31 = arith.constant 0 : index
    %17 = vector.load %arg2[%c0_29, %c0_30, %c0_31] : memref<3x384x128xf32, #tpu.memory_space<vmem>>, vector<1x384x128xf32>
    %18 = vector.shape_cast %17 : vector<1x384x128xf32> to vector<384x128xf32>
    %cst_32 = arith.constant dense<0.000000e+00> : vector<256x128xf32>
    %19 = tpu.matmul %16, %18, %cst_32 {dimension_numbers = #tpu.dot_dimension_numbers<[1], [0], [0], [1], [0, 0, 1, 1], [], []>} : vector<256x384xf32>, vector<384x128xf32>, vector<256x128xf32> -> vector<256x128xf32>
    %20 = arith.addf %11, %19 : vector<256x128xf32>
    %c1_33 = arith.constant 1 : index
    %c0_34 = arith.constant 0 : index
    %c0_35 = arith.constant 0 : index
    %21 = vector.load %arg5[%c1_33, %c0_34, %c0_35] : memref<18x18x128xf32, #tpu.memory_space<vmem>>, vector<16x16x128xf32>
    %c1_36 = arith.constant 1 : index
    %c1_37 = arith.constant 1 : index
    %c0_38 = arith.constant 0 : index
    %22 = vector.load %arg5[%c1_36, %c1_37, %c0_38] : memref<18x18x128xf32, #tpu.memory_space<vmem>>, vector<16x16x128xf32>
    %c1_39 = arith.constant 1 : index
    %c2_40 = arith.constant 2 : index
    %c0_41 = arith.constant 0 : index
    %23 = vector.load %arg5[%c1_39, %c2_40, %c0_41] : memref<18x18x128xf32, #tpu.memory_space<vmem>>, vector<16x16x128xf32>
    %24 = tpu.concatenate %21, %22, %23 in 2 : vector<16x16x128xf32>, vector<16x16x128xf32>, vector<16x16x128xf32> -> vector<16x16x384xf32>
    %25 = vector.shape_cast %24 : vector<16x16x384xf32> to vector<256x384xf32>
    %c1_42 = arith.constant 1 : index
    %c0_43 = arith.constant 0 : index
    %c0_44 = arith.constant 0 : index
    %26 = vector.load %arg2[%c1_42, %c0_43, %c0_44] : memref<3x384x128xf32, #tpu.memory_space<vmem>>, vector<1x384x128xf32>
    %27 = vector.shape_cast %26 : vector<1x384x128xf32> to vector<384x128xf32>
    %cst_45 = arith.constant dense<0.000000e+00> : vector<256x128xf32>
    %28 = tpu.matmul %25, %27, %cst_45 {dimension_numbers = #tpu.dot_dimension_numbers<[1], [0], [0], [1], [0, 0, 1, 1], [], []>} : vector<256x384xf32>, vector<384x128xf32>, vector<256x128xf32> -> vector<256x128xf32>
    %29 = arith.addf %20, %28 : vector<256x128xf32>
    %c2_46 = arith.constant 2 : index
    %c0_47 = arith.constant 0 : index
    %c0_48 = arith.constant 0 : index
    %30 = vector.load %arg5[%c2_46, %c0_47, %c0_48] : memref<18x18x128xf32, #tpu.memory_space<vmem>>, vector<16x16x128xf32>
    %c2_49 = arith.constant 2 : index
    %c1_50 = arith.constant 1 : index
    %c0_51 = arith.constant 0 : index
    %31 = vector.load %arg5[%c2_49, %c1_50, %c0_51] : memref<18x18x128xf32, #tpu.memory_space<vmem>>, vector<16x16x128xf32>
    %c2_52 = arith.constant 2 : index
    %c2_53 = arith.constant 2 : index
    %c0_54 = arith.constant 0 : index
    %32 = vector.load %arg5[%c2_52, %c2_53, %c0_54] : memref<18x18x128xf32, #tpu.memory_space<vmem>>, vector<16x16x128xf32>
    %33 = tpu.concatenate %30, %31, %32 in 2 : vector<16x16x128xf32>, vector<16x16x128xf32>, vector<16x16x128xf32> -> vector<16x16x384xf32>
    %34 = vector.shape_cast %33 : vector<16x16x384xf32> to vector<256x384xf32>
    %c2_55 = arith.constant 2 : index
    %c0_56 = arith.constant 0 : index
    %c0_57 = arith.constant 0 : index
    %35 = vector.load %arg2[%c2_55, %c0_56, %c0_57] : memref<3x384x128xf32, #tpu.memory_space<vmem>>, vector<1x384x128xf32>
    %36 = vector.shape_cast %35 : vector<1x384x128xf32> to vector<384x128xf32>
    %cst_58 = arith.constant dense<0.000000e+00> : vector<256x128xf32>
    %37 = tpu.matmul %34, %36, %cst_58 {dimension_numbers = #tpu.dot_dimension_numbers<[1], [0], [0], [1], [0, 0, 1, 1], [], []>} : vector<256x384xf32>, vector<384x128xf32>, vector<256x128xf32> -> vector<256x128xf32>
    %38 = arith.addf %29, %37 : vector<256x128xf32>
    %cst_59 = arith.constant dense<0.000000e+00> : vector<128xf32>
    %39 = vector.multi_reduction <add>, %38, %cst_59 [0] : vector<256x128xf32> to vector<128xf32>
    %40 = vector.shape_cast %39 : vector<128xf32> to vector<1x128xf32>
    %cst_60 = arith.constant 2.560000e+02 : f32
    %41 = vector.broadcast %cst_60 : f32 to vector<1x128xf32>
    %42 = arith.divf %40, %41 : vector<1x128xf32>
    %43 = vector.broadcast %42 : vector<1x128xf32> to vector<256x128xf32>
    %44 = arith.subf %38, %43 : vector<256x128xf32>
    %45 = arith.mulf %44, %44 : vector<256x128xf32>
    %cst_61 = arith.constant dense<0.000000e+00> : vector<128xf32>
    %46 = vector.multi_reduction <add>, %45, %cst_61 [0] : vector<256x128xf32> to vector<128xf32>
    %47 = vector.shape_cast %46 : vector<128xf32> to vector<1x128xf32>
    %cst_62 = arith.constant 2.560000e+02 : f32
    %48 = vector.broadcast %cst_62 : f32 to vector<1x128xf32>
    %49 = arith.divf %47, %48 : vector<1x128xf32>
    %50 = vector.broadcast %42 : vector<1x128xf32> to vector<256x128xf32>
    %51 = arith.subf %38, %50 : vector<256x128xf32>
    %cst_63 = arith.constant 9.99999974E-6 : f32
    %52 = vector.broadcast %cst_63 : f32 to vector<1x128xf32>
    %53 = arith.addf %49, %52 : vector<1x128xf32>
    %54 = math.rsqrt %53 : vector<1x128xf32>
    %55 = vector.broadcast %54 : vector<1x128xf32> to vector<256x128xf32>
    %56 = arith.mulf %51, %55 : vector<256x128xf32>
    %cst_64 = arith.constant 0.000000e+00 : f32
    %57 = vector.broadcast %cst_64 : f32 to vector<256x128xf32>
    %58 = arith.maximumf %56, %57 : vector<256x128xf32>
    %59 = vector.shape_cast %58 : vector<256x128xf32> to vector<16x16x128xf32>
    %c1_65 = arith.constant 1 : index
    %c1_66 = arith.constant 1 : index
    %c0_67 = arith.constant 0 : index
    %60 = vector.load %arg5[%c1_65, %c1_66, %c0_67] : memref<18x18x128xf32, #tpu.memory_space<vmem>>, vector<16x16x128xf32>
    tpu.vector_store %arg5[%c1_65, %c1_66, %c0_67], %59 {strides = array<i32>} : memref<18x18x128xf32, #tpu.memory_space<vmem>>, vector<16x16x128xf32>,
    %61 = vector.extract_strided_slice %59 {offsets = [1, 0, 0], sizes = [1, 16, 128], strides = [1, 1, 1]} : vector<16x16x128xf32> to vector<1x16x128xf32>
    %c0_68 = arith.constant 0 : index
    %c1_69 = arith.constant 1 : index
    %c0_70 = arith.constant 0 : index
    %62 = vector.load %arg5[%c0_68, %c1_69, %c0_70] : memref<18x18x128xf32, #tpu.memory_space<vmem>>, vector<1x16x128xf32>
    tpu.vector_store %arg5[%c0_68, %c1_69, %c0_70], %61 {strides = array<i32>} : memref<18x18x128xf32, #tpu.memory_space<vmem>>, vector<1x16x128xf32>,
    %63 = vector.extract_strided_slice %59 {offsets = [14, 0, 0], sizes = [1, 16, 128], strides = [1, 1, 1]} : vector<16x16x128xf32> to vector<1x16x128xf32>
    %c17_71 = arith.constant 17 : index
    %c1_72 = arith.constant 1 : index
    %c0_73 = arith.constant 0 : index
    %64 = vector.load %arg5[%c17_71, %c1_72, %c0_73] : memref<18x18x128xf32, #tpu.memory_space<vmem>>, vector<1x16x128xf32>
    tpu.vector_store %arg5[%c17_71, %c1_72, %c0_73], %63 {strides = array<i32>} : memref<18x18x128xf32, #tpu.memory_space<vmem>>, vector<1x16x128xf32>,
    %c0_74 = arith.constant 0 : index
    %c2_75 = arith.constant 2 : index
    %c0_76 = arith.constant 0 : index
    %65 = vector.load %arg5[%c0_74, %c2_75, %c0_76] : memref<18x18x128xf32, #tpu.memory_space<vmem>>, vector<18x1x128xf32>
    %c0_77 = arith.constant 0 : index
    %c0_78 = arith.constant 0 : index
    %c0_79 = arith.constant 0 : index
    %66 = vector.load %arg5[%c0_77, %c0_78, %c0_79] : memref<18x18x128xf32, #tpu.memory_space<vmem>>, vector<18x1x128xf32>
    tpu.vector_store %arg5[%c0_77, %c0_78, %c0_79], %65 {strides = array<i32>} : memref<18x18x128xf32, #tpu.memory_space<vmem>>, vector<18x1x128xf32>,
    %c0_80 = arith.constant 0 : index
    %c15_81 = arith.constant 15 : index
    %c0_82 = arith.constant 0 : index
    %67 = vector.load %arg5[%c0_80, %c15_81, %c0_82] : memref<18x18x128xf32, #tpu.memory_space<vmem>>, vector<18x1x128xf32>
    %c0_83 = arith.constant 0 : index
    %c17_84 = arith.constant 17 : index
    %c0_85 = arith.constant 0 : index
    %68 = vector.load %arg5[%c0_83, %c17_84, %c0_85] : memref<18x18x128xf32, #tpu.memory_space<vmem>>, vector<18x1x128xf32>
    tpu.vector_store %arg5[%c0_83, %c17_84, %c0_85], %67 {strides = array<i32>} : memref<18x18x128xf32, #tpu.memory_space<vmem>>, vector<18x1x128xf32>,
    %cst_86 = arith.constant 0.000000e+00 : f32
    %69 = vector.broadcast %cst_86 : f32 to vector<256x128xf32>
    %c0_87 = arith.constant 0 : index
    %c0_88 = arith.constant 0 : index
    %c0_89 = arith.constant 0 : index
    %70 = vector.load %arg5[%c0_87, %c0_88, %c0_89] : memref<18x18x128xf32, #tpu.memory_space<vmem>>, vector<16x16x128xf32>
    %c0_90 = arith.constant 0 : index
    %c1_91 = arith.constant 1 : index
    %c0_92 = arith.constant 0 : index
    %71 = vector.load %arg5[%c0_90, %c1_91, %c0_92] : memref<18x18x128xf32, #tpu.memory_space<vmem>>, vector<16x16x128xf32>
    %c0_93 = arith.constant 0 : index
    %c2_94 = arith.constant 2 : index
    %c0_95 = arith.constant 0 : index
    %72 = vector.load %arg5[%c0_93, %c2_94, %c0_95] : memref<18x18x128xf32, #tpu.memory_space<vmem>>, vector<16x16x128xf32>
    %73 = tpu.concatenate %70, %71, %72 in 2 : vector<16x16x128xf32>, vector<16x16x128xf32>, vector<16x16x128xf32> -> vector<16x16x384xf32>
    %74 = vector.shape_cast %73 : vector<16x16x384xf32> to vector<256x384xf32>
    %c0_96 = arith.constant 0 : index
    %c0_97 = arith.constant 0 : index
    %c0_98 = arith.constant 0 : index
    %75 = vector.load %arg3[%c0_96, %c0_97, %c0_98] : memref<3x384x128xf32, #tpu.memory_space<vmem>>, vector<1x384x128xf32>
    %76 = vector.shape_cast %75 : vector<1x384x128xf32> to vector<384x128xf32>
    %cst_99 = arith.constant dense<0.000000e+00> : vector<256x128xf32>
    %77 = tpu.matmul %74, %76, %cst_99 {dimension_numbers = #tpu.dot_dimension_numbers<[1], [0], [0], [1], [0, 0, 1, 1], [], []>} : vector<256x384xf32>, vector<384x128xf32>, vector<256x128xf32> -> vector<256x128xf32>
    %78 = arith.addf %69, %77 : vector<256x128xf32>
    %c1_100 = arith.constant 1 : index
    %c0_101 = arith.constant 0 : index
    %c0_102 = arith.constant 0 : index
    %79 = vector.load %arg5[%c1_100, %c0_101, %c0_102] : memref<18x18x128xf32, #tpu.memory_space<vmem>>, vector<16x16x128xf32>
    %c1_103 = arith.constant 1 : index
    %c1_104 = arith.constant 1 : index
    %c0_105 = arith.constant 0 : index
    %80 = vector.load %arg5[%c1_103, %c1_104, %c0_105] : memref<18x18x128xf32, #tpu.memory_space<vmem>>, vector<16x16x128xf32>
    %c1_106 = arith.constant 1 : index
    %c2_107 = arith.constant 2 : index
    %c0_108 = arith.constant 0 : index
    %81 = vector.load %arg5[%c1_106, %c2_107, %c0_108] : memref<18x18x128xf32, #tpu.memory_space<vmem>>, vector<16x16x128xf32>
    %82 = tpu.concatenate %79, %80, %81 in 2 : vector<16x16x128xf32>, vector<16x16x128xf32>, vector<16x16x128xf32> -> vector<16x16x384xf32>
    %83 = vector.shape_cast %82 : vector<16x16x384xf32> to vector<256x384xf32>
    %c1_109 = arith.constant 1 : index
    %c0_110 = arith.constant 0 : index
    %c0_111 = arith.constant 0 : index
    %84 = vector.load %arg3[%c1_109, %c0_110, %c0_111] : memref<3x384x128xf32, #tpu.memory_space<vmem>>, vector<1x384x128xf32>
    %85 = vector.shape_cast %84 : vector<1x384x128xf32> to vector<384x128xf32>
    %cst_112 = arith.constant dense<0.000000e+00> : vector<256x128xf32>
    %86 = tpu.matmul %83, %85, %cst_112 {dimension_numbers = #tpu.dot_dimension_numbers<[1], [0], [0], [1], [0, 0, 1, 1], [], []>} : vector<256x384xf32>, vector<384x128xf32>, vector<256x128xf32> -> vector<256x128xf32>
    %87 = arith.addf %78, %86 : vector<256x128xf32>
    %c2_113 = arith.constant 2 : index
    %c0_114 = arith.constant 0 : index
    %c0_115 = arith.constant 0 : index
    %88 = vector.load %arg5[%c2_113, %c0_114, %c0_115] : memref<18x18x128xf32, #tpu.memory_space<vmem>>, vector<16x16x128xf32>
    %c2_116 = arith.constant 2 : index
    %c1_117 = arith.constant 1 : index
    %c0_118 = arith.constant 0 : index
    %89 = vector.load %arg5[%c2_116, %c1_117, %c0_118] : memref<18x18x128xf32, #tpu.memory_space<vmem>>, vector<16x16x128xf32>
    %c2_119 = arith.constant 2 : index
    %c2_120 = arith.constant 2 : index
    %c0_121 = arith.constant 0 : index
    %90 = vector.load %arg5[%c2_119, %c2_120, %c0_121] : memref<18x18x128xf32, #tpu.memory_space<vmem>>, vector<16x16x128xf32>
    %91 = tpu.concatenate %88, %89, %90 in 2 : vector<16x16x128xf32>, vector<16x16x128xf32>, vector<16x16x128xf32> -> vector<16x16x384xf32>
    %92 = vector.shape_cast %91 : vector<16x16x384xf32> to vector<256x384xf32>
    %c2_122 = arith.constant 2 : index
    %c0_123 = arith.constant 0 : index
    %c0_124 = arith.constant 0 : index
    %93 = vector.load %arg3[%c2_122, %c0_123, %c0_124] : memref<3x384x128xf32, #tpu.memory_space<vmem>>, vector<1x384x128xf32>
    %94 = vector.shape_cast %93 : vector<1x384x128xf32> to vector<384x128xf32>
    %cst_125 = arith.constant dense<0.000000e+00> : vector<256x128xf32>
    %95 = tpu.matmul %92, %94, %cst_125 {dimension_numbers = #tpu.dot_dimension_numbers<[1], [0], [0], [1], [0, 0, 1, 1], [], []>} : vector<256x384xf32>, vector<384x128xf32>, vector<256x128xf32> -> vector<256x128xf32>
    %96 = arith.addf %87, %95 : vector<256x128xf32>
    %cst_126 = arith.constant dense<0.000000e+00> : vector<128xf32>
    %97 = vector.multi_reduction <add>, %96, %cst_126 [0] : vector<256x128xf32> to vector<128xf32>
    %98 = vector.shape_cast %97 : vector<128xf32> to vector<1x128xf32>
    %cst_127 = arith.constant 2.560000e+02 : f32
    %99 = vector.broadcast %cst_127 : f32 to vector<1x128xf32>
    %100 = arith.divf %98, %99 : vector<1x128xf32>
    %101 = vector.broadcast %100 : vector<1x128xf32> to vector<256x128xf32>
    %102 = arith.subf %96, %101 : vector<256x128xf32>
    %103 = arith.mulf %102, %102 : vector<256x128xf32>
    %cst_128 = arith.constant dense<0.000000e+00> : vector<128xf32>
    %104 = vector.multi_reduction <add>, %103, %cst_128 [0] : vector<256x128xf32> to vector<128xf32>
    %105 = vector.shape_cast %104 : vector<128xf32> to vector<1x128xf32>
    %cst_129 = arith.constant 2.560000e+02 : f32
    %106 = vector.broadcast %cst_129 : f32 to vector<1x128xf32>
    %107 = arith.divf %105, %106 : vector<1x128xf32>
    %108 = vector.broadcast %100 : vector<1x128xf32> to vector<256x128xf32>
    %109 = arith.subf %96, %108 : vector<256x128xf32>
    %cst_130 = arith.constant 9.99999974E-6 : f32
    %110 = vector.broadcast %cst_130 : f32 to vector<1x128xf32>
    %111 = arith.addf %107, %110 : vector<1x128xf32>
    %112 = math.rsqrt %111 : vector<1x128xf32>
    %113 = vector.broadcast %112 : vector<1x128xf32> to vector<256x128xf32>
    %114 = arith.mulf %109, %113 : vector<256x128xf32>
    %115 = vector.shape_cast %114 : vector<256x128xf32> to vector<16x16x128xf32>
    %116 = arith.addf %115, %1 : vector<16x16x128xf32>
    %117 = vector.shape_cast %116 : vector<16x16x128xf32> to vector<1x16x16x128xf32>
    %c0_131 = arith.constant 0 : index
    %c0_132 = arith.constant 0 : index
    %c0_133 = arith.constant 0 : index
    %c0_134 = arith.constant 0 : index
    %118 = vector.load %arg4[%c0_131, %c0_132, %c0_133, %c0_134] : memref<1x16x16x128xf32, #tpu.memory_space<vmem>>, vector<1x16x16x128xf32>
    tpu.vector_store %arg4[%c0_131, %c0_132, %c0_133, %c0_134], %117 {strides = array<i32>} : memref<1x16x16x128xf32, #tpu.memory_space<vmem>>, vector<1x16x16x128xf32>,
    return
  }
  func.func @transform_0(%arg0: i32) -> (i32, i32, i32, i32) {
    %c0_i32 = arith.constant 0 : i32
    %c0_i32_0 = arith.constant 0 : i32
    %c0_i32_1 = arith.constant 0 : i32
    %c0_i32_2 = arith.constant 0 : i32
    return %arg0, %c0_i32, %c0_i32_0, %c0_i32_1 : i32, i32, i32, i32
  }
  func.func @transform_1(%arg0: i32) -> (i32, i32, i32) {
    %c0_i32 = arith.constant 0 : i32
    %c0_i32_0 = arith.constant 0 : i32
    %c0_i32_1 = arith.constant 0 : i32
    %c0_i32_2 = arith.constant 0 : i32
    return %c0_i32, %c0_i32_0, %c0_i32_1 : i32, i32, i32
  }
  func.func @transform_2(%arg0: i32) -> (i32, i32, i32) {
    %c0_i32 = arith.constant 0 : i32
    %c0_i32_0 = arith.constant 0 : i32
    %c0_i32_1 = arith.constant 0 : i32
    %c0_i32_2 = arith.constant 0 : i32
    return %c0_i32, %c0_i32_0, %c0_i32_1 : i32, i32, i32
  }
  func.func @transform_3(%arg0: i32) -> (i32, i32, i32, i32) {
    %c0_i32 = arith.constant 0 : i32
    %c0_i32_0 = arith.constant 0 : i32
    %c0_i32_1 = arith.constant 0 : i32
    %c0_i32_2 = arith.constant 0 : i32
    return %arg0, %c0_i32, %c0_i32_0, %c0_i32_1 : i32, i32, i32, i32
  }
}

</mosaic_0001>

<bundles_post_ra>
// kernel: resnet_block_forward.1
= control target key start
LH: loop header
LB: loop body
LE: loop exit
PB: predicated region body
PF: predicated region fallthrough
CT: control target
= control target key end

     0   :  { %8 = vsyncpa [#allocation4], 0  ;;  %s6032_s12 = smov 0   ;;  %s8943_s0 = inlined_call_operand.vmem [shape: f32[2,16,16,128], index: 0, kind: input, shape index: {}]   ;;  %s8944_s1 = inlined_call_operand.vmem [shape: f32[3,384,128], index: 1, kind: input, shape index: {}]   ;;  %s8945_s2 = inlined_call_operand.hbm [shape: f32[3,384,128], index: 2, kind: input, shape index: {}]   ;;  %s8946_s3 = inlined_call_operand.vmem [shape: f32[2,16,16,128], index: 3, kind: output, shape index: {}]  }
   0x1 LB: > { %s6038_s13 = sadd.s32 4294967295, %s6006_s12   ;;  %p4583_p0 = scmp.ge.s32.totalorder %s6006_s12, 1  ;;  %s6006_s12 = sphi %s6032_s12, %s14_s12  }
   0x2   : > { %p113_p1 = scmp.lt.s32.totalorder %s6006_s12, 3  ;;  %s6008_s14 = smov [#allocation3]  }
   0x3   : > { %s128_s15 = sshll.u32 %s6008_s14, 4  ;;  %p8947_p3 = scmp.eq.s32.totalorder %s6038_s13, 0  ;;  %s129_s15 = int_to_ptr.vmem [resolvable:$true] %s128_s15 }
   0x4   : > { %p6042_p2 = pnand %p4583_p0, %p113_p1  ;;  %s5968_s20 = scalar_lea.hbm %s8945_s2, 18432 }
   0x5   : > { %p5969_p6 = scmp.ne.s32.totalorder %s8945_s2, %s5968_s20  ;;  %p5975_p10 = scmp.lt.u32.totalorder %s5968_s20, %s8945_s2 }
   0x6   : > { %s9017_s16 = scalar_select %p6042_p2, 1, 0 }
   0x7   : > { %p5944_p4 = pneg %p6042_p2 }
   0x9   : > { %p6051_p5 = pnand %p8947_p3, %p5944_p4 }
   0xb   : > { %p5970_p7 = pneg %p6051_p5 }
   0xd   : > { %p5971_p8 = pnand %p5970_p7, %p5969_p6 }
   0xf   : > { %p5972_p9 = pneg %p5971_p8 }
  0x11   : > { %p5977_p11 = pnand %p5975_p10, %p5972_p9 }
  0x13   : > { %5980 = shalt.err (!%p5977_p11)
}
  0x14   : > { %s5981_s25 = scalar_lea.vmem %s129_s15, 18432  ;;  %p5989_p1 = scmp.lt.s32.totalorder %s129_s15, %s129_s15 }
  0x15   : > { %p5982_p12 = scmp.ne.s32.totalorder %s129_s15, %s5981_s25  ;;  %p5990_p4 = scmp.lt.s32.totalorder %s5981_s25, %s5981_s25 }
  0x17   : > { %p5984_p13 = pnand %p5982_p12, %p5970_p7  ;;  %p5991_p3 = por %p5990_p4, %p5989_p1 }
  0x19   : > { %p5985_p0 = pneg %p5984_p13 }
  0x1b   : > { %p5992_p2 = pnand %p5991_p3, %p5985_p0 }
  0x1d   : > { %5995 = shalt.err (!%p5992_p2)
}
  0x1e   : > { %s6009_s26 = smov 128   ;;  %s6010_s27 = smov 8  }
  0x1f   : > { %5947 = dma.hbm_to_vmem [thread:$0]  (!%p6051_p5), %s8945_s2, 18432, %s129_s15, [#allocation4], %s6009_s26, %s6009_s26, %s6010_s27  }
  0x20   : > { %p9019_p6 = scmp.ne.s32.totalorder %s9017_s16, 0 }
  0x22   : > { %152 = sbr.rel (%p9019_p6) target bundleno = 1432 (0x598), region = 32 }
  0x29   : > { %p9020_p8 = scmp.eq.s32.totalorder %s6038_s13, 0 }
  0x2b   : > { %6001 = dma.done.wait (%p9020_p8), [#allocation4], 18432   ;;  %p9021_p7 = pmov %p9020_p8 }
  0x2c   : > { %v8949_v0 = vmov 0.0|0.0   ;;  %p176_p2 = scmp.lt.s32.totalorder %s6038_s13, 1  ;;  %v4592_v1 = vld [vmem:[%s8944_s1 + $0x180] sm:$0xff]  ;;  %v4593_v2 = vld [vmem:[%s8944_s1 + $0x188] sm:$0xff]  ;;  %v4594_v6 = vld [vmem:[%s8944_s1 + $0x190] sm:$0xff] }
  0x2d   : > { %6003 = vsyncadd (%p9021_p7), [#allocation4], 4294948864  ;;  %5460 = vmatprep.subr.bf16.mxu0 %v8949_v0  ;;  %v4624_v3 = vld [vmem:[%s8944_s1 + $0x280] sm:$0xff]  ;;  %v5461_v4 = vpack.c.bf16 %v4593_v2, %v4592_v1  ;;  %v4625_v5 = vld [vmem:[%s8944_s1 + $0x288] sm:$0xff] }
  0x2e   : > { %v4595_v7 = vld [vmem:[%s8944_s1 + $0x198] sm:$0xff]  ;;  %s9137_s13 = smov (!%p176_p2, %s6038_s13), 1  ;;  %v5508_v8 = vpack.c.bf16 %v4625_v5, %v4624_v3  ;;  %v4626_v9 = vld [vmem:[%s8944_s1 + $0x290] sm:$0xff]  ;;  %v4628_v13 = vld [vmem:[%s8944_s1 + $0x2a0] sm:$0xff] }
  0x2f   : > { %v4627_v10 = vld [vmem:[%s8944_s1 + $0x298] sm:$0xff]  ;;  %5462 = vmatpush1.bf16.msra.mxu0 %v5461_v4  ;;  %v5464_v11 = vpack.c.bf16 %v4595_v7, %v4594_v6  ;;  %v4629_v14 = vld [vmem:[%s8944_s1 + $0x2a8] sm:$0xff]  ;;  %v4596_v15 = vld [vmem:[%s8944_s1 + $0x1a0] sm:$0xff]  ;;  %s4690_s29 = sshll.u32 %s9137_s13, 8 }
  0x30   : > { %v5512_v12 = vpack.c.bf16 %v4627_v10, %v4626_v9  ;;  %5509 = vmatprep.subr.bf16.mxu1 %v5508_v8  ;;  %5463 = vmatprep.subr.bf16.mxu0 %v8949_v0  ;;  %v4597_v16 = vld [vmem:[%s8944_s1 + $0x1a8] sm:$0xff]  ;;  %v5516_v17 = vpack.c.bf16 %v4629_v14, %v4628_v13  ;;  %v4630_v19 = vld [vmem:[%s8944_s1 + $0x2b0] sm:$0xff]  ;;  %v4631_v20 = vld [vmem:[%s8944_s1 + $0x2b8] sm:$0xff]  ;;  %s6138_s15 = scalar_lea.vmem %s8943_s0, %s4690_s29  ;;  %s8870_s10 = scalar_lea.vmem %s8946_s3, %s4690_s29 }
  0x31   : > { %5511 = vmatpush3.bf16.msra.mxu1 %v5508_v8  ;;  %v5467_v18 = vpack.c.bf16 %v4597_v16, %v4596_v15  ;;  %v4598_v21 = vld [vmem:[%s8944_s1 + $0x1b0] sm:$0xff]  ;;  %v4599_v22 = vld [vmem:[%s8944_s1 + $0x1b8] sm:$0xff]  ;;  %v5520_v23 = vpack.c.bf16 %v4631_v20, %v4630_v19  ;;  %v6141_v24 = vld [vmem:[%s6138_s15] sm:$0xff] }
  0x32   : > { %5513 = vmatprep.subr.bf16.mxu1 %v5512_v12  ;;  %9022 = vst [vmem:[#allocation6_spill] sm:$0xff] %v6141_v24  ;;  %v5470_v25 = vpack.c.bf16 %v4599_v22, %v4598_v21  ;;  %v4632_v26 = vld [vmem:[%s8944_s1 + $0x2c0] sm:$0xff]  ;;  %v4633_v27 = vld [vmem:[%s8944_s1 + $0x2c8] sm:$0xff]  ;;  %219 = vst [vmem:[#allocation2 + $0x19] sm:$0xff] %v6141_v24  ;;  %681 = vmatprep.mubr.f32.mxu0 %v6141_v24 }
  0x33   : > { %5465 = vmatpush1.bf16.msra.mxu0 %v5464_v11  ;;  %v6150_v28 = vld [vmem:[%s6138_s15 + $0x8] sm:$0xff]  ;;  %v4600_v29 = vld [vmem:[%s8944_s1 + $0x1c0] sm:$0xff]  ;;  %v6163_v31 = vld [vmem:[%s6138_s15 + $0x10] sm:$0xff]  ;;  %v5524_v33 = vpack.c.bf16 %v4633_v27, %v4632_v26 }
  0x34   : > { %5466 = vmatprep.subr.bf16.mxu0 %v8949_v0  ;;  %9023 = vst [vmem:[#allocation7_spill] sm:$0xff] %v6150_v28  ;;  %v4601_v30 = vld [vmem:[%s8944_s1 + $0x1c8] sm:$0xff]  ;;  %220 = vst [vmem:[#allocation2 + $0x21] sm:$0xff] %v6150_v28  ;;  %v6166_v32 = vld [vmem:[%s6138_s15 + $0x18] sm:$0xff] }
  0x35   : > { %5515 = vmatpush3.bf16.msra.mxu1 %v5512_v12  ;;  %9024 = vst [vmem:[#allocation8_spill] sm:$0xff] %v6163_v31  ;;  %9025 = vst [vmem:[#allocation9_spill] sm:$0xff] %v6166_v32  ;;  %v6173_v34 = vld [vmem:[%s6138_s15 + $0x20] sm:$0xff]  ;;  %v5473_v35 = vpack.c.bf16 %v4601_v30, %v4600_v29  ;;  %v4634_v36 = vld [vmem:[%s8944_s1 + $0x2d0] sm:$0xff] }
  0x36   : > { %5517 = vmatprep.subr.bf16.mxu1 %v5516_v17  ;;  %221 = vst [vmem:[#allocation2 + $0x31] sm:$0xff] %v6163_v31  ;;  %251 = vst [vmem:[#allocation2 + $0x1] sm:$0xff] %v6163_v31  ;;  %v4635_v37 = vld [vmem:[%s8944_s1 + $0x2d8] sm:$0xff]  ;;  %v6182_v38 = vld [vmem:[%s6138_s15 + $0x28] sm:$0xff] }
  0x37   : > { %5468 = vmatpush1.bf16.msra.mxu0 %v5467_v18  ;;  %222 = vst [vmem:[#allocation2 + $0x39] sm:$0xff] %v6166_v32  ;;  %252 = vst [vmem:[#allocation2 + $0x9] sm:$0xff] %v6166_v32  ;;  %v4602_v39 = vld [vmem:[%s8944_s1 + $0x1d0] sm:$0xff]  ;;  %v4603_v40 = vld [vmem:[%s8944_s1 + $0x1d8] sm:$0xff]  ;;  %v5528_v43 = vpack.c.bf16 %v4635_v37, %v4634_v36 }
  0x38   : > { %5469 = vmatprep.subr.bf16.mxu0 %v8949_v0  ;;  %9026 = vst [vmem:[#allocation10_spill] sm:$0xff] %v6173_v34  ;;  %9027 = vst [vmem:[#allocation11_spill] sm:$0xff] %v6182_v38  ;;  %v6194_v41 = vld [vmem:[%s6138_s15 + $0x30] sm:$0xff]  ;;  %v6197_v42 = vld [vmem:[%s6138_s15 + $0x38] sm:$0xff]  ;;  %v5476_v47 = vpack.c.bf16 %v4603_v40, %v4602_v39 }
  0x39   : > { %5519 = vmatpush3.bf16.msra.mxu1 %v5516_v17  ;;  %223 = vst [vmem:[#allocation2 + $0x49] sm:$0xff] %v6173_v34  ;;  %224 = vst [vmem:[#allocation2 + $0x51] sm:$0xff] %v6182_v38  ;;  %v4636_v44 = vld [vmem:[%s8944_s1 + $0x2e0] sm:$0xff]  ;;  %v4637_v45 = vld [vmem:[%s8944_s1 + $0x2e8] sm:$0xff] }
  0x3a   : > { %5521 = vmatprep.subr.bf16.mxu1 %v5520_v23  ;;  %9028 = vst [vmem:[#allocation12_spill] sm:$0xff] %v6194_v41  ;;  %9029 = vst [vmem:[#allocation13_spill] sm:$0xff] %v6197_v42  ;;  %v6208_v46 = vld [vmem:[%s6138_s15 + $0x40] sm:$0xff]  ;;  %v6211_v50 = vld [vmem:[%s6138_s15 + $0x48] sm:$0xff]  ;;  %v5532_v54 = vpack.c.bf16 %v4637_v45, %v4636_v44 }
  0x3b   : > { %5471 = vmatpush1.bf16.msra.mxu0 %v5470_v25  ;;  %225 = vst [vmem:[#allocation2 + $0x61] sm:$0xff] %v6194_v41  ;;  %226 = vst [vmem:[#allocation2 + $0x69] sm:$0xff] %v6197_v42  ;;  %v536_v48 = vld [vmem:[#allocation2 + $0x1a] sm:$0xff]  ;;  %v293_v49 = vld [vmem:[#allocation2 + $0x27] sm:$0x1] }
  0x3c   : > { %5472 = vmatprep.subr.bf16.mxu0 %v8949_v0  ;;  %9030 = vst [vmem:[#allocation14_spill] sm:$0xff] %v6208_v46  ;;  %9031 = vst [vmem:[#allocation15_spill] sm:$0xff] %v6211_v50  ;;  %v4604_v51 = vld [vmem:[%s8944_s1 + $0x1e0] sm:$0xff]  ;;  %v4605_v52 = vld [vmem:[%s8944_s1 + $0x1e8] sm:$0xff]  ;;  %5012 = vmatprep.mubr.f32.mxu1 %v536_v48 }
  0x3d   : > { %5523 = vmatpush3.bf16.msra.mxu1 %v5520_v23  ;;  %227 = vst [vmem:[#allocation2 + $0x79] sm:$0xff] %v6208_v46  ;;  %311 = vst [vmem:[#allocation2 + $0x29] sm:$0x1] %v293_v49  ;;  %v6223_v55 = vld [vmem:[%s6138_s15 + $0x50] sm:$0xff]  ;;  %v6226_v56 = vld [vmem:[%s6138_s15 + $0x58] sm:$0xff]  ;;  %v5479_v57 = vpack.c.bf16 %v4605_v52, %v4604_v51 }
  0x3e   : > { %5525 = vmatprep.subr.bf16.mxu1 %v5524_v33  ;;  %228 = vst [vmem:[#allocation2 + $0x81] sm:$0xff] %v6211_v50  ;;  %v294_v53 = vld [vmem:[#allocation2 + $0x3f] sm:$0x1]  ;;  %9032 = vst [vmem:[#allocation16_spill] sm:$0xff] %v6223_v55  ;;  %v4638_v58 = vld [vmem:[%s8944_s1 + $0x2f0] sm:$0xff] }
  0x3f   : > { %5474 = vmatpush1.bf16.msra.mxu0 %v5473_v35  ;;  %312 = vst [vmem:[#allocation2 + $0x41] sm:$0x1] %v294_v53  ;;  %9033 = vst [vmem:[#allocation17_spill] sm:$0xff] %v6226_v56  ;;  %v4639_v59 = vld [vmem:[%s8944_s1 + $0x2f8] sm:$0xff]  ;;  %v4606_v61 = vld [vmem:[%s8944_s1 + $0x1f0] sm:$0xff] }
  0x40   : > { %5475 = vmatprep.subr.bf16.mxu0 %v8949_v0  ;;  %v295_v60 = vld [vmem:[#allocation2 + $0x57] sm:$0x1]  ;;  %229 = vst [vmem:[#allocation2 + $0x91] sm:$0xff] %v6223_v55  ;;  %230 = vst [vmem:[#allocation2 + $0x99] sm:$0xff] %v6226_v56  ;;  %v4607_v62 = vld [vmem:[%s8944_s1 + $0x1f8] sm:$0xff]  ;;  %v5536_v3 = vpack.c.bf16 %v4639_v59, %v4638_v58 }
  0x41   : > { %5527 = vmatpush3.bf16.msra.mxu1 %v5524_v33  ;;  %313 = vst [vmem:[#allocation2 + $0x59] sm:$0x1] %v295_v60  ;;  %v6244_v63 = vld [vmem:[%s6138_s15 + $0x60] sm:$0xff]  ;;  %v6247_v2 = vld [vmem:[%s6138_s15 + $0x68] sm:$0xff]  ;;  %v5482_v4 = vpack.c.bf16 %v4607_v62, %v4606_v61  ;;  %v6259_v8 = vld [vmem:[%s6138_s15 + $0x70] sm:$0xff] }
  0x42   : > { %5529 = vmatprep.subr.bf16.mxu1 %v5528_v43  ;;  %9034 = vst [vmem:[#allocation18_spill] sm:$0xff] %v6244_v63  ;;  %v296_v1 = vld [vmem:[#allocation2 + $0x6f] sm:$0x1]  ;;  %9035 = vst [vmem:[#allocation19_spill] sm:$0xff] %v6247_v2  ;;  %v4608_v5 = vld [vmem:[%s8944_s1 + $0x200] sm:$0xff] }
  0x43   : > { %5477 = vmatpush1.bf16.msra.mxu0 %v5476_v47  ;;  %231 = vst [vmem:[#allocation2 + $0xa9] sm:$0xff] %v6244_v63  ;;  %314 = vst [vmem:[#allocation2 + $0x71] sm:$0x1] %v296_v1  ;;  %v4609_v7 = vld [vmem:[%s8944_s1 + $0x208] sm:$0xff]  ;;  %v6262_v9 = vld [vmem:[%s6138_s15 + $0x78] sm:$0xff] }
  0x44   : > { %5478 = vmatprep.subr.bf16.mxu0 %v8949_v0  ;;  %232 = vst [vmem:[#allocation2 + $0xb1] sm:$0xff] %v6247_v2  ;;  %9036 = vst [vmem:[#allocation20_spill] sm:$0xff] %v6259_v8  ;;  %v424_v10 = vld [vmem:[%s8944_s1] sm:$0xff]  ;;  %v425_v11 = vld [vmem:[%s8944_s1 + $0x8] sm:$0xff]  ;;  %v5485_v13 = vpack.c.bf16 %v4609_v7, %v4608_v5 }
  0x45   : > { %5531 = vmatpush3.bf16.msra.mxu1 %v5528_v43  ;;  %v297_v6 = vld [vmem:[#allocation2 + $0x87] sm:$0x1]  ;;  %233 = vst [vmem:[#allocation2 + $0xc1] sm:$0xff] %v6259_v8  ;;  %234 = vst [vmem:[#allocation2 + $0xc9] sm:$0xff] %v6262_v9  ;;  %v4610_v14 = vld [vmem:[%s8944_s1 + $0x210] sm:$0xff]  ;;  %v5541_v20 = vpack.c.bf16 %v425_v11, %v424_v10 }
  0x46   : > { %5533 = vmatprep.subr.bf16.mxu1 %v5532_v54  ;;  %315 = vst [vmem:[#allocation2 + $0x89] sm:$0x1] %v297_v6  ;;  %v257_v15 = vld [vmem:[#allocation2 + $0x1a] sm:$0x1]  ;;  %v6280_v17 = vld [vmem:[%s6138_s15 + $0x80] sm:$0xff]  ;;  %v6283_v18 = vld [vmem:[%s6138_s15 + $0x88] sm:$0xff] }
  0x47   : > { %5480 = vmatpush1.bf16.msra.mxu0 %v5479_v57  ;;  %v298_v12 = vld [vmem:[#allocation2 + $0x9f] sm:$0x1]  ;;  %275 = vst [vmem:[#allocation2 + $0x18] sm:$0x1] %v257_v15  ;;  %9037 = vst [vmem:[#allocation21_spill] sm:$0xff] %v6280_v17  ;;  %v537_v19 = vld [vmem:[#allocation2 + $0x22] sm:$0xff] }
  0x48   : > { %5481 = vmatprep.subr.bf16.mxu0 %v8949_v0  ;;  %316 = vst [vmem:[#allocation2 + $0xa1] sm:$0x1] %v298_v12  ;;  %v4611_v16 = vld [vmem:[%s8944_s1 + $0x218] sm:$0xff]  ;;  %9038 = vst [vmem:[#allocation22_spill] sm:$0xff] %v6283_v18  ;;  %v426_v21 = vld [vmem:[%s8944_s1 + $0x10] sm:$0xff] }
  0x49   : > { %5535 = vmatpush3.bf16.msra.mxu1 %v5532_v54  ;;  %235 = vst [vmem:[#allocation2 + $0xd9] sm:$0xff] %v6280_v17  ;;  %236 = vst [vmem:[#allocation2 + $0xe1] sm:$0xff] %v6283_v18  ;;  %v538_v23 = vld [vmem:[#allocation2 + $0x32] sm:$0xff]  ;;  %v5488_v27 = vpack.c.bf16 %v4611_v16, %v4610_v14  ;;  %v4612_v29 = vld [vmem:[%s8944_s1 + $0x220] sm:$0xff] }
  0x4a   : > { %5537 = vmatprep.subr.bf16.mxu1 %v5536_v3  ;;  %v427_v25 = vld [vmem:[%s8944_s1 + $0x18] sm:$0xff]  ;;  %v6295_v26 = vld [vmem:[%s6138_s15 + $0x90] sm:$0xff]  ;;  %v4613_v35 = vld [vmem:[%s8944_s1 + $0x228] sm:$0xff] }
  0x4b   : > { %5483 = vmatpush1.bf16.msra.mxu0 %v5482_v4  ;;  %v299_v22 = vld [vmem:[#allocation2 + $0xb7] sm:$0x1]  ;;  %9039 = vst [vmem:[#allocation23_spill] sm:$0xff] %v6295_v26  ;;  %v6301_v30 = vld [vmem:[%s6138_s15 + $0x98] sm:$0xff]  ;;  %237 = vst [vmem:[#allocation2 + $0xf1] sm:$0xff] %v6295_v26  ;;  %v5544_v37 = vpack.c.bf16 %v427_v25, %v426_v21  ;;  %v5491_v48 = vpack.c.bf16 %v4613_v35, %v4612_v29 }
  0x4c   : > { %5484 = vmatprep.subr.bf16.mxu0 %v8949_v0  ;;  %317 = vst [vmem:[#allocation2 + $0xb9] sm:$0x1] %v299_v22  ;;  %9040 = vst [vmem:[#allocation24_spill] sm:$0xff] %v6301_v30  ;;  %v539_v33 = vld [vmem:[#allocation2 + $0x3a] sm:$0xff]  ;;  %v300_v36 = vld [vmem:[#allocation2 + $0xcf] sm:$0x1] }
  0x4d   : > { %5539 = vmatpush3.bf16.msra.mxu1 %v5536_v3  ;;  %238 = vst [vmem:[#allocation2 + $0xf9] sm:$0xff] %v6301_v30  ;;  %318 = vst [vmem:[#allocation2 + $0xd1] sm:$0x1] %v300_v36  ;;  %v258_v39 = vld [vmem:[#allocation2 + $0x32] sm:$0x1]  ;;  %v6310_v40 = vld [vmem:[%s6138_s15 + $0xa0] sm:$0xff] }
  0x4e   : > { %5540 = vmatprep.subr.bf16.mxu1 %v8949_v0  ;;  %9041 = vst [vmem:[#allocation25_spill] sm:$0xff] %v6310_v40  ;;  %v6313_v43 = vld [vmem:[%s6138_s15 + $0xa8] sm:$0xff]  ;;  %v428_v45 = vld [vmem:[%s8944_s1 + $0x20] sm:$0xff]  ;;  %276 = vst [vmem:[#allocation2 + $0x30] sm:$0x1] %v258_v39 }
  0x4f   : > { %5486 = vmatpush1.bf16.msra.mxu0 %v5485_v13  ;;  %9042 = vst [vmem:[#allocation26_spill] sm:$0xff] %v6313_v43  ;;  %v540_v44 = vld [vmem:[#allocation2 + $0x4a] sm:$0xff]  ;;  %239 = vst [vmem:[#allocation2 + $0x109] sm:$0xff] %v6310_v40  ;;  %v4615_v51 = vld [vmem:[%s8944_s1 + $0x238] sm:$0xff] }
  0x50   : > { %5013 = vmatmul.mubr.f32.vlgmr.msra.gmra.mrb[0].mxu1 %v537_v19  ;;  %5487 = vmatprep.subr.bf16.mxu0 %v8949_v0  ;;  %v429_v47 = vld [vmem:[%s8944_s1 + $0x28] sm:$0xff]  ;;  %240 = vst [vmem:[#allocation2 + $0x111] sm:$0xff] %v6313_v43  ;;  %v4614_v49 = vld [vmem:[%s8944_s1 + $0x230] sm:$0xff]  ;;  %v301_v54 = vld [vmem:[#allocation2 + $0xe7] sm:$0x1] }
  0x51   : > { %5542 = vmatpush1.bf16.msra.mxu1 %v5541_v20  ;;  %5015 = vmatprep.mubr.f32.mxu1 %v538_v23  ;;  %v6331_v52 = vld [vmem:[%s6138_s15 + $0xb0] sm:$0xff]  ;;  %v6338_v57 = vld [vmem:[%s6138_s15 + $0xb8] sm:$0xff]  ;;  %v5547_v59 = vpack.c.bf16 %v429_v47, %v428_v45  ;;  %v542_v60 = vld [vmem:[#allocation2 + $0x62] sm:$0xff]  ;;  %319 = vst [vmem:[#allocation2 + $0xe9] sm:$0x1] %v301_v54  ;;  %v5494_v4 = vpack.c.bf16 %v4615_v51, %v4614_v49 }
  0x52   : > { %5543 = vmatprep.subr.bf16.mxu1 %v8949_v0  ;;  %9043 = vst [vmem:[#allocation27_spill] sm:$0xff] %v6331_v52  ;;  %v430_v53 = vld [vmem:[%s8944_s1 + $0x30] sm:$0xff]  ;;  %9044 = vst [vmem:[#allocation28_spill] sm:$0xff] %v6338_v57  ;;  %v431_v61 = vld [vmem:[%s8944_s1 + $0x38] sm:$0xff] }
  0x53   : > { %5489 = vmatpush1.bf16.msra.mxu0 %v5488_v27  ;;  %241 = vst [vmem:[#allocation2 + $0x121] sm:$0xff] %v6331_v52  ;;  %v541_v58 = vld [vmem:[#allocation2 + $0x52] sm:$0xff]  ;;  %242 = vst [vmem:[#allocation2 + $0x129] sm:$0xff] %v6338_v57  ;;  %v259_v62 = vld [vmem:[#allocation2 + $0x4a] sm:$0x1]  ;;  %v5550_v12 = vpack.c.bf16 %v431_v61, %v430_v53 }
  0x54   : > { %5016 = vmatmul.mubr.f32.gmra.mrb[2].mxu1 %v539_v33  ;;  %5490 = vmatprep.subr.bf16.mxu0 %v8949_v0  ;;  %v6347_v1 = vld [vmem:[%s6138_s15 + $0xc0] sm:$0xff]  ;;  %v6350_v3 = vld [vmem:[%s6138_s15 + $0xc8] sm:$0xff]  ;;  %v302_v5 = vld [vmem:[#allocation2 + $0xff] sm:$0x1]  ;;  %277 = vst [vmem:[#allocation2 + $0x48] sm:$0x1] %v259_v62 }
  0x55   : > { %5545 = vmatpush1.bf16.msra.mxu1 %v5544_v37  ;;  %5018 = vmatprep.mubr.f32.mxu1 %v540_v44  ;;  %9045 = vst [vmem:[#allocation29_spill] sm:$0xff] %v6347_v1  ;;  %9046 = vst [vmem:[#allocation30_spill] sm:$0xff] %v6350_v3  ;;  %v4616_v6 = vld [vmem:[%s8944_s1 + $0x240] sm:$0xff]  ;;  %v4617_v7 = vld [vmem:[%s8944_s1 + $0x248] sm:$0xff] }
  0x56   : > { %5546 = vmatprep.subr.bf16.mxu1 %v8949_v0  ;;  %243 = vst [vmem:[#allocation2 + $0x139] sm:$0xff] %v6347_v1  ;;  %244 = vst [vmem:[#allocation2 + $0x141] sm:$0xff] %v6350_v3  ;;  %v432_v10 = vld [vmem:[%s8944_s1 + $0x40] sm:$0xff]  ;;  %v543_v11 = vld [vmem:[#allocation2 + $0x6a] sm:$0xff]  ;;  %v5497_v20 = vpack.c.bf16 %v4617_v7, %v4616_v6 }
  0x57   : > { %5492 = vmatpush1.bf16.msra.mxu0 %v5491_v48  ;;  %320 = vst [vmem:[#allocation2 + $0x101] sm:$0x1] %v302_v5  ;;  %v433_v13 = vld [vmem:[%s8944_s1 + $0x48] sm:$0xff]  ;;  %v303_v14 = vld [vmem:[#allocation2 + $0x117] sm:$0x1]  ;;  %v544_v15 = vld [vmem:[#allocation2 + $0x7a] sm:$0xff] }
  0x58   : > { %5019 = vmatmul.mubr.f32.gmra.mrb[4].mxu1 %v541_v58  ;;  %5493 = vmatprep.subr.bf16.mxu0 %v8949_v0  ;;  %321 = vst [vmem:[#allocation2 + $0x119] sm:$0x1] %v303_v14  ;;  %v6369_v16 = vld [vmem:[%s6138_s15 + $0xd0] sm:$0xff]  ;;  %v6372_v19 = vld [vmem:[%s6138_s15 + $0xd8] sm:$0xff]  ;;  %v260_v21 = vld [vmem:[#allocation2 + $0x62] sm:$0x1]  ;;  %v5553_v33 = vpack.c.bf16 %v433_v13, %v432_v10 }
  0x59   : > { %5548 = vmatpush1.bf16.msra.mxu1 %v5547_v59  ;;  %5021 = vmatprep.mubr.f32.mxu1 %v542_v60  ;;  %9047 = vst [vmem:[#allocation31_spill] sm:$0xff] %v6369_v16  ;;  %9048 = vst [vmem:[#allocation32_spill] sm:$0xff] %v6372_v19  ;;  %v6377_v22 = vld [vmem:[%s6138_s15 + $0xe0] sm:$0xff]  ;;  %v4618_v23 = vld [vmem:[%s8944_s1 + $0x250] sm:$0xff] }
  0x5a   : > { %5549 = vmatprep.subr.bf16.mxu1 %v8949_v0  ;;  %245 = vst [vmem:[#allocation2 + $0x151] sm:$0xff] %v6369_v16  ;;  %246 = vst [vmem:[#allocation2 + $0x159] sm:$0xff] %v6372_v19  ;;  %v4619_v25 = vld [vmem:[%s8944_s1 + $0x258] sm:$0xff]  ;;  %v304_v27 = vld [vmem:[#allocation2 + $0x12f] sm:$0x1] }
  0x5b   : > { %5495 = vmatpush1.bf16.msra.mxu0 %v5494_v4  ;;  %278 = vst [vmem:[#allocation2 + $0x60] sm:$0x1] %v260_v21  ;;  %247 = vst [vmem:[#allocation2 + $0x169] sm:$0xff] %v6377_v22  ;;  %v545_v29 = vld [vmem:[#allocation2 + $0x82] sm:$0xff]  ;;  %v434_v35 = vld [vmem:[%s8944_s1 + $0x50] sm:$0xff]  ;;  %v5500_v45 = vpack.c.bf16 %v4619_v25, %v4618_v23 }
  0x5c   : > { %5022 = vmatmul.mubr.f32.gmra.mrb[6].mxu1 %v543_v11  ;;  %5496 = vmatprep.subr.bf16.mxu0 %v8949_v0  ;;  %254 = vst [vmem:[#allocation2 + $0x199] sm:$0xff] %v6377_v22  ;;  %322 = vst [vmem:[#allocation2 + $0x131] sm:$0x1] %v304_v27  ;;  %v6392_v36 = vld [vmem:[%s6138_s15 + $0xe8] sm:$0xff]  ;;  %v546_v37 = vld [vmem:[#allocation2 + $0x92] sm:$0xff] }
  0x5d   : > { %5551 = vmatpush1.bf16.msra.mxu1 %v5550_v12  ;;  %5024 = vmatprep.mubr.f32.mxu1 %v544_v15  ;;  %9049 = vst [vmem:[#allocation33_spill] sm:$0xff] %v6392_v36  ;;  %v435_v39 = vld [vmem:[%s8944_s1 + $0x58] sm:$0xff]  ;;  %v305_v44 = vld [vmem:[#allocation2 + $0x147] sm:$0x1]  ;;  %248 = vst [vmem:[#allocation2 + $0x171] sm:$0xff] %v6392_v36 }
  0x5e   : > { %5552 = vmatprep.subr.bf16.mxu1 %v8949_v0  ;;  %255 = vst [vmem:[#allocation2 + $0x1a1] sm:$0xff] %v6392_v36  ;;  %323 = vst [vmem:[#allocation2 + $0x149] sm:$0x1] %v305_v44  ;;  %v6401_v47 = vld [vmem:[%s6138_s15 + $0xf0] sm:$0xff]  ;;  %v4620_v48 = vld [vmem:[%s8944_s1 + $0x260] sm:$0xff]  ;;  %v5556_v54 = vpack.c.bf16 %v435_v39, %v434_v35 }
  0x5f   : > { %5498 = vmatpush1.bf16.msra.mxu0 %v5497_v20  ;;  %9050 = vst [vmem:[#allocation34_spill] sm:$0xff] %v6401_v47  ;;  %v4621_v49 = vld [vmem:[%s8944_s1 + $0x268] sm:$0xff]  ;;  %v6411_v51 = vld [vmem:[%s6138_s15 + $0xf8] sm:$0xff]  ;;  %249 = vst [vmem:[#allocation2 + $0x181] sm:$0xff] %v6401_v47 }
  0x60   : > { %5025 = vmatmul.mubr.f32.gmra.mrb[8].mxu1 %v545_v29  ;;  %5499 = vmatprep.subr.bf16.mxu0 %v8949_v0  ;;  %9051 = vst [vmem:[#allocation35_spill] sm:$0xff] %v6411_v51  ;;  %v547_v53 = vld [vmem:[#allocation2 + $0x9a] sm:$0xff]  ;;  %v437_v59 = vld [vmem:[%s8944_s1 + $0x68] sm:$0xff]  ;;  %250 = vst [vmem:[#allocation2 + $0x189] sm:$0xff] %v6411_v51  ;;  %v5503_v4 = vpack.c.bf16 %v4621_v49, %v4620_v48 }
  0x61   : > { %5554 = vmatpush1.bf16.msra.mxu1 %v5553_v33  ;;  %5027 = vmatprep.mubr.f32.mxu1 %v546_v37  ;;  %v436_v58 = vld [vmem:[%s8944_s1 + $0x60] sm:$0xff]  ;;  %v548_v60 = vld [vmem:[#allocation2 + $0xaa] sm:$0xff]  ;;  %v306_v61 = vld [vmem:[#allocation2 + $0x15f] sm:$0x1] }
  0x62   : > { %5555 = vmatprep.subr.bf16.mxu1 %v8949_v0  ;;  %v261_v62 = vld [vmem:[#allocation2 + $0x7a] sm:$0x1]  ;;  %v4622_v5 = vld [vmem:[%s8944_s1 + $0x270] sm:$0xff]  ;;  %324 = vst [vmem:[#allocation2 + $0x161] sm:$0x1] %v306_v61  ;;  %v5559_v12 = vpack.c.bf16 %v437_v59, %v436_v58  ;;  %v456_v14 = vld [vmem:[%s8944_s1 + $0x100] sm:$0xff] }
  0x63   : > { %5501 = vmatpush1.bf16.msra.mxu0 %v5500_v45  ;;  %279 = vst [vmem:[#allocation2 + $0x78] sm:$0x1] %v261_v62  ;;  %v256_v6 = vld [vmem:[#allocation2 + $0x2] sm:$0x1]  ;;  %v549_v7 = vld [vmem:[#allocation2 + $0xb2] sm:$0xff]  ;;  %v457_v15 = vld [vmem:[%s8944_s1 + $0x108] sm:$0xff] }
  0x64   : > { %5028 = vmatmul.mubr.f32.gmra.mrb[10].mxu1 %v547_v53  ;;  %5502 = vmatprep.subr.bf16.mxu0 %v8949_v0  ;;  %v4623_v10 = vld [vmem:[%s8944_s1 + $0x278] sm:$0xff]  ;;  %v438_v11 = vld [vmem:[%s8944_s1 + $0x70] sm:$0xff]  ;;  %274 = vst [vmem:[#allocation2] sm:$0x1] %v256_v6  ;;  %v550_v20 = vld [vmem:[#allocation2 + $0xc2] sm:$0xff]  ;;  %v5588_v33 = vpack.c.bf16 %v457_v15, %v456_v14 }
  0x65   : > { %5557 = vmatpush1.bf16.msra.mxu1 %v5556_v54  ;;  %5030 = vmatprep.mubr.f32.mxu1 %v548_v60  ;;  %v307_v13 = vld [vmem:[#allocation2 + $0x177] sm:$0x1]  ;;  %v439_v21 = vld [vmem:[%s8944_s1 + $0x78] sm:$0xff]  ;;  %v262_v23 = vld [vmem:[#allocation2 + $0x92] sm:$0x1]  ;;  %v5506_v25 = vpack.c.bf16 %v4623_v10, %v4622_v5 }
  0x66   : > { %5558 = vmatprep.subr.bf16.mxu1 %v8949_v0  ;;  %325 = vst [vmem:[#allocation2 + $0x179] sm:$0x1] %v307_v13  ;;  %280 = vst [vmem:[#allocation2 + $0x90] sm:$0x1] %v262_v23  ;;  %v551_v27 = vld [vmem:[#allocation2 + $0xca] sm:$0xff]  ;;  %v5562_v35 = vpack.c.bf16 %v439_v21, %v438_v11  ;;  %v459_v39 = vld [vmem:[%s8944_s1 + $0x118] sm:$0xff] }
  0x67   : > { %5504 = vmatpush1.bf16.msra.mxu0 %v5503_v4  ;;  %v308_v29 = vld [vmem:[#allocation2 + $0x18f] sm:$0x1]  ;;  %v458_v37 = vld [vmem:[%s8944_s1 + $0x110] sm:$0xff]  ;;  %v263_v44 = vld [vmem:[#allocation2 + $0xaa] sm:$0x1] }
  0x68   : > { %5031 = vmatmul.mubr.f32.gmra.mrb[12].mxu1 %v549_v7  ;;  %5505 = vmatprep.subr.bf16.mxu0 %v8949_v0  ;;  %326 = vst [vmem:[#allocation2 + $0x191] sm:$0x1] %v308_v29  ;;  %v552_v45 = vld [vmem:[#allocation2 + $0xda] sm:$0xff]  ;;  %v441_v49 = vld [vmem:[%s8944_s1 + $0x88] sm:$0xff]  ;;  %281 = vst [vmem:[#allocation2 + $0xa8] sm:$0x1] %v263_v44  ;;  %v5592_v59 = vpack.c.bf16 %v459_v39, %v458_v37 }
  0x69   : > { %5560 = vmatpush1.bf16.msra.mxu1 %v5559_v12  ;;  %5033 = vmatprep.mubr.f32.mxu1 %v550_v20  ;;  %v440_v48 = vld [vmem:[%s8944_s1 + $0x80] sm:$0xff]  ;;  %v6456_v53 = vld [vmem:[#allocation2 + $0x18] sm:$0xff]  ;;  %v461_v62 = vld [vmem:[%s8944_s1 + $0x128] sm:$0xff] }
  0x6a   : > { %5561 = vmatprep.subr.bf16.mxu1 %v8949_v0  ;;  %v264_v54 = vld [vmem:[#allocation2 + $0xc2] sm:$0x1]  ;;  %v5565_v60 = vpack.c.bf16 %v441_v49, %v440_v48  ;;  %v265_v4 = vld [vmem:[#allocation2 + $0xda] sm:$0x1]  ;;  %v554_v5 = vld [vmem:[#allocation2 + $0xf2] sm:$0xff] }
  0x6b   : > { %5507 = vmatpush1.bf16.msra.mxu0 %v5506_v25  ;;  %v553_v58 = vld [vmem:[#allocation2 + $0xe2] sm:$0xff]  ;;  %282 = vst [vmem:[#allocation2 + $0xc0] sm:$0x1] %v264_v54  ;;  %v442_v6 = vld [vmem:[%s8944_s1 + $0x90] sm:$0xff]  ;;  %v443_v7 = vld [vmem:[%s8944_s1 + $0x98] sm:$0xff] }
  0x6c   : > { %5034 = vmatmul.mubr.f32.gmra.mrb[14].mxu1 %v551_v27  ;;  %5589 = vmatprep.subr.bf16.mxu0 %v5588_v33  ;;  %v460_v61 = vld [vmem:[%s8944_s1 + $0x120] sm:$0xff]  ;;  %283 = vst [vmem:[#allocation2 + $0xd8] sm:$0x1] %v265_v4  ;;  %v266_v11 = vld [vmem:[#allocation2 + $0xf2] sm:$0x1]  ;;  %v5568_v15 = vpack.c.bf16 %v443_v7, %v442_v6  ;;  %v463_v21 = vld [vmem:[%s8944_s1 + $0x138] sm:$0xff] }
  0x6d   : > { %5563 = vmatpush1.bf16.msra.mxu1 %v5562_v35  ;;  %5036 = vmatprep.mubr.f32.mxu1 %v552_v45  ;;  %v6473_v10 = vld [vmem:[#allocation2 + $0x20] sm:$0xff]  ;;  %v5596_v13 = vpack.c.bf16 %v461_v62, %v460_v61  ;;  %284 = vst [vmem:[#allocation2 + $0xf0] sm:$0x1] %v266_v11  ;;  %v462_v20 = vld [vmem:[%s8944_s1 + $0x130] sm:$0xff]  ;;  %v445_v25 = vld [vmem:[%s8944_s1 + $0xa8] sm:$0xff] }
  0x6e   : > { %682 = vmatmul.mubr.f32.vlgmr.msra.gmra.mrb[0].mxu0 %v6456_v53  ;;  %5564 = vmatprep.subr.bf16.mxu1 %v8949_v0  ;;  %v444_v12 = vld [vmem:[%s8944_s1 + $0xa0] sm:$0xff]  ;;  %v556_v23 = vld [vmem:[#allocation2 + $0x10a] sm:$0xff]  ;;  %v5600_v37 = vpack.c.bf16 %v463_v21, %v462_v20  ;;  %v557_v39 = vld [vmem:[#allocation2 + $0x112] sm:$0xff] }
  0x6f   : > { %686 = vmatprep.mubr.f32.mxu0 %v6150_v28  ;;  %5591 = vmatpush3.bf16.msra.mxu0 %v5588_v33  ;;  %v555_v14 = vld [vmem:[#allocation2 + $0xfa] sm:$0xff]  ;;  %v267_v27 = vld [vmem:[#allocation2 + $0x10a] sm:$0x1]  ;;  %v6490_v29 = vld [vmem:[#allocation2 + $0x30] sm:$0xff]  ;;  %v5571_v44 = vpack.c.bf16 %v445_v25, %v444_v12 }
  0x70   : > { %5037 = vmatmul.mubr.f32.gmra.mrb[16].mxu1 %v553_v58  ;;  %5593 = vmatprep.subr.bf16.mxu0 %v5592_v59  ;;  %285 = vst [vmem:[#allocation2 + $0x108] sm:$0x1] %v267_v27  ;;  %v268_v33 = vld [vmem:[#allocation2 + $0x122] sm:$0x1]  ;;  %v446_v35 = vld [vmem:[%s8944_s1 + $0xb0] sm:$0xff]  ;;  %v465_v48 = vld [vmem:[%s8944_s1 + $0x148] sm:$0xff] }
  0x71   : > { %5566 = vmatpush1.bf16.msra.mxu1 %v5565_v60  ;;  %5039 = vmatprep.mubr.f32.mxu1 %v554_v5  ;;  %286 = vst [vmem:[#allocation2 + $0x120] sm:$0x1] %v268_v33  ;;  %v464_v45 = vld [vmem:[%s8944_s1 + $0x140] sm:$0xff]  ;;  %v447_v54 = vld [vmem:[%s8944_s1 + $0xb8] sm:$0xff]  ;;  %v270_v60 = vld [vmem:[#allocation2 + $0x152] sm:$0x1] }
  0x72   : > { %687 = vmatmul.mubr.f32.gmra.mrb[2].mxu0 %v6473_v10  ;;  %5567 = vmatprep.subr.bf16.mxu1 %v8949_v0  ;;  %v558_v49 = vld [vmem:[#allocation2 + $0x122] sm:$0xff]  ;;  %v269_v58 = vld [vmem:[#allocation2 + $0x13a] sm:$0x1]  ;;  %v559_v61 = vld [vmem:[#allocation2 + $0x12a] sm:$0xff]  ;;  %v5604_v62 = vpack.c.bf16 %v465_v48, %v464_v45  ;;  %288 = vst [vmem:[#allocation2 + $0x150] sm:$0x1] %v270_v60  ;;  %v5574_v4 = vpack.c.bf16 %v447_v54, %v446_v35 }
  0x73   : > { %691 = vmatprep.mubr.f32.mxu0 %v6163_v31  ;;  %5595 = vmatpush3.bf16.msra.mxu0 %v5592_v59  ;;  %v6507_v59 = vld [vmem:[#allocation2 + $0x38] sm:$0xff]  ;;  %287 = vst [vmem:[#allocation2 + $0x138] sm:$0x1] %v269_v58  ;;  %v466_v5 = vld [vmem:[%s8944_s1 + $0x150] sm:$0xff]  ;;  %v271_v7 = vld [vmem:[#allocation2 + $0x16a] sm:$0x1] }
  0x74   : > { %5040 = vmatmul.mubr.f32.gmra.mrb[18].mxu1 %v555_v14  ;;  %5597 = vmatprep.subr.bf16.mxu0 %v5596_v13  ;;  %v467_v6 = vld [vmem:[%s8944_s1 + $0x158] sm:$0xff]  ;;  %v448_v12 = vld [vmem:[%s8944_s1 + $0xc0] sm:$0xff]  ;;  %289 = vst [vmem:[#allocation2 + $0x168] sm:$0x1] %v271_v7  ;;  %v6524_v14 = vld [vmem:[#allocation2 + $0x48] sm:$0xff] }
  0x75   : > { %5569 = vmatpush1.bf16.msra.mxu1 %v5568_v15  ;;  %5042 = vmatprep.mubr.f32.mxu1 %v556_v23  ;;  %v560_v11 = vld [vmem:[#allocation2 + $0x13a] sm:$0xff]  ;;  %v272_v15 = vld [vmem:[#allocation2 + $0x182] sm:$0x1]  ;;  %v5608_v20 = vpack.c.bf16 %v467_v6, %v466_v5  ;;  %v469_v27 = vld [vmem:[%s8944_s1 + $0x168] sm:$0xff] }
  0x76   : > { %692 = vmatmul.mubr.f32.gmra.mrb[4].mxu0 %v6490_v29  ;;  %5570 = vmatprep.subr.bf16.mxu1 %v8949_v0  ;;  %290 = vst [vmem:[#allocation2 + $0x180] sm:$0x1] %v272_v15  ;;  %v561_v21 = vld [vmem:[#allocation2 + $0x142] sm:$0xff]  ;;  %v562_v33 = vld [vmem:[#allocation2 + $0x152] sm:$0xff]  ;;  %v563_v48 = vld [vmem:[#allocation2 + $0x15a] sm:$0xff] }
  0x77   : > { %696 = vmatprep.mubr.f32.mxu0 %v6166_v32  ;;  %5599 = vmatpush3.bf16.msra.mxu0 %v5596_v13  ;;  %v449_v13 = vld [vmem:[%s8944_s1 + $0xc8] sm:$0xff]  ;;  %v468_v25 = vld [vmem:[%s8944_s1 + $0x160] sm:$0xff]  ;;  %v450_v35 = vld [vmem:[%s8944_s1 + $0xd0] sm:$0xff] }
  0x78   : > { %5043 = vmatmul.mubr.f32.gmra.mrb[20].mxu1 %v557_v39  ;;  %5601 = vmatprep.subr.bf16.mxu0 %v5600_v37  ;;  %v5577_v23 = vpack.c.bf16 %v449_v13, %v448_v12  ;;  %v6541_v39 = vld [vmem:[#allocation2 + $0x50] sm:$0xff]  ;;  %v5612_v45 = vpack.c.bf16 %v469_v27, %v468_v25  ;;  %v471_v58 = vld [vmem:[%s8944_s1 + $0x178] sm:$0xff]  ;;  %v6569_v15 = vld [vmem:[#allocation2 + $0x68] sm:$0xff] }
  0x79   : > { %5572 = vmatpush1.bf16.msra.mxu1 %v5571_v44  ;;  %5045 = vmatprep.mubr.f32.mxu1 %v558_v49  ;;  %v292_v44 = vld [vmem:[#allocation2 + $0xf] sm:$0x1]  ;;  %v470_v54 = vld [vmem:[%s8944_s1 + $0x170] sm:$0xff]  ;;  %v455_v13 = vld [vmem:[%s8944_s1 + $0xf8] sm:$0xff] }
  0x7a   : > { %697 = vmatmul.mubr.f32.gmra.mrb[6].mxu0 %v6507_v59  ;;  %5573 = vmatprep.subr.bf16.mxu1 %v8949_v0  ;;  %310 = vst [vmem:[#allocation2 + $0x11] sm:$0x1] %v292_v44  ;;  %v564_v60 = vld [vmem:[#allocation2 + $0x16a] sm:$0xff]  ;;  %v5616_v5 = vpack.c.bf16 %v471_v58, %v470_v54  ;;  %v565_v6 = vld [vmem:[#allocation2 + $0x172] sm:$0xff]  ;;  %v6600_v54 = vld [vmem:[#allocation2 + $0x80] sm:$0xff] }
  0x7b   : > { %701 = vmatprep.mubr.f32.mxu0 %v6173_v34  ;;  %5603 = vmatpush3.bf16.msra.mxu0 %v5600_v37  ;;  %v451_v37 = vld [vmem:[%s8944_s1 + $0xd8] sm:$0xff]  ;;  %v454_v12 = vld [vmem:[%s8944_s1 + $0xf0] sm:$0xff]  ;;  %v4641_v25 = vld [vmem:[%s8944_s1 + $0x308] sm:$0xff] }
  0x7c   : > { %5046 = vmatmul.mubr.f32.gmra.mrb[22].mxu1 %v559_v61  ;;  %5605 = vmatprep.subr.bf16.mxu0 %v5604_v62  ;;  %v5580_v49 = vpack.c.bf16 %v451_v37, %v450_v35  ;;  %v452_v61 = vld [vmem:[%s8944_s1 + $0xe0] sm:$0xff]  ;;  %v6580_v27 = vld [vmem:[#allocation2 + $0x78] sm:$0xff]  ;;  %v4673_v35 = vld [vmem:[%s8944_s1 + $0x408] sm:$0xff] }
  0x7d   : > { %5575 = vmatpush1.bf16.msra.mxu1 %v5574_v4  ;;  %5048 = vmatprep.mubr.f32.mxu1 %v560_v11  ;;  %v6558_v4 = vld [vmem:[#allocation2 + $0x60] sm:$0xff]  ;;  %v329_v58 = vld [vmem:[#allocation2 + $0x8] sm:$0xff] }
  0x7e   : > { %702 = vmatmul.mubr.f32.gmra.mrb[8].mxu0 %v6524_v14  ;;  %5576 = vmatprep.subr.bf16.mxu1 %v8949_v0  ;;  %v566_v11 = vld [vmem:[#allocation2 + $0x182] sm:$0xff] }
  0x7f   : > { %706 = vmatprep.mubr.f32.mxu0 %v6182_v38  ;;  %5607 = vmatpush3.bf16.msra.mxu0 %v5604_v62  ;;  %v453_v62 = vld [vmem:[%s8944_s1 + $0xe8] sm:$0xff]  ;;  %v328_v37 = vld [vmem:[#allocation2] sm:$0xff] }
  0x80   : > { %5049 = vmatmul.mubr.f32.gmra.mrb[24].mxu1 %v561_v21  ;;  %5609 = vmatprep.subr.bf16.mxu0 %v5608_v20  ;;  %v5583_v7 = vpack.c.bf16 %v453_v62, %v452_v61  ;;  %v5586_v21 = vpack.c.bf16 %v455_v13, %v454_v12  ;;  %v4644_v61 = vld [vmem:[%s8944_s1 + $0x320] sm:$0xff]  ;;  %v4645_v62 = vld [vmem:[%s8944_s1 + $0x328] sm:$0xff]  ;;  %v6625_v12 = vld [vmem:[#allocation2 + $0x98] sm:$0xff] }
  0x81   : > { %5578 = vmatpush1.bf16.msra.mxu1 %v5577_v23  ;;  %5051 = vmatprep.mubr.f32.mxu1 %v562_v33  ;;  %v4640_v23 = vld [vmem:[%s8944_s1 + $0x300] sm:$0xff] }
  0x82   : > { %707 = vmatmul.mubr.f32.gmra.mrb[10].mxu0 %v6541_v39  ;;  %5579 = vmatprep.subr.bf16.mxu1 %v8949_v0  ;;  %v4672_v33 = vld [vmem:[%s8944_s1 + $0x400] sm:$0xff]  ;;  %v5621_v44 = vpack.c.bf16 %v4641_v25, %v4640_v23  ;;  %v6638_v23 = vld [vmem:[#allocation2 + $0xa8] sm:$0xff]  ;;  %v4650_v25 = vld [vmem:[%s8944_s1 + $0x350] sm:$0xff] }
  0x83   : > { %711 = vmatprep.mubr.f32.mxu0 %v6194_v41  ;;  %5611 = vmatpush3.bf16.msra.mxu0 %v5608_v20  ;;  %v567_v20 = vld [vmem:[#allocation2 + $0x18a] sm:$0xff] }
  0x84   : > { %5052 = vmatmul.mubr.f32.gmra.mrb[26].mxu1 %v563_v48  ;;  %5613 = vmatprep.subr.bf16.mxu0 %v5612_v45  ;;  %v4642_v48 = vld [vmem:[%s8944_s1 + $0x310] sm:$0xff] }
  0x85   : > { %5581 = vmatpush1.bf16.msra.mxu1 %v5580_v49  ;;  %5054 = vmatprep.mubr.f32.mxu1 %v564_v60  ;;  %v4643_v49 = vld [vmem:[%s8944_s1 + $0x318] sm:$0xff] }
  0x86   : > { %712 = vmatmul.mubr.f32.gmra.mrb[12].mxu0 %v6558_v4  ;;  %5582 = vmatprep.subr.bf16.mxu1 %v8949_v0  ;;  %v5624_v60 = vpack.c.bf16 %v4643_v49, %v4642_v48  ;;  %v6664_v48 = vld [vmem:[#allocation2 + $0xc0] sm:$0xff]  ;;  %v4654_v49 = vld [vmem:[%s8944_s1 + $0x370] sm:$0xff] }
  0x87   : > { %716 = vmatprep.mubr.f32.mxu0 %v6197_v42  ;;  %5615 = vmatpush3.bf16.msra.mxu0 %v5612_v45  ;;  %v6589_v45 = vpack.c.bf16 %v4673_v35, %v4672_v33  ;;  %v4651_v33 = vld [vmem:[%s8944_s1 + $0x358] sm:$0xff]  ;;  %v6651_v35 = vld [vmem:[#allocation2 + $0xb0] sm:$0xff] }
  0x88   : > { %5055 = vmatmul.mubr.f32.gmra.mrb[28].mxu1 %v565_v6  ;;  %5617 = vmatprep.subr.bf16.mxu0 %v5616_v5  ;;  %v5627_v6 = vpack.c.bf16 %v4645_v62, %v4644_v61  ;;  %v4656_v61 = vld [vmem:[%s8944_s1 + $0x380] sm:$0xff]  ;;  %v6690_v62 = vld [vmem:[#allocation2 + $0xd8] sm:$0xff] }
  0x89   : > { %5584 = vmatpush1.bf16.msra.mxu1 %v5583_v7  ;;  %5057 = vmatprep.mubr.f32.mxu1 %v566_v11  ;;  %v4646_v7 = vld [vmem:[%s8944_s1 + $0x330] sm:$0xff]  ;;  %v4647_v11 = vld [vmem:[%s8944_s1 + $0x338] sm:$0xff] }
  0x8a   : > { %717 = vmatmul.mubr.f32.gmra.mrb[14].mxu0 %v6569_v15  ;;  %5585 = vmatprep.subr.bf16.mxu1 %v8949_v0  ;;  %v5630_v13 = vpack.c.bf16 %v4647_v11, %v4646_v7  ;;  %v4659_v7 = vld [vmem:[%s8944_s1 + $0x398] sm:$0xff]  ;;  %v6703_v11 = vld [vmem:[#allocation2 + $0xe0] sm:$0xff] }
  0x8b   : > { %721 = vmatprep.mubr.f32.mxu0 %v6208_v46  ;;  %5619 = vmatpush3.bf16.msra.mxu0 %v5616_v5  ;;  %v6613_v5 = vld [vmem:[#allocation2 + $0x90] sm:$0xff] }
  0x8c   : > { %5058 = vmatmul.mubr.f32.gmra.mrb[30].mxu1 %v567_v20  ;;  %5669 = vmatprep.subr.bf16.mxu0 %v6589_v45  ;;  %v4648_v20 = vld [vmem:[%s8944_s1 + $0x340] sm:$0xff] }
  0x8d   : > { %5587 = vmatpush1.bf16.msra.mxu1 %v5586_v21  ;;  %1131 = vmatprep.mubr.f32.mxu1 %v6163_v31  ;;  %v4649_v21 = vld [vmem:[%s8944_s1 + $0x348] sm:$0xff] }
  0x8e   : > { %722 = vmatmul.mubr.f32.gmra.mrb[16].mxu0 %v6580_v27  ;;  %5620 = vmatprep.subr.bf16.mxu1 %v8949_v0 }
  0x8f   : > { %726 = vmatprep.mubr.f32.mxu0 %v6211_v50 }
  0x90   : > { %1132 = vmatmul.mubr.f32.vlgmr.msra.gmra.mrb[32].mxu1 %v328_v37  ;;  %v4652_v37 = vld [vmem:[%s8944_s1 + $0x360] sm:$0xff] }
  0x91   : > { %5622 = vmatpush1.bf16.msra.mxu1 %v5621_v44  ;;  %1136 = vmatprep.mubr.f32.mxu1 %v6166_v32  ;;  %v4653_v44 = vld [vmem:[%s8944_s1 + $0x368] sm:$0xff] }
  0x92   : > { %727 = vmatmul.mubr.f32.gmra.mrb[18].mxu0 %v6600_v54  ;;  %5623 = vmatprep.subr.bf16.mxu1 %v8949_v0 }
  0x93   : > { %731 = vmatprep.mubr.f32.mxu0 %v6223_v55 }
  0x94   : > { %1137 = vmatmul.mubr.f32.gmra.mrb[34].mxu1 %v329_v58  ;;  %v4655_v58 = vld [vmem:[%s8944_s1 + $0x378] sm:$0xff] }
  0x95   : > { %1141 = vmatprep.mubr.f32.mxu1 %v6141_v24  ;;  %5625 = vmatpush1.bf16.msra.mxu1 %v5624_v60  ;;  %v6677_v60 = vld [vmem:[#allocation2 + $0xc8] sm:$0xff] }
  0x96   : > { %732 = vmatmul.mubr.f32.gmra.mrb[20].mxu0 %v6613_v5  ;;  %5626 = vmatprep.subr.bf16.mxu1 %v8949_v0 }
  0x97   : > { %736 = vmatprep.mubr.f32.mxu0 %v6226_v56 }
  0x98   : > { %1142 = vmatmul.mubr.f32.gmra.mrb[36].mxu1 %v6456_v53  ;;  %v5633_v53 = vpack.c.bf16 %v4649_v21, %v4648_v20  ;;  %v4660_v20 = vld [vmem:[%s8944_s1 + $0x3a0] sm:$0xff]  ;;  %v4661_v21 = vld [vmem:[%s8944_s1 + $0x3a8] sm:$0xff] }
  0x99   : > { %1146 = vmatprep.mubr.f32.mxu1 %v6150_v28  ;;  %5628 = vmatpush1.bf16.msra.mxu1 %v5627_v6  ;;  %v4658_v6 = vld [vmem:[%s8944_s1 + $0x390] sm:$0xff] }
  0x9a   : > { %737 = vmatmul.mubr.f32.gmra.mrb[22].mxu0 %v6625_v12  ;;  %5629 = vmatprep.subr.bf16.mxu1 %v8949_v0 }
  0x9b   : > { %741 = vmatprep.mubr.f32.mxu0 %v6244_v63 }
  0x9c   : > { %1147 = vmatmul.mubr.f32.gmra.mrb[38].mxu1 %v6473_v10  ;;  %v5636_v10 = vpack.c.bf16 %v4651_v33, %v4650_v25  ;;  %v5651_v25 = vpack.c.bf16 %v4661_v21, %v4660_v20  ;;  %v4662_v33 = vld [vmem:[%s8944_s1 + $0x3b0] sm:$0xff]  ;;  %v6768_v20 = vld [vmem:[#allocation2 + $0x120] sm:$0xff] }
  0x9d   : > { %1151 = vmatprep.mubr.f32.mxu1 %v6163_v31  ;;  %5631 = vmatpush1.bf16.msra.mxu1 %v5630_v13  ;;  %v5648_v13 = vpack.c.bf16 %v4659_v7, %v4658_v6  ;;  %v4668_v7 = vld [vmem:[%s8944_s1 + $0x3e0] sm:$0xff] }
  0x9e   : > { %742 = vmatmul.mubr.f32.gmra.mrb[24].mxu0 %v6638_v23  ;;  %5632 = vmatprep.subr.bf16.mxu1 %v8949_v0  ;;  %v1559_v31 = vld [vmem:[#allocation2 + $0x99] sm:$0xff] }
  0x9f   : > { %746 = vmatprep.mubr.f32.mxu0 %v6247_v2 }
  0xa0   : > { %1152 = vmatmul.mubr.f32.gmra.mrb[40].mxu1 %v6490_v29  ;;  %v5639_v29 = vpack.c.bf16 %v4653_v44, %v4652_v37  ;;  %v6729_v37 = vld [vmem:[#allocation2 + $0xf8] sm:$0xff] }
  0xa1   : > { %1156 = vmatprep.mubr.f32.mxu1 %v6166_v32  ;;  %5634 = vmatpush1.bf16.msra.mxu1 %v5633_v53  ;;  %v6716_v53 = vld [vmem:[#allocation2 + $0xf0] sm:$0xff] }
  0xa2   : > { %747 = vmatmul.mubr.f32.gmra.mrb[26].mxu0 %v6651_v35  ;;  %5635 = vmatprep.subr.bf16.mxu1 %v8949_v0 }
  0xa3   : > { %751 = vmatprep.mubr.f32.mxu0 %v6259_v8 }
  0xa4   : > { %1157 = vmatmul.mubr.f32.gmra.mrb[42].mxu1 %v6507_v59  ;;  %v5642_v59 = vpack.c.bf16 %v4655_v58, %v4654_v49  ;;  %v4665_v49 = vld [vmem:[%s8944_s1 + $0x3c8] sm:$0xff] }
  0xa5   : > { %1161 = vmatprep.mubr.f32.mxu1 %v6173_v34  ;;  %5637 = vmatpush1.bf16.msra.mxu1 %v5636_v10  ;;  %v4663_v10 = vld [vmem:[%s8944_s1 + $0x3b8] sm:$0xff]  ;;  %v6742_v58 = vld [vmem:[#allocation2 + $0x108] sm:$0xff] }
  0xa6   : > { %752 = vmatmul.mubr.f32.gmra.mrb[28].mxu0 %v6664_v48  ;;  %5638 = vmatprep.subr.bf16.mxu1 %v8949_v0  ;;  %v5654_v44 = vpack.c.bf16 %v4663_v10, %v4662_v33  ;;  %v4671_v33 = vld [vmem:[%s8944_s1 + $0x3f8] sm:$0xff]  ;;  %v6781_v10 = vld [vmem:[#allocation2 + $0x128] sm:$0xff] }
  0xa7   : > { %756 = vmatprep.mubr.f32.mxu0 %v6262_v9  ;;  %v4657_v9 = vld [vmem:[%s8944_s1 + $0x388] sm:$0xff] }
  0xa8   : > { %1162 = vmatmul.mubr.f32.gmra.mrb[44].mxu1 %v6524_v14  ;;  %v5645_v14 = vpack.c.bf16 %v4657_v9, %v4656_v61  ;;  %v4666_v61 = vld [vmem:[%s8944_s1 + $0x3d0] sm:$0xff]  ;;  %v4667_v9 = vld [vmem:[%s8944_s1 + $0x3d8] sm:$0xff] }
  0xa9   : > { %1166 = vmatprep.mubr.f32.mxu1 %v6182_v38  ;;  %5640 = vmatpush1.bf16.msra.mxu1 %v5639_v29  ;;  %v4664_v29 = vld [vmem:[%s8944_s1 + $0x3c0] sm:$0xff]  ;;  %v5660_v6 = vpack.c.bf16 %v4667_v9, %v4666_v61  ;;  %v6802_v61 = vld [vmem:[#allocation2 + $0x150] sm:$0xff]  ;;  %v6808_v9 = vld [vmem:[#allocation2 + $0x158] sm:$0xff] }
  0xaa   : > { %757 = vmatmul.mubr.f32.gmra.mrb[30].mxu0 %v6677_v60  ;;  %5641 = vmatprep.subr.bf16.mxu1 %v8949_v0 }
  0xab   : > { %761 = vmatprep.mubr.f32.mxu0 %v6280_v17 }
  0xac   : > { %1167 = vmatmul.mubr.f32.gmra.mrb[46].mxu1 %v6541_v39 }
  0xad   : > { %1171 = vmatprep.mubr.f32.mxu1 %v6194_v41  ;;  %5643 = vmatpush1.bf16.msra.mxu1 %v5642_v59  ;;  %v5657_v59 = vpack.c.bf16 %v4665_v49, %v4664_v29  ;;  %v6788_v29 = vld [vmem:[#allocation2 + $0x138] sm:$0xff]  ;;  %v6794_v49 = vld [vmem:[#allocation2 + $0x140] sm:$0xff]  ;;  %v6982_v41 = vld [vmem:[#allocation2 + $0x16a] sm:$0xff] }
  0xae   : > { %762 = vmatmul.mubr.f32.gmra.mrb[32].mxu0 %v6690_v62  ;;  %5644 = vmatprep.subr.bf16.mxu1 %v8949_v0 }
  0xaf   : > { %766 = vmatprep.mubr.f32.mxu0 %v6283_v18 }
  0xb0   : > { %1172 = vmatmul.mubr.f32.gmra.mrb[48].mxu1 %v6558_v4 }
  0xb1   : > { %1176 = vmatprep.mubr.f32.mxu1 %v6197_v42  ;;  %5646 = vmatpush1.bf16.msra.mxu1 %v5645_v14  ;;  %v6755_v14 = vld [vmem:[#allocation2 + $0x110] sm:$0xff] }
  0xb2   : > { %767 = vmatmul.mubr.f32.gmra.mrb[34].mxu0 %v6703_v11  ;;  %5647 = vmatprep.subr.bf16.mxu1 %v8949_v0 }
  0xb3   : > { %771 = vmatprep.mubr.f32.mxu0 %v6295_v26 }
  0xb4   : > { %1177 = vmatmul.mubr.f32.gmra.mrb[50].mxu1 %v6569_v15 }
  0xb5   : > { %1181 = vmatprep.mubr.f32.mxu1 %v6208_v46  ;;  %5649 = vmatpush1.bf16.msra.mxu1 %v5648_v13  ;;  %v4669_v13 = vld [vmem:[%s8944_s1 + $0x3e8] sm:$0xff]  ;;  %v1556_v46 = vld [vmem:[#allocation2 + $0x79] sm:$0xff] }
  0xb6   : > { %772 = vmatmul.mubr.f32.gmra.mrb[36].mxu0 %v6716_v53  ;;  %5650 = vmatprep.subr.bf16.mxu1 %v8949_v0  ;;  %v5663_v21 = vpack.c.bf16 %v4669_v13, %v4668_v7  ;;  %v6820_v7 = vld [vmem:[#allocation2 + $0x170] sm:$0xff]  ;;  %v6832_v13 = vld [vmem:[#allocation2 + $0x188] sm:$0xff] }
  0xb7   : > { %776 = vmatprep.mubr.f32.mxu0 %v6301_v30 }
  0xb8   : > { %1182 = vmatmul.mubr.f32.gmra.mrb[52].mxu1 %v6580_v27 }
  0xb9   : > { %1186 = vmatprep.mubr.f32.mxu1 %v6211_v50  ;;  %5652 = vmatpush1.bf16.msra.mxu1 %v5651_v25  ;;  %v4670_v25 = vld [vmem:[%s8944_s1 + $0x3f0] sm:$0xff] }
  0xba   : > { %777 = vmatmul.mubr.f32.gmra.mrb[38].mxu0 %v6729_v37  ;;  %5653 = vmatprep.subr.bf16.mxu1 %v8949_v0  ;;  %v1555_v50 = vld [vmem:[#allocation2 + $0x69] sm:$0xff] }
  0xbb   : > { %781 = vmatprep.mubr.f32.mxu0 %v6310_v40 }
  0xbc   : > { %1187 = vmatmul.mubr.f32.gmra.mrb[54].mxu1 %v6600_v54 }
  0xbd   : > { %1191 = vmatprep.mubr.f32.mxu1 %v6223_v55  ;;  %5655 = vmatpush1.bf16.msra.mxu1 %v5654_v44  ;;  %v5666_v44 = vpack.c.bf16 %v4671_v33, %v4670_v25  ;;  %v4674_v25 = vld [vmem:[%s8944_s1 + $0x410] sm:$0xff]  ;;  %v4675_v33 = vld [vmem:[%s8944_s1 + $0x418] sm:$0xff]  ;;  %v1554_v55 = vld [vmem:[#allocation2 + $0x61] sm:$0xff] }
  0xbe   : > { %782 = vmatmul.mubr.f32.gmra.mrb[40].mxu0 %v6742_v58  ;;  %5656 = vmatprep.subr.bf16.mxu1 %v8949_v0 }
  0xbf   : > { %786 = vmatprep.mubr.f32.mxu0 %v6313_v43 }
  0xc0   : > { %1192 = vmatmul.mubr.f32.gmra.mrb[56].mxu1 %v6613_v5 }
  0xc1   : > { %1196 = vmatprep.mubr.f32.mxu1 %v6226_v56  ;;  %5658 = vmatpush1.bf16.msra.mxu1 %v5657_v59  ;;  %v6797_v59 = vld [vmem:[#allocation2 + $0xc9] sm:$0xff]  ;;  %v1553_v56 = vld [vmem:[#allocation2 + $0x51] sm:$0xff] }
  0xc2   : > { %787 = vmatmul.mubr.f32.gmra.mrb[42].mxu0 %v6755_v14  ;;  %5659 = vmatprep.subr.bf16.mxu1 %v8949_v0  ;;  %9052 = vst [vmem:[#allocation36_spill] sm:$0xff] %v6797_v59 }
  0xc3   : > { %791 = vmatprep.mubr.f32.mxu0 %v6331_v52 }
  0xc4   : > { %1197 = vmatmul.mubr.f32.gmra.mrb[58].mxu1 %v6625_v12 }
  0xc5   : > { %1201 = vmatprep.mubr.f32.mxu1 %v6244_v63  ;;  %5661 = vmatpush1.bf16.msra.mxu1 %v5660_v6  ;;  %v6814_v6 = vld [vmem:[#allocation2 + $0x168] sm:$0xff] }
  0xc6   : > { %792 = vmatmul.mubr.f32.gmra.mrb[44].mxu0 %v6768_v20  ;;  %5662 = vmatprep.subr.bf16.mxu1 %v8949_v0  ;;  %v1520_v63 = vld [vmem:[#allocation2 + $0x48] sm:$0xff] }
  0xc7   : > { %796 = vmatprep.mubr.f32.mxu0 %v6338_v57 }
  0xc8   : > { %1202 = vmatmul.mubr.f32.gmra.mrb[60].mxu1 %v6638_v23 }
  0xc9   : > { %1206 = vmatprep.mubr.f32.mxu1 %v6247_v2  ;;  %5664 = vmatpush1.bf16.msra.mxu1 %v5663_v21  ;;  %v392_v21 = vld [vmem:[#allocation2 + $0x2] sm:$0xff]  ;;  %v6951_v2 = vld [vmem:[#allocation2 + $0xfa] sm:$0xff] }
  0xca   : > { %797 = vmatmul.mubr.f32.gmra.mrb[46].mxu0 %v6781_v10  ;;  %5665 = vmatprep.subr.bf16.mxu1 %v8949_v0  ;;  %v394_v0 = vld [vmem:[#allocation2 + $0x1a] sm:$0xff] }
  0xcb   : > { %801 = vmatprep.mubr.f32.mxu0 %v6347_v1 }
  0xcc   : > { %1207 = vmatmul.mubr.f32.gmra.mrb[62].mxu1 %v6651_v35 }
  0xcd   : > { %1211 = vmatprep.mubr.f32.mxu1 %v6259_v8  ;;  %5667 = vmatpush1.bf16.msra.mxu1 %v5666_v44  ;;  %v393_v44 = vld [vmem:[#allocation2 + $0xa] sm:$0xff] }
  0xce   : > { %802 = vmatmul.mubr.f32.gmra.mrb[48].mxu0 %v6788_v29  ;;  %v1552_v8 = vld [vmem:[#allocation2 + $0x49] sm:$0xff] }
  0xcf   : > { %806 = vmatprep.mubr.f32.mxu0 %v6350_v3 }
  0xd0   : > { %1212 = vmatmul.mubr.f32.gmra.mrb[64].mxu1 %v6664_v48 }
  0xd1   : > { %1216 = vmatprep.mubr.f32.mxu1 %v6797_v59  ;;  %v6947_v59 = vld [vmem:[#allocation2 + $0xf2] sm:$0xff] }
  0xd2   : > { %807 = vmatmul.mubr.f32.gmra.mrb[50].mxu0 %v6794_v49 }
  0xd3   : > { %811 = vmatprep.mubr.f32.mxu0 %v6369_v16 }
  0xd4   : > { %1217 = vmatmul.mubr.f32.gmra.mrb[66].mxu1 %v6677_v60 }
  0xd5   : > { %1221 = vmatprep.mubr.f32.mxu1 %v6280_v17  ;;  %v1551_v17 = vld [vmem:[#allocation2 + $0x39] sm:$0xff] }
  0xd6   : > { %812 = vmatmul.mubr.f32.gmra.mrb[52].mxu0 %v6802_v61 }
  0xd7   : > { %816 = vmatprep.mubr.f32.mxu0 %v6372_v19 }
  0xd8   : > { %1222 = vmatmul.mubr.f32.gmra.mrb[68].mxu1 %v6690_v62 }
  0xd9   : > { %1226 = vmatprep.mubr.f32.mxu1 %v6283_v18  ;;  %v4687_v18 = vld [vmem:[%s8944_s1 + $0x478] sm:$0xff] }
  0xda   : > { %817 = vmatmul.mubr.f32.gmra.mrb[54].mxu0 %v6808_v9 }
  0xdb   : > { %821 = vmatprep.mubr.f32.mxu0 %v6377_v22  ;;  %v6826_v22 = vld [vmem:[#allocation2 + $0x180] sm:$0xff] }
  0xdc   : > { %1227 = vmatmul.mubr.f32.gmra.mrb[70].mxu1 %v6703_v11 }
  0xdd   : > { %1231 = vmatprep.mubr.f32.mxu1 %v6295_v26  ;;  %v4686_v26 = vld [vmem:[%s8944_s1 + $0x470] sm:$0xff] }
  0xde   : > { %822 = vmatmul.mubr.f32.gmra.mrb[56].mxu0 %v6814_v6 }
  0xdf   : > { %826 = vmatprep.mubr.f32.mxu0 %v6392_v36 }
  0xe0   : > { %1232 = vmatmul.mubr.f32.gmra.mrb[72].mxu1 %v6716_v53 }
  0xe1   : > { %1236 = vmatprep.mubr.f32.mxu1 %v6301_v30  ;;  %v309_v30 = vld [vmem:[#allocation2 + $0x1a7] sm:$0x1] }
  0xe2   : > { %827 = vmatmul.mubr.f32.gmra.mrb[58].mxu0 %v6820_v7  ;;  %327 = vst [vmem:[#allocation2 + $0x1a9] sm:$0x1] %v309_v30  ;;  %v6919_v30 = vld [vmem:[#allocation2 + $0x9a] sm:$0xff] }
  0xe3   : > { %831 = vmatprep.mubr.f32.mxu0 %v6401_v47  ;;  %v4676_v47 = vld [vmem:[%s8944_s1 + $0x420] sm:$0xff] }
  0xe4   : > { %1237 = vmatmul.mubr.f32.gmra.mrb[74].mxu1 %v6729_v37 }
  0xe5   : > { %1241 = vmatprep.mubr.f32.mxu1 %v6310_v40  ;;  %v395_v40 = vld [vmem:[#allocation2 + $0x22] sm:$0xff] }
  0xe6   : > { %832 = vmatmul.mubr.f32.gmra.mrb[60].mxu0 %v6826_v22 }
  0xe7   : > { %836 = vmatprep.mubr.f32.mxu0 %v6411_v51  ;;  %v5672_v51 = vpack.c.bf16 %v4675_v33, %v4674_v25  ;;  %v4678_v33 = vld [vmem:[%s8944_s1 + $0x430] sm:$0xff] }
  0xe8   : > { %1242 = vmatmul.mubr.f32.gmra.mrb[76].mxu1 %v6742_v58 }
  0xe9   : > { %1246 = vmatprep.mubr.f32.mxu1 %v6313_v43  ;;  %v4677_v43 = vld [vmem:[%s8944_s1 + $0x428] sm:$0xff] }
  0xea   : > { %837 = vmatmul.mubr.f32.gmra.mrb[62].mxu0 %v6832_v13  ;;  %v5676_v25 = vpack.c.bf16 %v4677_v43, %v4676_v47  ;;  %v4680_v47 = vld [vmem:[%s8944_s1 + $0x440] sm:$0xff] }
  0xeb   : > { %5092 = vmatprep.mubr.f32.mxu0 %v392_v21  ;;  %v6853_v21 = vld [vmem:[#allocation2 + $0x32] sm:$0xff] }
  0xec   : > { %1247 = vmatmul.mubr.f32.gmra.mrb[78].mxu1 %v6755_v14 }
  0xed   : > { %1251 = vmatprep.mubr.f32.mxu1 %v6331_v52  ;;  %v4685_v52 = vld [vmem:[%s8944_s1 + $0x468] sm:$0xff] }
  0xee   : > { %5093 = vmatmul.mubr.f32.vlgmr.msra.gmra.mrb[64].mxu0 %v393_v44  ;;  %v4679_v44 = vld [vmem:[%s8944_s1 + $0x438] sm:$0xff] }
  0xef   : > { %5095 = vmatprep.mubr.f32.mxu0 %v394_v0  ;;  %5671 = vmatpush3.bf16.msra.mxu0 %v6589_v45  ;;  %v6863_v0 = vld [vmem:[#allocation2 + $0x3a] sm:$0xff]  ;;  %v6866_v45 = vld [vmem:[#allocation2 + $0x4a] sm:$0xff]  ;;  %v5680_v43 = vpack.c.bf16 %v4679_v44, %v4678_v33  ;;  %v6880_v33 = vld [vmem:[#allocation2 + $0x62] sm:$0xff] }
  0xf0   : > { %1252 = vmatmul.mubr.f32.gmra.mrb[80].mxu1 %v6768_v20  ;;  %5673 = vmatprep.subr.bf16.mxu0 %v5672_v51 }
  0xf1   : > { %1256 = vmatprep.mubr.f32.mxu1 %v6338_v57  ;;  %v4683_v57 = vld [vmem:[%s8944_s1 + $0x458] sm:$0xff] }
  0xf2   : > { %5096 = vmatmul.mubr.f32.gmra.mrb[66].mxu0 %v395_v40  ;;  %v4681_v40 = vld [vmem:[%s8944_s1 + $0x448] sm:$0xff] }
  0xf3   : > { %5098 = vmatprep.mubr.f32.mxu0 %v6853_v21  ;;  %5675 = vmatpush3.bf16.msra.mxu0 %v5672_v51  ;;  %v6877_v51 = vld [vmem:[#allocation2 + $0x52] sm:$0xff]  ;;  %v5684_v44 = vpack.c.bf16 %v4681_v40, %v4680_v47  ;;  %v6894_v47 = vld [vmem:[#allocation2 + $0x7a] sm:$0xff] }
  0xf4   : > { %1257 = vmatmul.mubr.f32.gmra.mrb[82].mxu1 %v6781_v10  ;;  %5677 = vmatprep.subr.bf16.mxu0 %v5676_v25 }
  0xf5   : > { %1261 = vmatprep.mubr.f32.mxu1 %v6347_v1  ;;  %v4682_v1 = vld [vmem:[%s8944_s1 + $0x450] sm:$0xff] }
  0xf6   : > { %5099 = vmatmul.mubr.f32.gmra.mrb[68].mxu0 %v6863_v0  ;;  %v5688_v40 = vpack.c.bf16 %v4683_v57, %v4682_v1  ;;  %v273_v57 = vld [vmem:[#allocation2 + $0x19a] sm:$0x1]  ;;  %v6908_v1 = vld [vmem:[#allocation2 + $0x92] sm:$0xff] }
  0xf7   : > { %5101 = vmatprep.mubr.f32.mxu0 %v6866_v45  ;;  %5679 = vmatpush3.bf16.msra.mxu0 %v5676_v25  ;;  %v6891_v25 = vld [vmem:[#allocation2 + $0x6a] sm:$0xff]  ;;  %291 = vst [vmem:[#allocation2 + $0x198] sm:$0x1] %v273_v57  ;;  %v6929_v57 = vld [vmem:[#allocation2 + $0xb2] sm:$0xff] }
  0xf8   : > { %1262 = vmatmul.mubr.f32.gmra.mrb[84].mxu1 %v6788_v29  ;;  %5681 = vmatprep.subr.bf16.mxu0 %v5680_v43 }
  0xf9   : > { %1266 = vmatprep.mubr.f32.mxu1 %v6350_v3  ;;  %v4684_v3 = vld [vmem:[%s8944_s1 + $0x460] sm:$0xff] }
  0xfa   : > { %5102 = vmatmul.mubr.f32.gmra.mrb[70].mxu0 %v6877_v51 }
  0xfb   : > { %5104 = vmatprep.mubr.f32.mxu0 %v6880_v33  ;;  %5683 = vmatpush3.bf16.msra.mxu0 %v5680_v43  ;;  %v6905_v43 = vld [vmem:[#allocation2 + $0x82] sm:$0xff] }
  0xfc   : > { %1267 = vmatmul.mubr.f32.gmra.mrb[86].mxu1 %v6794_v49  ;;  %5685 = vmatprep.subr.bf16.mxu0 %v5684_v44 }
  0xfd   : > { %1271 = vmatprep.mubr.f32.mxu1 %v6369_v16  ;;  %v5692_v16 = vpack.c.bf16 %v4685_v52, %v4684_v3  ;;  %v6922_v52 = vld [vmem:[#allocation2 + $0xaa] sm:$0xff]  ;;  %v5696_v3 = vpack.c.bf16 %v4687_v18, %v4686_v26 }
  0xfe   : > { %5105 = vmatmul.mubr.f32.gmra.mrb[72].mxu0 %v6891_v25  ;;  %v1550_v18 = vld [vmem:[#allocation2 + $0x31] sm:$0xff] }
  0xff   : > { %5107 = vmatprep.mubr.f32.mxu0 %v6894_v47  ;;  %5687 = vmatpush3.bf16.msra.mxu0 %v5684_v44  ;;  %v6924_v44 = vld [vmem:[#allocation2 + $0x169] sm:$0xff] }
 0x100   : > { %1272 = vmatmul.mubr.f32.gmra.mrb[88].mxu1 %v6802_v61  ;;  %5689 = vmatprep.subr.bf16.mxu0 %v5688_v40  ;;  %9053 = vst [vmem:[#allocation37_spill] sm:$0xff] %v6924_v44  ;;  %v6937_v26 = vld [vmem:[#allocation2 + $0xca] sm:$0xff] }
 0x101   : > { %1276 = vmatprep.mubr.f32.mxu1 %v6372_v19  ;;  %v1518_v19 = vld [vmem:[#allocation2 + $0x30] sm:$0xff] }
 0x102   : > { %5108 = vmatmul.mubr.f32.gmra.mrb[74].mxu0 %v6905_v43 }
 0x103   : > { %5110 = vmatprep.mubr.f32.mxu0 %v6908_v1  ;;  %5691 = vmatpush3.bf16.msra.mxu0 %v5688_v40  ;;  %v6932_v40 = vld [vmem:[#allocation2 + $0xc2] sm:$0xff] }
 0x104   : > { %1277 = vmatmul.mubr.f32.gmra.mrb[90].mxu1 %v6808_v9  ;;  %5693 = vmatprep.subr.bf16.mxu0 %v5692_v16 }
 0x105   : > { %1281 = vmatprep.mubr.f32.mxu1 %v6924_v44  ;;  %v6940_v44 = vld [vmem:[#allocation2 + $0xda] sm:$0xff] }
 0x106   : > { %5111 = vmatmul.mubr.f32.gmra.mrb[76].mxu0 %v6919_v30 }
 0x107   : > { %5113 = vmatprep.mubr.f32.mxu0 %v6922_v52  ;;  %5695 = vmatpush3.bf16.msra.mxu0 %v5692_v16  ;;  %v9054_v16 = vmov 0.0|0.0  }
 0x108   : > { %1282 = vmatmul.mubr.f32.gmra.mrb[92].mxu1 %v6814_v6  ;;  %5697 = vmatprep.subr.bf16.mxu0 %v5696_v3 }
 0x109   : > { %1286 = vmatprep.mubr.f32.mxu1 %v6392_v36  ;;  %v6945_v36 = vld [vmem:[#allocation2 + $0xe2] sm:$0xff] }
 0x10a   : > { %5114 = vmatmul.mubr.f32.gmra.mrb[78].mxu0 %v6929_v57 }
 0x10b   : > { %5116 = vmatprep.mubr.f32.mxu0 %v6932_v40  ;;  %5699 = vmatpush3.bf16.msra.mxu0 %v5696_v3  ;;  %v1519_v3 = vld [vmem:[#allocation2 + $0x38] sm:$0xff] }
 0x10c   : > { %1287 = vmatmul.mubr.f32.gmra.mrb[94].mxu1 %v6820_v7  ;;  %5700 = vmatprep.subr.bf16.mxu0 %v9054_v16 }
 0x10d   : > { %1727 = vmatprep.mubr.f32.mxu1 %v1550_v18  ;;  %v6953_v18 = vld [vmem:[#allocation2 + $0x10a] sm:$0xff] }
 0x10e   : > { %5117 = vmatmul.mubr.f32.gmra.mrb[80].mxu0 %v6937_v26 }
 0x10f   : > { %5119 = vmatprep.mubr.f32.mxu0 %v6940_v44 }
 0x110   : > { %1728 = vmatmul.mubr.f32.vlgmr.msra.gmra.mrb[96].mxu1 %v1518_v19  ;;  %v6957_v19 = vld [vmem:[#allocation2 + $0x112] sm:$0xff] }
 0x111   : > { %1732 = vmatprep.mubr.f32.mxu1 %v1551_v17  ;;  %v6959_v17 = vld [vmem:[#allocation2 + $0x122] sm:$0xff] }
 0x112   : > { %5120 = vmatmul.mubr.f32.gmra.mrb[82].mxu0 %v6945_v36 }
 0x113   : > { %5122 = vmatprep.mubr.f32.mxu0 %v6947_v59 }
 0x114   : > { %1733 = vmatmul.mubr.f32.gmra.mrb[98].mxu1 %v1519_v3  ;;  %v6963_v3 = vld [vmem:[#allocation2 + $0x12a] sm:$0xff] }
 0x115   : > { %1737 = vmatprep.mubr.f32.mxu1 %v1552_v8  ;;  %v6966_v8 = vld [vmem:[#allocation2 + $0x13a] sm:$0xff] }
 0x116   : > { %5123 = vmatmul.mubr.f32.gmra.mrb[84].mxu0 %v6951_v2 }
 0x117   : > { %5125 = vmatprep.mubr.f32.mxu0 %v6953_v18 }
 0x118   : > { %1738 = vmatmul.mubr.f32.gmra.mrb[100].mxu1 %v1520_v63  ;;  %v6970_v63 = vld [vmem:[#allocation2 + $0x142] sm:$0xff] }
 0x119   : > { %1742 = vmatprep.mubr.f32.mxu1 %v1553_v56  ;;  %v6973_v56 = vld [vmem:[#allocation2 + $0x152] sm:$0xff] }
 0x11a   : > { %5126 = vmatmul.mubr.f32.gmra.mrb[86].mxu0 %v6957_v19 }
 0x11b   : > { %5128 = vmatprep.mubr.f32.mxu0 %v6959_v17 }
 0x11c   : > { %1743 = vmatmul.mubr.f32.gmra.mrb[102].mxu1 %v6541_v39 }
 0x11d   : > { %1747 = vmatprep.mubr.f32.mxu1 %v1554_v55  ;;  %v6979_v55 = vld [vmem:[#allocation2 + $0x15a] sm:$0xff] }
 0x11e   : > { %5129 = vmatmul.mubr.f32.gmra.mrb[88].mxu0 %v6963_v3 }
 0x11f   : > { %5131 = vmatprep.mubr.f32.mxu0 %v6966_v8 }
 0x120   : > { %1748 = vmatmul.mubr.f32.gmra.mrb[104].mxu1 %v6558_v4  ;;  %v1557_v4 = vld [vmem:[#allocation2 + $0x81] sm:$0xff] }
 0x121   : > { %1752 = vmatprep.mubr.f32.mxu1 %v1555_v50  ;;  %v6988_v50 = vld [vmem:[#allocation2 + $0x172] sm:$0xff] }
 0x122   : > { %5132 = vmatmul.mubr.f32.gmra.mrb[90].mxu0 %v6970_v63 }
 0x123   : > { %v6976_v42 = vpop.f32.mrb[0].mxu1  ;;  %5134 = vmatprep.mubr.f32.mxu0 %v6973_v56 }
 0x124   : > { %v908_v39 = vpop.f32.mrb[1].mxu1  ;;  %1753 = vmatmul.mubr.f32.gmra.mrb[106].mxu1 %v6569_v15  ;;  %v1558_v15 = vld [vmem:[#allocation2 + $0x91] sm:$0xff] }
 0x125   : > { %1757 = vmatprep.mubr.f32.mxu1 %v1556_v46 }
 0x126   : > { %5135 = vmatmul.mubr.f32.gmra.mrb[92].mxu0 %v6979_v55 }
 0x127   : > { %v6985_v38 = vpop.f32.mrb[2].mxu1  ;;  %5137 = vmatprep.mubr.f32.mxu0 %v6982_v41 }
 0x128   : > { %v6990_v34 = vpop.f32.mrb[3].mxu1  ;;  %1758 = vmatmul.mubr.f32.gmra.mrb[108].mxu1 %v6580_v27 }
 0x129   : > { %1762 = vmatprep.mubr.f32.mxu1 %v1557_v4 }
 0x12a   : > { %5138 = vmatmul.mubr.f32.gmra.mrb[94].mxu0 %v6988_v50 }
 0x12b   : > { %v6994_v32 = vpop.f32.mrb[4].mxu1  ;;  %5172 = vmatprep.mubr.f32.mxu0 %v6853_v21  ;;  %v1560_v21 = vld [vmem:[#allocation2 + $0xa9] sm:$0xff] }
 0x12c   : > { %v6997_v46 = vpop.f32.mrb[5].mxu1  ;;  %1763 = vmatmul.mubr.f32.gmra.mrb[110].mxu1 %v6600_v54 }
 0x12d   : > { %1767 = vmatprep.mubr.f32.mxu1 %v1558_v15 }
 0x12e   : > { %5173 = vmatmul.mubr.f32.vlgmr.msra.gmra.mrb[96].mxu0 %v6863_v0  ;;  %v1561_v0 = vld [vmem:[#allocation2 + $0xb1] sm:$0xff] }
 0x12f   : > { %v7001_v28 = vpop.f32.mrb[6].mxu1  ;;  %5175 = vmatprep.mubr.f32.mxu0 %v6866_v45 }
 0x130   : > { %v7004_v27 = vpop.f32.mrb[7].mxu1  ;;  %1768 = vmatmul.mubr.f32.gmra.mrb[112].mxu1 %v6613_v5  ;;  %v1562_v5 = vld [vmem:[#allocation2 + $0xc1] sm:$0xff] }
 0x131   : > { %1772 = vmatprep.mubr.f32.mxu1 %v1559_v31 }
 0x132   : > { %5176 = vmatmul.mubr.f32.gmra.mrb[98].mxu0 %v6877_v51 }
 0x133   : > { %v7008_v4 = vpop.f32.mrb[8].mxu1  ;;  %5178 = vmatprep.mubr.f32.mxu0 %v6880_v33  ;;  %v1563_v33 = vld [vmem:[#allocation2 + $0xc9] sm:$0xff] }
 0x134   : > { %v7011_v54 = vpop.f32.mrb[9].mxu1  ;;  %1773 = vmatmul.mubr.f32.gmra.mrb[114].mxu1 %v6625_v12 }
 0x135   : > { %1777 = vmatprep.mubr.f32.mxu1 %v1560_v21  ;;  %v1565_v21 = vld [vmem:[#allocation2 + $0xe1] sm:$0xff] }
 0x136   : > { %5179 = vmatmul.mubr.f32.gmra.mrb[100].mxu0 %v6891_v25 }
 0x137   : > { %v7015_v45 = vpop.f32.mrb[10].mxu1  ;;  %5181 = vmatprep.mubr.f32.mxu0 %v6894_v47 }
 0x138   : > { %v7018_v31 = vpop.f32.mrb[11].mxu1  ;;  %1778 = vmatmul.mubr.f32.gmra.mrb[116].mxu1 %v6638_v23 }
 0x139   : > { %1782 = vmatprep.mubr.f32.mxu1 %v1561_v0 }
 0x13a   : > { %5182 = vmatmul.mubr.f32.gmra.mrb[102].mxu0 %v6905_v43 }
 0x13b   : > { %v7022_v51 = vpop.f32.mrb[12].mxu1  ;;  %5184 = vmatprep.mubr.f32.mxu0 %v6908_v1  ;;  %v1564_v1 = vld [vmem:[#allocation2 + $0xd9] sm:$0xff] }
 0x13c   : > { %v7025_v12 = vpop.f32.mrb[13].mxu1  ;;  %1783 = vmatmul.mubr.f32.gmra.mrb[118].mxu1 %v6651_v35 }
 0x13d   : > { %1787 = vmatprep.mubr.f32.mxu1 %v1562_v5  ;;  %v1566_v5 = vld [vmem:[#allocation2 + $0xf1] sm:$0xff] }
 0x13e   : > { %5185 = vmatmul.mubr.f32.gmra.mrb[104].mxu0 %v6919_v30 }
 0x13f   : > { %v7029_v25 = vpop.f32.mrb[14].mxu1  ;;  %5187 = vmatprep.mubr.f32.mxu0 %v6922_v52 }
 0x140   : > { %v7032_v23 = vpop.f32.mrb[15].mxu1  ;;  %1788 = vmatmul.mubr.f32.gmra.mrb[120].mxu1 %v6664_v48 }
 0x141   : > { %v683_v47 = vpop.f32.mrb[0].mxu0  ;;  %1792 = vmatprep.mubr.f32.mxu1 %v1563_v33 }
 0x142   : > { %5188 = vmatmul.mubr.f32.gmra.mrb[106].mxu0 %v6929_v57  ;;  %v685_v43 = vpop.f32.mrb[1].mxu0  ;;  %v7036_v15 = vadd.f32 %v908_v39, %v683_v47  ;;  %v1567_v47 = vld [vmem:[#allocation2 + $0xf9] sm:$0xff] }
 0x143   : > { %v7038_v35 = vpop.f32.mrb[16].mxu1  ;;  %5190 = vmatprep.mubr.f32.mxu0 %v6932_v40 }
 0x144   : > { %v7041_v30 = vpop.f32.mrb[17].mxu1  ;;  %1793 = vmatmul.mubr.f32.gmra.mrb[122].mxu1 %v6677_v60 }
 0x145   : > { %v688_v52 = vpop.f32.mrb[2].mxu0  ;;  %1797 = vmatprep.mubr.f32.mxu1 %v1564_v1  ;;  %v1568_v1 = vld [vmem:[#allocation2 + $0x109] sm:$0xff] }
 0x146   : > { %5191 = vmatmul.mubr.f32.gmra.mrb[108].mxu0 %v6937_v26  ;;  %v690_v48 = vpop.f32.mrb[3].mxu0  ;;  %v7046_v57 = vadd.f32 %v6976_v42, %v688_v52 }
 0x147   : > { %v7048_v0 = vpop.f32.mrb[18].mxu1  ;;  %5193 = vmatprep.mubr.f32.mxu0 %v6940_v44  ;;  %v1569_v48 = vld [vmem:[#allocation2 + $0x111] sm:$0xff] }
 0x148   : > { %v7051_v39 = vpop.f32.mrb[19].mxu1  ;;  %1798 = vmatmul.mubr.f32.gmra.mrb[124].mxu1 %v6690_v62 }
 0x149   : > { %v693_v40 = vpop.f32.mrb[4].mxu0  ;;  %1802 = vmatprep.mubr.f32.mxu1 %v1565_v21 }
 0x14a   : > { %5194 = vmatmul.mubr.f32.gmra.mrb[110].mxu0 %v6945_v36  ;;  %v695_v60 = vpop.f32.mrb[5].mxu0  ;;  %v7056_v26 = vadd.f32 %v6990_v34, %v693_v40  ;;  %v1570_v40 = vld [vmem:[#allocation2 + $0x121] sm:$0xff] }
 0x14b   : > { %v7058_v33 = vpop.f32.mrb[20].mxu1  ;;  %5196 = vmatprep.mubr.f32.mxu0 %v6947_v59 }
 0x14c   : > { %v7061_v42 = vpop.f32.mrb[21].mxu1  ;;  %1803 = vmatmul.mubr.f32.gmra.mrb[126].mxu1 %v6703_v11 }
 0x14d   : > { %v698_v44 = vpop.f32.mrb[6].mxu0  ;;  %1807 = vmatprep.mubr.f32.mxu1 %v1566_v5  ;;  %v1571_v5 = vld [vmem:[#allocation2 + $0x129] sm:$0xff] }
 0x14e   : > { %5197 = vmatmul.mubr.f32.gmra.mrb[112].mxu0 %v6951_v2  ;;  %v700_v62 = vpop.f32.mrb[7].mxu0  ;;  %v7066_v36 = vadd.f32 %v6985_v38, %v698_v44 }
 0x14f   : > { %v7068_v43 = vpop.f32.mrb[22].mxu1  ;;  %5199 = vmatprep.mubr.f32.mxu0 %v6953_v18 }
 0x150   : > { %v7071_v34 = vpop.f32.mrb[23].mxu1  ;;  %1808 = vmatmul.mubr.f32.gmra.mrb[128].mxu1 %v6716_v53 }
 0x151   : > { %v703_v59 = vpop.f32.mrb[8].mxu0  ;;  %1812 = vmatprep.mubr.f32.mxu1 %v1567_v47  ;;  %v1572_v47 = vld [vmem:[#allocation2 + $0x139] sm:$0xff] }
 0x152   : > { %v705_v11 = vpop.f32.mrb[9].mxu0  ;;  %5200 = vmatmul.mubr.f32.gmra.mrb[114].mxu0 %v6957_v19  ;;  %v7076_v2 = vadd.f32 %v6997_v46, %v703_v59  ;;  %v1611_v59 = vld [vmem:[#allocation2 + $0x18a] sm:$0xff] }
 0x153   : > { %v7078_v52 = vpop.f32.mrb[24].mxu1  ;;  %5202 = vmatprep.mubr.f32.mxu0 %v6959_v17 }
 0x154   : > { %v7081_v38 = vpop.f32.mrb[25].mxu1  ;;  %1813 = vmatmul.mubr.f32.gmra.mrb[130].mxu1 %v6729_v37 }
 0x155   : > { %v708_v18 = vpop.f32.mrb[10].mxu0  ;;  %1817 = vmatprep.mubr.f32.mxu1 %v1568_v1 }
 0x156   : > { %v710_v53 = vpop.f32.mrb[11].mxu0  ;;  %5203 = vmatmul.mubr.f32.gmra.mrb[116].mxu0 %v6963_v3  ;;  %v7086_v21 = vadd.f32 %v6994_v32, %v708_v18 }
 0x157   : > { %v7088_v19 = vpop.f32.mrb[26].mxu1  ;;  %5205 = vmatprep.mubr.f32.mxu0 %v6966_v8  ;;  %v1573_v53 = vld [vmem:[#allocation2 + $0x141] sm:$0xff] }
 0x158   : > { %v7091_v46 = vpop.f32.mrb[27].mxu1  ;;  %1818 = vmatmul.mubr.f32.gmra.mrb[132].mxu1 %v6742_v58 }
 0x159   : > { %v713_v17 = vpop.f32.mrb[12].mxu0  ;;  %1822 = vmatprep.mubr.f32.mxu1 %v1569_v48  ;;  %v1613_v48 = vld [vmem:[#allocation2 + $0x1a2] sm:$0xff] }
 0x15a   : > { %v715_v37 = vpop.f32.mrb[13].mxu0  ;;  %5206 = vmatmul.mubr.f32.gmra.mrb[118].mxu0 %v6970_v63  ;;  %v7096_v60 = vadd.f32 %v7004_v27, %v713_v17 }
 0x15b   : > { %v7098_v3 = vpop.f32.mrb[28].mxu1  ;;  %5208 = vmatprep.mubr.f32.mxu0 %v6973_v56  ;;  %v1610_v56 = vld [vmem:[#allocation2 + $0x182] sm:$0xff] }
 0x15c   : > { %v7101_v32 = vpop.f32.mrb[29].mxu1  ;;  %1823 = vmatmul.mubr.f32.gmra.mrb[134].mxu1 %v6755_v14 }
 0x15d   : > { %v718_v8 = vpop.f32.mrb[14].mxu0  ;;  %1827 = vmatprep.mubr.f32.mxu1 %v1570_v40  ;;  %v1574_v40 = vld [vmem:[#allocation2 + $0x151] sm:$0xff] }
 0x15e   : > { %v720_v58 = vpop.f32.mrb[15].mxu0  ;;  %5209 = vmatmul.mubr.f32.gmra.mrb[120].mxu0 %v6979_v55  ;;  %v7106_v44 = vadd.f32 %v7001_v28, %v718_v8 }
 0x15f   : > { %v7108_v63 = vpop.f32.mrb[30].mxu1  ;;  %5211 = vmatprep.mubr.f32.mxu0 %v6982_v41 }
 0x160   : > { %v7111_v27 = vpop.f32.mrb[31].mxu1  ;;  %1828 = vmatmul.mubr.f32.gmra.mrb[136].mxu1 %v6768_v20  ;;  %v1612_v20 = vld [vmem:[#allocation2 + $0x19a] sm:$0xff] }
 0x161   : > { %v723_v62 = vpop.f32.mrb[16].mxu0  ;;  %1832 = vmatprep.mubr.f32.mxu1 %v1571_v5 }
 0x162   : > { %v725_v14 = vpop.f32.mrb[17].mxu0  ;;  %5212 = vmatmul.mubr.f32.gmra.mrb[122].mxu0 %v6988_v50  ;;  %v7116_v55 = vadd.f32 %v7011_v54, %v723_v62  ;;  %v1575_v62 = vld [vmem:[#allocation2 + $0x159] sm:$0xff] }
 0x163   : > { %v1133_v28 = vpop.f32.mrb[32].mxu1  ;;  %5214 = vmatprep.mubr.f32.mxu0 %v1610_v56 }
 0x164   : > { %v7119_v11 = vadd.f32 %v1133_v28, %v7036_v15  ;;  %v1135_v41 = vpop.f32.mrb[33].mxu1  ;;  %1833 = vmatmul.mubr.f32.gmra.mrb[138].mxu1 %v6781_v10 }
 0x165   : > { %v728_v1 = vpop.f32.mrb[18].mxu0  ;;  %1837 = vmatprep.mubr.f32.mxu1 %v1572_v47 }
 0x166   : > { %v730_v18 = vpop.f32.mrb[19].mxu0  ;;  %5215 = vmatmul.mubr.f32.gmra.mrb[124].mxu0 %v1611_v59  ;;  %v7123_v50 = vadd.f32 %v7008_v4, %v728_v1  ;;  %v1576_v59 = vld [vmem:[#allocation2 + $0x169] sm:$0xff] }
 0x167   : > { %v1138_v54 = vpop.f32.mrb[34].mxu1  ;;  %5217 = vmatprep.mubr.f32.mxu0 %v1612_v20  ;;  %v1577_v18 = vld [vmem:[#allocation2 + $0x171] sm:$0xff] }
 0x168   : > { %v7126_v17 = vadd.f32 %v1138_v54, %v7046_v57  ;;  %v1140_v15 = vpop.f32.mrb[35].mxu1  ;;  %1838 = vmatmul.mubr.f32.gmra.mrb[140].mxu1 %v6788_v29 }
 0x169   : > { %v733_v37 = vpop.f32.mrb[20].mxu0  ;;  %1842 = vmatprep.mubr.f32.mxu1 %v1573_v53  ;;  %v1578_v15 = vld [vmem:[#allocation2 + $0x181] sm:$0xff] }
 0x16a   : > { %v735_v10 = vpop.f32.mrb[21].mxu0  ;;  %5218 = vmatmul.mubr.f32.gmra.mrb[126].mxu0 %v1613_v48  ;;  %v7130_v8 = vadd.f32 %v7018_v31, %v733_v37 }
 0x16b   : > { %v1143_v58 = vpop.f32.mrb[36].mxu1 }
 0x16c   : > { %v7133_v4 = vadd.f32 %v1143_v58, %v7056_v26  ;;  %v1145_v5 = vpop.f32.mrb[37].mxu1  ;;  %1843 = vmatmul.mubr.f32.gmra.mrb[142].mxu1 %v6794_v49  ;;  %v1579_v58 = vld [vmem:[#allocation2 + $0x189] sm:$0xff] }
 0x16d   : > { %v738_v57 = vpop.f32.mrb[22].mxu0  ;;  %1847 = vmatprep.mubr.f32.mxu1 %v1574_v40 }
 0x16e   : > { %v740_v56 = vpop.f32.mrb[23].mxu0  ;;  %v7137_v29 = vadd.f32 %v7015_v45, %v738_v57 }
 0x16f   : > { %v1148_v14 = vpop.f32.mrb[38].mxu1 }
 0x170   : > { %v7140_v47 = vadd.f32 %v1148_v14, %v7066_v36  ;;  %v1150_v31 = vpop.f32.mrb[39].mxu1  ;;  %1848 = vmatmul.mubr.f32.gmra.mrb[144].mxu1 %v6802_v61  ;;  %v1580_v14 = vld [vmem:[#allocation2 + $0x199] sm:$0xff] }
 0x171   : > { %v743_v28 = vpop.f32.mrb[24].mxu0  ;;  %1852 = vmatprep.mubr.f32.mxu1 %v1575_v62 }
 0x172   : > { %v745_v26 = vpop.f32.mrb[25].mxu0  ;;  %v7144_v49 = vadd.f32 %v7025_v12, %v743_v28 }
 0x173   : > { %v1153_v41 = vpop.f32.mrb[40].mxu1 }
 0x174   : > { %v7147_v20 = vadd.f32 %v1153_v41, %v7076_v2  ;;  %v1155_v45 = vpop.f32.mrb[41].mxu1  ;;  %1853 = vmatmul.mubr.f32.gmra.mrb[146].mxu1 %v6808_v9 }
 0x175   : > { %v748_v1 = vpop.f32.mrb[26].mxu0  ;;  %1857 = vmatprep.mubr.f32.mxu1 %v1576_v59 }
 0x176   : > { %v750_v36 = vpop.f32.mrb[27].mxu0  ;;  %v7151_v61 = vadd.f32 %v7022_v51, %v748_v1 }
 0x177   : > { %v1158_v53 = vpop.f32.mrb[42].mxu1 }
 0x178   : > { %v7154_v54 = vadd.f32 %v1158_v53, %v7086_v21  ;;  %v1160_v12 = vpop.f32.mrb[43].mxu1  ;;  %1858 = vmatmul.mubr.f32.gmra.mrb[148].mxu1 %v6814_v6 }
 0x179   : > { %v753_v48 = vpop.f32.mrb[28].mxu0  ;;  %1862 = vmatprep.mubr.f32.mxu1 %v1577_v18 }
 0x17a   : > { %v755_v2 = vpop.f32.mrb[29].mxu0  ;;  %v7158_v9 = vadd.f32 %v7032_v23, %v753_v48 }
 0x17b   : > { %v1163_v37 = vpop.f32.mrb[44].mxu1 }
 0x17c   : > { %v7161_v10 = vadd.f32 %v1163_v37, %v7096_v60  ;;  %v1165_v51 = vpop.f32.mrb[45].mxu1  ;;  %1863 = vmatmul.mubr.f32.gmra.mrb[150].mxu1 %v6820_v7 }
 0x17d   : > { %v758_v40 = vpop.f32.mrb[30].mxu0  ;;  %1867 = vmatprep.mubr.f32.mxu1 %v1578_v15 }
 0x17e   : > { %v760_v21 = vpop.f32.mrb[31].mxu0  ;;  %v984_v6 = vadd.f32 %v7029_v25, %v758_v40 }
 0x17f   : > { %v1168_v5 = vpop.f32.mrb[46].mxu1 }
 0x180   : > { %v7166_v57 = vadd.f32 %v1168_v5, %v7106_v44  ;;  %v1170_v56 = vpop.f32.mrb[47].mxu1  ;;  %1868 = vmatmul.mubr.f32.gmra.mrb[152].mxu1 %v6826_v22  ;;  %v1548_v44 = vld [vmem:[#allocation2 + $0x198] sm:$0xff]  ;;  %v1581_v22 = vld [vmem:[#allocation2 + $0x1a1] sm:$0xff] }
 0x181   : > { %v763_v23 = vpop.f32.mrb[32].mxu0  ;;  %1872 = vmatprep.mubr.f32.mxu1 %v1579_v58 }
 0x182   : > { %v989_v60 = vadd.f32 %v7041_v30, %v763_v23  ;;  %v765_v62 = vpop.f32.mrb[33].mxu0 }
 0x183   : > { %v1173_v7 = vpop.f32.mrb[48].mxu1 }
 0x184   : > { %v7171_v31 = vadd.f32 %v1173_v7, %v7116_v55  ;;  %v1175_v28 = vpop.f32.mrb[49].mxu1  ;;  %1873 = vmatmul.mubr.f32.gmra.mrb[154].mxu1 %v6832_v13  ;;  %v1549_v55 = vld [vmem:[#allocation2 + $0x1a0] sm:$0xff] }
 0x185   : > { %v768_v25 = vpop.f32.mrb[34].mxu0  ;;  %1877 = vmatprep.mubr.f32.mxu1 %v1580_v14 }
 0x186   : > { %v994_v26 = vadd.f32 %v7038_v35, %v768_v25  ;;  %v770_v59 = vpop.f32.mrb[35].mxu0 }
 0x187   : > { %v1178_v41 = vpop.f32.mrb[50].mxu1 }
 0x188   : > { %v7176_v45 = vadd.f32 %v1178_v41, %v7123_v50  ;;  %v1180_v30 = vpop.f32.mrb[51].mxu1  ;;  %1878 = vmatmul.mubr.f32.gmra.mrb[156].mxu1 %v1548_v44 }
 0x189   : > { %v773_v1 = vpop.f32.mrb[36].mxu0  ;;  %1882 = vmatprep.mubr.f32.mxu1 %v1581_v22 }
 0x18a   : > { %v999_v36 = vadd.f32 %v7051_v39, %v773_v1  ;;  %v775_v18 = vpop.f32.mrb[37].mxu0 }
 0x18b   : > { %v1183_v13 = vpop.f32.mrb[52].mxu1 }
 0x18c   : > { %v7180_v53 = vadd.f32 %v1183_v13, %v7130_v8  ;;  %v1185_v12 = vpop.f32.mrb[53].mxu1  ;;  %1883 = vmatmul.mubr.f32.gmra.mrb[158].mxu1 %v1549_v55 }
 0x18d   : > { %v778_v35 = vpop.f32.mrb[38].mxu0 }
 0x18e   : > { %v1004_v48 = vadd.f32 %v7048_v0, %v778_v35  ;;  %v780_v2 = vpop.f32.mrb[39].mxu0 }
 0x18f   : > { %v1188_v50 = vpop.f32.mrb[54].mxu1 }
 0x190   : > { %v7184_v15 = vadd.f32 %v1188_v50, %v7137_v29  ;;  %v1190_v37 = vpop.f32.mrb[55].mxu1 }
 0x191   : > { %v783_v51 = vpop.f32.mrb[40].mxu0 }
 0x192   : > { %v1009_v40 = vadd.f32 %v7061_v42, %v783_v51  ;;  %v785_v39 = vpop.f32.mrb[41].mxu0 }
 0x193   : > { %v1193_v21 = vpop.f32.mrb[56].mxu1 }
 0x194   : > { %v7188_v58 = vadd.f32 %v1193_v21, %v7144_v49  ;;  %v1195_v8 = vpop.f32.mrb[57].mxu1 }
 0x195   : > { %v788_v5 = vpop.f32.mrb[42].mxu0 }
 0x196   : > { %v1014_v56 = vadd.f32 %v7058_v33, %v788_v5  ;;  %v790_v23 = vpop.f32.mrb[43].mxu0 }
 0x197   : > { %v1198_v0 = vpop.f32.mrb[58].mxu1 }
 0x198   : > { %v7192_v62 = vadd.f32 %v1198_v0, %v7151_v61  ;;  %v1200_v29 = vpop.f32.mrb[59].mxu1 }
 0x199   : > { %v793_v14 = vpop.f32.mrb[44].mxu0 }
 0x19a   : > { %v1019_v7 = vadd.f32 %v7071_v34, %v793_v14  ;;  %v795_v28 = vpop.f32.mrb[45].mxu0 }
 0x19b   : > { %v1203_v42 = vpop.f32.mrb[60].mxu1 }
 0x19c   : > { %v7196_v25 = vadd.f32 %v1203_v42, %v7158_v9  ;;  %v1205_v49 = vpop.f32.mrb[61].mxu1 }
 0x19d   : > { %v798_v44 = vpop.f32.mrb[46].mxu0 }
 0x19e   : > { %v1024_v59 = vadd.f32 %v7068_v43, %v798_v44  ;;  %v800_v22 = vpop.f32.mrb[47].mxu0 }
 0x19f   : > { %v1208_v33 = vpop.f32.mrb[62].mxu1 }
 0x1a0   : > { %v7199_v41 = vadd.f32 %v1208_v33, %v984_v6  ;;  %v1210_v30 = vpop.f32.mrb[63].mxu1 }
 0x1a1   : > { %v803_v61 = vpop.f32.mrb[48].mxu0 }
 0x1a2   : > { %v1029_v1 = vadd.f32 %v7081_v38, %v803_v61  ;;  %v805_v55 = vpop.f32.mrb[49].mxu0 }
 0x1a3   : > { %v1213_v18 = vpop.f32.mrb[64].mxu1 }
 0x1a4   : > { %v7202_v34 = vadd.f32 %v1213_v18, %v989_v60  ;;  %v1215_v13 = vpop.f32.mrb[65].mxu1 }
 0x1a5   : > { %v808_v12 = vpop.f32.mrb[50].mxu0 }
 0x1a6   : > { %v1034_v9 = vadd.f32 %v7078_v52, %v808_v12  ;;  %v810_v35 = vpop.f32.mrb[51].mxu0 }
 0x1a7   : > { %v1218_v2 = vpop.f32.mrb[66].mxu1 }
 0x1a8   : > { %v7205_v50 = vadd.f32 %v1218_v2, %v994_v26  ;;  %v1220_v43 = vpop.f32.mrb[67].mxu1 }
 0x1a9   : > { %v813_v37 = vpop.f32.mrb[52].mxu0 }
 0x1aa   : > { %v1039_v6 = vadd.f32 %v7091_v46, %v813_v37  ;;  %v815_v51 = vpop.f32.mrb[53].mxu0 }
 0x1ab   : > { %v1223_v39 = vpop.f32.mrb[68].mxu1 }
 0x1ac   : > { %v7208_v21 = vadd.f32 %v1223_v39, %v999_v36  ;;  %v1225_v38 = vpop.f32.mrb[69].mxu1 }
 0x1ad   : > { %v818_v8 = vpop.f32.mrb[54].mxu0 }
 0x1ae   : > { %v1044_v60 = vadd.f32 %v7088_v19, %v818_v8  ;;  %v820_v5 = vpop.f32.mrb[55].mxu0 }
 0x1af   : > { %v1228_v23 = vpop.f32.mrb[70].mxu1 }
 0x1b0   : > { %v7211_v0 = vadd.f32 %v1228_v23, %v1004_v48  ;;  %v1230_v52 = vpop.f32.mrb[71].mxu1 }
 0x1b1   : > { %v823_v29 = vpop.f32.mrb[56].mxu0 }
 0x1b2   : > { %v1049_v26 = vadd.f32 %v7101_v32, %v823_v29  ;;  %v825_v14 = vpop.f32.mrb[57].mxu0 }
 0x1b3   : > { %v1233_v28 = vpop.f32.mrb[72].mxu1 }
 0x1b4   : > { %v7214_v42 = vadd.f32 %v1233_v28, %v1009_v40  ;;  %v1235_v46 = vpop.f32.mrb[73].mxu1 }
 0x1b5   : > { %v828_v49 = vpop.f32.mrb[58].mxu0 }
 0x1b6   : > { %v1054_v36 = vadd.f32 %v7098_v3, %v828_v49  ;;  %v830_v44 = vpop.f32.mrb[59].mxu0 }
 0x1b7   : > { %v1238_v22 = vpop.f32.mrb[74].mxu1 }
 0x1b8   : > { %v7217_v33 = vadd.f32 %v1238_v22, %v1014_v56  ;;  %v1240_v19 = vpop.f32.mrb[75].mxu1 }
 0x1b9   : > { %v833_v30 = vpop.f32.mrb[60].mxu0 }
 0x1ba   : > { %v1059_v48 = vadd.f32 %v7111_v27, %v833_v30  ;;  %v835_v61 = vpop.f32.mrb[61].mxu0 }
 0x1bb   : > { %v1243_v55 = vpop.f32.mrb[76].mxu1 }
 0x1bc   : > { %v7220_v18 = vadd.f32 %v1243_v55, %v1019_v7  ;;  %v1245_v32 = vpop.f32.mrb[77].mxu1 }
 0x1bd   : > { %v838_v13 = vpop.f32.mrb[62].mxu0 }
 0x1be   : > { %v1064_v40 = vadd.f32 %v7108_v63, %v838_v13  ;;  %v840_v12 = vpop.f32.mrb[63].mxu0 }
 0x1bf   : > { %v1248_v35 = vpop.f32.mrb[78].mxu1 }
 0x1c0   : > { %v7223_v2 = vadd.f32 %v1248_v35, %v1024_v59  ;;  %v1250_v3 = vpop.f32.mrb[79].mxu1 }
 0x1c1   : > { %v5094_v43 = vpop.f32.mrb[64].mxu0 }
 0x1c2   : > { %v7226_v56 = vadd.f32 %v5094_v43, %v7126_v17  ;;  %v1358_v37 = vpop.f32.mrb[65].mxu0 }
 0x1c3   : > { %v1253_v51 = vpop.f32.mrb[80].mxu1  ;;  %v7229_v27 = vadd.f32 %v1358_v37, %v7119_v11 }
 0x1c4   : > { %v7231_v7 = vadd.f32 %v1253_v51, %v1029_v1  ;;  %v1255_v39 = vpop.f32.mrb[81].mxu1 }
 0x1c5   : > { %v5097_v38 = vpop.f32.mrb[66].mxu0 }
 0x1c6   : > { %v7234_v63 = vadd.f32 %v5097_v38, %v7140_v47  ;;  %v1368_v8 = vpop.f32.mrb[67].mxu0 }
 0x1c7   : > { %v1258_v59 = vpop.f32.mrb[82].mxu1  ;;  %v7237_v5 = vadd.f32 %v1368_v8, %v7133_v4 }
 0x1c8   : > { %v7239_v23 = vadd.f32 %v1258_v59, %v1034_v9  ;;  %v1260_v17 = vpop.f32.mrb[83].mxu1 }
 0x1c9   : > { %v5100_v52 = vpop.f32.mrb[68].mxu0 }
 0x1ca   : > { %v7242_v29 = vadd.f32 %v5100_v52, %v7154_v54  ;;  %v1378_v11 = vpop.f32.mrb[69].mxu0 }
 0x1cb   : > { %v1263_v1 = vpop.f32.mrb[84].mxu1  ;;  %v7245_v14 = vadd.f32 %v1378_v11, %v7147_v20 }
 0x1cc   : > { %v7247_v28 = vadd.f32 %v1263_v1, %v1039_v6  ;;  %v1265_v47 = vpop.f32.mrb[85].mxu1 }
 0x1cd   : > { %v5103_v46 = vpop.f32.mrb[70].mxu0 }
 0x1ce   : > { %v7250_v49 = vadd.f32 %v5103_v46, %v7166_v57  ;;  %v1388_v4 = vpop.f32.mrb[71].mxu0 }
 0x1cf   : > { %v1268_v9 = vpop.f32.mrb[86].mxu1  ;;  %v7253_v44 = vadd.f32 %v1388_v4, %v7161_v10 }
 0x1d0   : > { %v1269_v22 = vadd.f32 %v1268_v9, %v1044_v60  ;;  %v1270_v54 = vpop.f32.mrb[87].mxu1 }
 0x1d1   : > { %v5106_v19 = vpop.f32.mrb[72].mxu0 }
 0x1d2   : > { %v7256_v30 = vadd.f32 %v5106_v19, %v7176_v45  ;;  %v1398_v20 = vpop.f32.mrb[73].mxu0 }
 0x1d3   : > { %v1273_v61 = vpop.f32.mrb[88].mxu1  ;;  %v7259_v6 = vadd.f32 %v1398_v20, %v7171_v31 }
 0x1d4   : > { %v1274_v55 = vadd.f32 %v1273_v61, %v1049_v26  ;;  %v1275_v32 = vpop.f32.mrb[89].mxu1 }
 0x1d5   : > { %v5109_v57 = vpop.f32.mrb[74].mxu0 }
 0x1d6   : > { %v7262_v13 = vadd.f32 %v5109_v57, %v7184_v15  ;;  %v1408_v12 = vpop.f32.mrb[75].mxu0 }
 0x1d7   : > { %v1278_v10 = vpop.f32.mrb[90].mxu1  ;;  %v7265_v60 = vadd.f32 %v1408_v12, %v7180_v53 }
 0x1d8   : > { %v1279_v35 = vadd.f32 %v1278_v10, %v1054_v36  ;;  %v1280_v3 = vpop.f32.mrb[91].mxu1 }
 0x1d9   : > { %v5112_v45 = vpop.f32.mrb[76].mxu0 }
 0x1da   : > { %v7268_v43 = vadd.f32 %v5112_v45, %v7192_v62  ;;  %v1418_v37 = vpop.f32.mrb[77].mxu0 }
 0x1db   : > { %v1283_v31 = vpop.f32.mrb[92].mxu1  ;;  %v7271_v26 = vadd.f32 %v1418_v37, %v7188_v58 }
 0x1dc   : > { %v1284_v51 = vadd.f32 %v1283_v31, %v1059_v48  ;;  %v1285_v39 = vpop.f32.mrb[93].mxu1 }
 0x1dd   : > { %v5115_v15 = vpop.f32.mrb[78].mxu0 }
 0x1de   : > { %v7274_v38 = vadd.f32 %v5115_v15, %v7199_v41  ;;  %v1428_v8 = vpop.f32.mrb[79].mxu0 }
 0x1df   : > { %v1288_v53 = vpop.f32.mrb[94].mxu1  ;;  %v7277_v36 = vadd.f32 %v1428_v8, %v7196_v25 }
 0x1e0   : > { %v1289_v59 = vadd.f32 %v1288_v53, %v1064_v40  ;;  %v1290_v17 = vpop.f32.mrb[95].mxu1 }
 0x1e1   : > { %v5118_v62 = vpop.f32.mrb[80].mxu0 }
 0x1e2   : > { %v7280_v52 = vadd.f32 %v5118_v62, %v7205_v50  ;;  %v1438_v11 = vpop.f32.mrb[81].mxu0 }
 0x1e3   : > { %v7283_v58 = vadd.f32 %v1438_v11, %v7202_v34  ;;  %v1729_v48 = vpop.f32.mrb[96].mxu1 }
 0x1e4   : > { %v1731_v1 = vpop.f32.mrb[97].mxu1 }
 0x1e5   : > { %v5121_v47 = vpop.f32.mrb[82].mxu0 }
 0x1e6   : > { %v7286_v41 = vadd.f32 %v5121_v47, %v7211_v0  ;;  %v1448_v46 = vpop.f32.mrb[83].mxu0 }
 0x1e7   : > { %v7289_v25 = vadd.f32 %v1448_v46, %v7208_v21  ;;  %v1734_v40 = vpop.f32.mrb[98].mxu1 }
 0x1e8   : > { %v1736_v4 = vpop.f32.mrb[99].mxu1 }
 0x1e9   : > { %v5124_v9 = vpop.f32.mrb[84].mxu0 }
 0x1ea   : > { %v7292_v50 = vadd.f32 %v5124_v9, %v7217_v33  ;;  %v1458_v54 = vpop.f32.mrb[85].mxu0 }
 0x1eb   : > { %v7295_v34 = vadd.f32 %v1458_v54, %v7214_v42  ;;  %v1739_v19 = vpop.f32.mrb[100].mxu1 }
 0x1ec   : > { %v1741_v20 = vpop.f32.mrb[101].mxu1 }
 0x1ed   : > { %v5127_v61 = vpop.f32.mrb[86].mxu0 }
 0x1ee   : > { %v7298_v0 = vadd.f32 %v5127_v61, %v7223_v2  ;;  %v1468_v32 = vpop.f32.mrb[87].mxu0 }
 0x1ef   : > { %v7301_v21 = vadd.f32 %v1468_v32, %v7220_v18  ;;  %v1744_v57 = vpop.f32.mrb[102].mxu1 }
 0x1f0   : > { %v1746_v12 = vpop.f32.mrb[103].mxu1 }
 0x1f1   : > { %v5130_v10 = vpop.f32.mrb[88].mxu0 }
 0x1f2   : > { %v7304_v33 = vadd.f32 %v5130_v10, %v7239_v23  ;;  %v1478_v3 = vpop.f32.mrb[89].mxu0 }
 0x1f3   : > { %v7307_v42 = vadd.f32 %v1478_v3, %v7231_v7  ;;  %v1749_v45 = vpop.f32.mrb[104].mxu1 }
 0x1f4   : > { %v1751_v37 = vpop.f32.mrb[105].mxu1 }
 0x1f5   : > { %v5133_v31 = vpop.f32.mrb[90].mxu0 }
 0x1f6   : > { %v7309_v39 = vadd.f32 %v5133_v31, %v1269_v22  ;;  %v1488_v2 = vpop.f32.mrb[91].mxu0 }
 0x1f7   : > { %v7312_v15 = vadd.f32 %v1488_v2, %v7247_v28  ;;  %v1754_v18 = vpop.f32.mrb[106].mxu1 }
 0x1f8   : > { %v1756_v8 = vpop.f32.mrb[107].mxu1 }
 0x1f9   : > { %v5136_v53 = vpop.f32.mrb[92].mxu0 }
 0x1fa   : > { %v7314_v17 = vadd.f32 %v5136_v53, %v1279_v35  ;;  %v1498_v23 = vpop.f32.mrb[93].mxu0 }
 0x1fb   : > { %v7316_v62 = vadd.f32 %v1498_v23, %v1274_v55  ;;  %v1759_v11 = vpop.f32.mrb[108].mxu1 }
 0x1fc   : > { %v1761_v7 = vpop.f32.mrb[109].mxu1 }
 0x1fd   : > { %v5139_v1 = vpop.f32.mrb[94].mxu0 }
 0x1fe   : > { %v7318_v47 = vadd.f32 %v5139_v1, %v1289_v59  ;;  %v1508_v46 = vpop.f32.mrb[95].mxu0 }
 0x1ff   : > { %v7320_v22 = vadd.f32 %v1508_v46, %v1284_v51  ;;  %v1764_v4 = vpop.f32.mrb[110].mxu1 }
 0x200   : > { %v1766_v9 = vpop.f32.mrb[111].mxu1 }
 0x201   : > { %v5174_v28 = vpop.f32.mrb[96].mxu0 }
 0x202   : > { %v1960_v54 = vadd.f32 %v5174_v28, %v1734_v40  ;;  %v1954_v20 = vpop.f32.mrb[97].mxu0 }
 0x203   : > { %v1769_v61 = vpop.f32.mrb[112].mxu1  ;;  %v1955_v32 = vadd.f32 %v1954_v20, %v1729_v48 }
 0x204   : > { %v7323_v35 = vadd.f32 %v1960_v54, %v7226_v56  ;;  %v1771_v55 = vpop.f32.mrb[113].mxu1 }
 0x205   : > { %v7326_v12 = vadd.f32 %v1955_v32, %v7229_v27  ;;  %v5177_v10 = vpop.f32.mrb[98].mxu0 }
 0x206   : > { %v1970_v59 = vadd.f32 %v5177_v10, %v1744_v57  ;;  %v1964_v3 = vpop.f32.mrb[99].mxu0 }
 0x207   : > { %v1774_v37 = vpop.f32.mrb[114].mxu1  ;;  %v1965_v51 = vadd.f32 %v1964_v3, %v1739_v19  ;;  %v2145_v40 = vadd.f32 %v7323_v35, %v7326_v12 }
 0x208   : > { %v7329_v31 = vadd.f32 %v1970_v59, %v7234_v63  ;;  %v1776_v2 = vpop.f32.mrb[115].mxu1 }
 0x209   : > { %v7334_v48 = vadd.f32 %v1965_v51, %v7237_v5  ;;  %v5180_v56 = vpop.f32.mrb[100].mxu0 }
 0x20a   : > { %v1980_v8 = vadd.f32 %v5180_v56, %v1754_v18  ;;  %v1974_v53 = vpop.f32.mrb[101].mxu0 }
 0x20b   : > { %v2146_v27 = vadd.f32 %v2145_v40, %v7334_v48  ;;  %v1779_v23 = vpop.f32.mrb[116].mxu1  ;;  %v1975_v57 = vadd.f32 %v1974_v53, %v1749_v45 }
 0x20c   : > { %v7338_v7 = vadd.f32 %v1980_v8, %v7242_v29  ;;  %v1781_v19 = vpop.f32.mrb[117].mxu1 }
 0x20d   : > { %v7341_v63 = vadd.f32 %v1975_v57, %v7245_v14  ;;  %v2147_v1 = vadd.f32 %v2146_v27, %v7329_v31  ;;  %v5183_v46 = vpop.f32.mrb[102].mxu0 }
 0x20e   : > { %v1990_v9 = vadd.f32 %v5183_v46, %v1764_v4  ;;  %v1984_v5 = vpop.f32.mrb[103].mxu0 }
 0x20f   : > { %v2148_v28 = vadd.f32 %v2147_v1, %v7341_v63  ;;  %v1784_v18 = vpop.f32.mrb[118].mxu1  ;;  %v1985_v54 = vadd.f32 %v1984_v5, %v1759_v11 }
 0x210   : > { %v7346_v20 = vadd.f32 %v1990_v9, %v7250_v49  ;;  %v1786_v45 = vpop.f32.mrb[119].mxu1 }
 0x211   : > { %v7349_v29 = vadd.f32 %v1985_v54, %v7253_v44  ;;  %v2149_v32 = vadd.f32 %v2148_v28, %v7338_v7  ;;  %v5186_v14 = vpop.f32.mrb[104].mxu0 }
 0x212   : > { %v2000_v55 = vadd.f32 %v5186_v14, %v1774_v37  ;;  %v1994_v10 = vpop.f32.mrb[105].mxu0 }
 0x213   : > { %v2150_v59 = vadd.f32 %v2149_v32, %v7349_v29  ;;  %v1789_v4 = vpop.f32.mrb[120].mxu1  ;;  %v1995_v3 = vadd.f32 %v1994_v10, %v1769_v61 }
 0x214   : > { %v7354_v51 = vadd.f32 %v2000_v55, %v7256_v30  ;;  %v1791_v11 = vpop.f32.mrb[121].mxu1 }
 0x215   : > { %v7357_v49 = vadd.f32 %v1995_v3, %v7259_v6  ;;  %v2151_v2 = vadd.f32 %v2150_v59, %v7346_v20  ;;  %v5189_v44 = vpop.f32.mrb[106].mxu0 }
 0x216   : > { %v2010_v40 = vadd.f32 %v5189_v44, %v1784_v18  ;;  %v2004_v56 = vpop.f32.mrb[107].mxu0 }
 0x217   : > { %v2152_v8 = vadd.f32 %v2151_v2, %v7357_v49  ;;  %v1794_v37 = vpop.f32.mrb[122].mxu1  ;;  %v2005_v53 = vadd.f32 %v2004_v56, %v1779_v23 }
 0x218   : > { %v7362_v27 = vadd.f32 %v2010_v40, %v7262_v13  ;;  %v1796_v61 = vpop.f32.mrb[123].mxu1 }
 0x219   : > { %v7365_v30 = vadd.f32 %v2005_v53, %v7265_v60  ;;  %v2153_v57 = vadd.f32 %v2152_v8, %v7354_v51  ;;  %v5192_v6 = vpop.f32.mrb[108].mxu0 }
 0x21a   : > { %v2020_v19 = vadd.f32 %v5192_v6, %v1794_v37  ;;  %v2014_v1 = vpop.f32.mrb[109].mxu0 }
 0x21b   : > { %v1799_v46 = vpop.f32.mrb[124].mxu1  ;;  %v2015_v9 = vadd.f32 %v2014_v1, %v1789_v4  ;;  %v2154_v5 = vadd.f32 %v2153_v57, %v7365_v30 }
 0x21c   : > { %v7370_v28 = vadd.f32 %v2020_v19, %v7268_v43  ;;  %v1801_v23 = vpop.f32.mrb[125].mxu1 }
 0x21d   : > { %v7373_v13 = vadd.f32 %v2015_v9, %v7271_v26  ;;  %v5195_v18 = vpop.f32.mrb[110].mxu0  ;;  %v2155_v32 = vadd.f32 %v2154_v5, %v7362_v27 }
 0x21e   : > { %v2024_v54 = vpop.f32.mrb[111].mxu0 }
 0x21f   : > { %v1804_v60 = vpop.f32.mrb[126].mxu1  ;;  %v2025_v45 = vadd.f32 %v2024_v54, %v1799_v46  ;;  %v2156_v26 = vadd.f32 %v2155_v32, %v7373_v13 }
 0x220   : > { %v2030_v14 = vadd.f32 %v5195_v18, %v1804_v60  ;;  %v1806_v55 = vpop.f32.mrb[127].mxu1 }
 0x221   : > { %v7377_v10 = vadd.f32 %v2025_v45, %v7277_v36  ;;  %v5198_v59 = vpop.f32.mrb[112].mxu0  ;;  %v2157_v37 = vadd.f32 %v2156_v26, %v7370_v28 }
 0x222   : > { %v7380_v4 = vadd.f32 %v2030_v14, %v7274_v38  ;;  %v2034_v43 = vpop.f32.mrb[113].mxu0 }
 0x223   : > { %v1809_v3 = vpop.f32.mrb[128].mxu1  ;;  %v2158_v19 = vadd.f32 %v2157_v37, %v7377_v10 }
 0x224   : > { %v2035_v11 = vadd.f32 %v2034_v43, %v1809_v3  ;;  %v1811_v2 = vpop.f32.mrb[129].mxu1 }
 0x225   : > { %v5201_v44 = vpop.f32.mrb[114].mxu0  ;;  %v2159_v18 = vadd.f32 %v2158_v19, %v7380_v4 }
 0x226   : > { %v7384_v40 = vadd.f32 %v2035_v11, %v7283_v58  ;;  %v2044_v56 = vpop.f32.mrb[115].mxu0 }
 0x227   : > { %v1814_v8 = vpop.f32.mrb[130].mxu1 }
 0x228   : > { %v2040_v36 = vadd.f32 %v5198_v59, %v1814_v8  ;;  %v1816_v53 = vpop.f32.mrb[131].mxu1  ;;  %v2160_v55 = vadd.f32 %v2159_v18, %v7384_v40 }
 0x229   : > { %v5204_v61 = vpop.f32.mrb[116].mxu0 }
 0x22a   : > { %v7388_v38 = vadd.f32 %v2040_v36, %v7280_v52  ;;  %v2054_v57 = vpop.f32.mrb[117].mxu0 }
 0x22b   : > { %v1819_v6 = vpop.f32.mrb[132].mxu1 }
 0x22c   : > { %v2045_v1 = vadd.f32 %v2044_v56, %v1819_v6  ;;  %v1821_v46 = vpop.f32.mrb[133].mxu1 }
 0x22d   : > { %v5207_v9 = vpop.f32.mrb[118].mxu0  ;;  %v2702_v46 = vld [vmem:[#allocation3 + $0x188] sm:$0xff] }
 0x22e   : > { %v7392_v58 = vadd.f32 %v2045_v1, %v7289_v25  ;;  %v2064_v5 = vpop.f32.mrb[119].mxu0  ;;  %v2161_v25 = vadd.f32 %v2160_v55, %v7388_v38  ;;  %v2701_v1 = vld [vmem:[#allocation3 + $0x180] sm:$0xff] }
 0x22f   : > { %v1824_v23 = vpop.f32.mrb[134].mxu1 }
 0x230   : > { %v2050_v54 = vadd.f32 %v5201_v44, %v1824_v23  ;;  %v1826_v60 = vpop.f32.mrb[135].mxu1  ;;  %v2162_v44 = vadd.f32 %v2161_v25, %v7392_v58 }
 0x231   : > { %v5210_v45 = vpop.f32.mrb[120].mxu0 }
 0x232   : > { %v7396_v52 = vadd.f32 %v2050_v54, %v7286_v41  ;;  %v2074_v32 = vpop.f32.mrb[121].mxu0 }
 0x233   : > { %v1829_v14 = vpop.f32.mrb[136].mxu1 }
 0x234   : > { %v2055_v59 = vadd.f32 %v2054_v57, %v1829_v14  ;;  %v1831_v43 = vpop.f32.mrb[137].mxu1  ;;  %v2163_v37 = vadd.f32 %v2162_v44, %v7396_v52 }
 0x235   : > { %v7399_v3 = vpop.f32.mrb[122].mxu0  ;;  %v2704_v43 = vld [vmem:[#allocation3 + $0x198] sm:$0xff] }
 0x236   : > { %v7403_v26 = vadd.f32 %v2055_v59, %v7295_v34  ;;  %v2084_v11 = vpop.f32.mrb[123].mxu0 }
 0x237   : > { %v1834_v2 = vpop.f32.mrb[138].mxu1 }
 0x238   : > { %v2060_v56 = vadd.f32 %v5204_v61, %v1834_v2  ;;  %v1836_v41 = vpop.f32.mrb[139].mxu1  ;;  %v2164_v6 = vadd.f32 %v2163_v37, %v7403_v26  ;;  %v5701_v61 = vpack.c.bf16 %v2702_v46, %v2701_v1  ;;  %v2705_v37 = vld [vmem:[#allocation3 + $0x1a0] sm:$0xff]  ;;  %v2707_v46 = vld [vmem:[#allocation3 + $0x1b0] sm:$0xff] }
 0x239   : > { %v7406_v8 = vpop.f32.mrb[124].mxu0 }
 0x23a   : > { %v7410_v36 = vadd.f32 %v2060_v56, %v7292_v50  ;;  %v7412_v53 = vpop.f32.mrb[125].mxu0  ;;  %5702 = vmatpush1.bf16.msra.mxu0 %v5701_v61  ;;  %v2708_v61 = vld [vmem:[#allocation3 + $0x1b8] sm:$0xff] }
 0x23b   : > { %v1839_v57 = vpop.f32.mrb[140].mxu1  ;;  %5703 = vmatprep.subr.bf16.mxu0 %v9054_v16 }
 0x23c   : > { %v2065_v34 = vadd.f32 %v2064_v5, %v1839_v57  ;;  %v1841_v19 = vpop.f32.mrb[141].mxu1  ;;  %v2165_v18 = vadd.f32 %v2164_v6, %v7410_v36  ;;  %v2703_v5 = vld [vmem:[#allocation3 + $0x190] sm:$0xff]  ;;  %v2706_v57 = vld [vmem:[#allocation3 + $0x1a8] sm:$0xff] }
 0x23d   : > { %v7415_v23 = vpop.f32.mrb[126].mxu0  ;;  %v5704_v25 = vpack.c.bf16 %v2704_v43, %v2703_v5  ;;  %v2710_v5 = vld [vmem:[#allocation3 + $0x1c8] sm:$0xff] }
 0x23e   : > { %v7419_v54 = vadd.f32 %v2065_v34, %v7301_v21  ;;  %v7421_v60 = vpop.f32.mrb[127].mxu0 }
 0x23f   : > { %v1844_v50 = vpop.f32.mrb[142].mxu1  ;;  %5705 = vmatpush1.bf16.msra.mxu0 %v5704_v25 }
 0x240   : > { %v2166_v14 = vadd.f32 %v2165_v18, %v7419_v54  ;;  %v2070_v55 = vadd.f32 %v5207_v9, %v1844_v50  ;;  %v1846_v59 = vpop.f32.mrb[143].mxu1  ;;  %5706 = vmatprep.subr.bf16.mxu0 %v9054_v16  ;;  %v5707_v9 = vpack.c.bf16 %v2706_v57, %v2705_v37 }
 0x241   : > { %v2709_v59 = vld [vmem:[#allocation3 + $0x1c0] sm:$0xff] }
 0x242   : > { %v7426_v2 = vadd.f32 %v2070_v55, %v7298_v0 }
 0x243   : > { %v1849_v44 = vpop.f32.mrb[144].mxu1  ;;  %5708 = vmatpush1.bf16.msra.mxu0 %v5707_v9 }
 0x244   : > { %v2167_v21 = vadd.f32 %v2166_v14, %v7426_v2  ;;  %v2075_v56 = vadd.f32 %v2074_v32, %v1849_v44  ;;  %v1851_v41 = vpop.f32.mrb[145].mxu1  ;;  %5709 = vmatprep.subr.bf16.mxu0 %v9054_v16  ;;  %v5710_v32 = vpack.c.bf16 %v2708_v61, %v2707_v46 }
 0x246   : > { %v7431_v6 = vadd.f32 %v2075_v56, %v7307_v42  ;;  %v2711_v56 = vld [vmem:[#allocation3 + $0x1d0] sm:$0xff] }
 0x247   : > { %v1854_v34 = vpop.f32.mrb[146].mxu1  ;;  %5711 = vmatpush1.bf16.msra.mxu0 %v5710_v32 }
 0x248   : > { %v2168_v19 = vadd.f32 %v2167_v21, %v7431_v6  ;;  %v2080_v0 = vadd.f32 %v5210_v45, %v1854_v34  ;;  %v1856_v1 = vpop.f32.mrb[147].mxu1  ;;  %5712 = vmatprep.subr.bf16.mxu0 %v9054_v16  ;;  %v5713_v45 = vpack.c.bf16 %v2710_v5, %v2709_v59  ;;  %v2733_v59 = vld [vmem:[#allocation3 + $0x280] sm:$0xff]  ;;  %v2734_v5 = vld [vmem:[#allocation3 + $0x288] sm:$0xff] }
 0x24a   : > { %v7436_v18 = vadd.f32 %v2080_v0, %v7304_v33 }
 0x24b   : > { %v1859_v50 = vpop.f32.mrb[148].mxu1  ;;  %5714 = vmatpush1.bf16.msra.mxu0 %v5713_v45 }
 0x24c   : > { %v2169_v14 = vadd.f32 %v2168_v19, %v7436_v18  ;;  %v2085_v42 = vadd.f32 %v2084_v11, %v1859_v50  ;;  %v1861_v55 = vpop.f32.mrb[149].mxu1  ;;  %5715 = vmatprep.subr.bf16.mxu0 %v9054_v16  ;;  %v2712_v11 = vld [vmem:[#allocation3 + $0x1d8] sm:$0xff]  ;;  %v2713_v19 = vld [vmem:[#allocation3 + $0x1e0] sm:$0xff]  ;;  %v2715_v50 = vld [vmem:[#allocation3 + $0x1f0] sm:$0xff] }
 0x24d   : > { %v5716_v41 = vpack.c.bf16 %v2712_v11, %v2711_v56  ;;  %v2735_v11 = vld [vmem:[#allocation3 + $0x290] sm:$0xff] }
 0x24e   : > { %v7441_v43 = vadd.f32 %v2085_v42, %v7312_v15 }
 0x24f   : > { %v1864_v25 = vpop.f32.mrb[150].mxu1  ;;  %5717 = vmatpush1.bf16.msra.mxu0 %v5716_v41  ;;  %v2736_v41 = vld [vmem:[#allocation3 + $0x298] sm:$0xff] }
 0x250   : > { %v2170_v44 = vadd.f32 %v2169_v14, %v7441_v43  ;;  %v2090_v33 = vadd.f32 %v7399_v3, %v1864_v25  ;;  %v1866_v21 = vpop.f32.mrb[151].mxu1  ;;  %5718 = vmatprep.subr.bf16.mxu0 %v9054_v16  ;;  %v2714_v3 = vld [vmem:[#allocation3 + $0x1e8] sm:$0xff] }
 0x251   : > { %v5719_v0 = vpack.c.bf16 %v2714_v3, %v2713_v19  ;;  %v2720_v19 = vld [vmem:[#allocation3 + $0x218] sm:$0xff] }
 0x252   : > { %v7447_v37 = vadd.f32 %v2090_v33, %v7309_v39  ;;  %v2718_v33 = vld [vmem:[#allocation3 + $0x208] sm:$0xff] }
 0x253   : > { %v1869_v57 = vpop.f32.mrb[152].mxu1  ;;  %5720 = vmatpush1.bf16.msra.mxu0 %v5719_v0  ;;  %v2737_v0 = vld [vmem:[#allocation3 + $0x2a0] sm:$0xff] }
 0x254   : > { %v2171_v15 = vadd.f32 %v2170_v44, %v7447_v37  ;;  %v2095_v9 = vadd.f32 %v7412_v53, %v1869_v57  ;;  %v1871_v34 = vpop.f32.mrb[153].mxu1  ;;  %5721 = vmatprep.subr.bf16.mxu0 %v9054_v16  ;;  %v2716_v53 = vld [vmem:[#allocation3 + $0x1f8] sm:$0xff]  ;;  %v5748_v44 = vpack.c.bf16 %v2734_v5, %v2733_v59  ;;  %v2723_v5 = vld [vmem:[#allocation3 + $0x230] sm:$0xff] }
 0x255   : > { %v5722_v14 = vpack.c.bf16 %v2716_v53, %v2715_v50  ;;  %v2719_v34 = vld [vmem:[#allocation3 + $0x210] sm:$0xff] }
 0x256   : > { %v7453_v1 = vadd.f32 %v2095_v9, %v7316_v62  ;;  %5749 = vmatprep.subr.bf16.mxu1 %v5748_v44  ;;  %v5752_v9 = vpack.c.bf16 %v2736_v41, %v2735_v11  ;;  %v5728_v3 = vpack.c.bf16 %v2720_v19, %v2719_v34  ;;  %v2726_v11 = vld [vmem:[#allocation3 + $0x248] sm:$0xff]  ;;  %v2728_v19 = vld [vmem:[#allocation3 + $0x258] sm:$0xff] }
 0x257   : > { %v1874_v46 = vpop.f32.mrb[154].mxu1  ;;  %5723 = vmatpush1.bf16.msra.mxu0 %v5722_v14  ;;  %5751 = vmatpush3.bf16.msra.mxu1 %v5748_v44  ;;  %v2739_v14 = vld [vmem:[#allocation3 + $0x2b0] sm:$0xff]  ;;  %v2741_v44 = vld [vmem:[#allocation3 + $0x2c0] sm:$0xff] }
 0x258   : > { %v2172_v39 = vadd.f32 %v2171_v15, %v7453_v1  ;;  %v2100_v61 = vadd.f32 %v7406_v8, %v1874_v46  ;;  %v1876_v32 = vpop.f32.mrb[155].mxu1  ;;  %5724 = vmatprep.subr.bf16.mxu0 %v9054_v16  ;;  %v2717_v8 = vld [vmem:[#allocation3 + $0x200] sm:$0xff]  ;;  %5753 = vmatprep.subr.bf16.mxu1 %v5752_v9  ;;  %v2738_v46 = vld [vmem:[#allocation3 + $0x2a8] sm:$0xff] }
 0x259   : > { %v5725_v21 = vpack.c.bf16 %v2718_v33, %v2717_v8  ;;  %v2722_v32 = vld [vmem:[#allocation3 + $0x228] sm:$0xff] }
 0x25a   : > { %v7459_v42 = vadd.f32 %v2100_v61, %v7314_v17  ;;  %v5756_v61 = vpack.c.bf16 %v2738_v46, %v2737_v0  ;;  %v2742_v8 = vld [vmem:[#allocation3 + $0x2c8] sm:$0xff] }
 0x25b   : > { %v1879_v55 = vpop.f32.mrb[156].mxu1  ;;  %5726 = vmatpush1.bf16.msra.mxu0 %v5725_v21  ;;  %5755 = vmatpush3.bf16.msra.mxu1 %v5752_v9  ;;  %v5764_v21 = vpack.c.bf16 %v2742_v8, %v2741_v44  ;;  %v2727_v9 = vld [vmem:[#allocation3 + $0x250] sm:$0xff]  ;;  %v2746_v0 = vld [vmem:[#allocation3 + $0x2e8] sm:$0xff] }
 0x25c   : > { %v2173_v62 = vadd.f32 %v2172_v39, %v7459_v42  ;;  %v2105_v45 = vadd.f32 %v7421_v60, %v1879_v55  ;;  %v1881_v25 = vpop.f32.mrb[157].mxu1  ;;  %5727 = vmatprep.subr.bf16.mxu0 %v9054_v16  ;;  %5757 = vmatprep.subr.bf16.mxu1 %v5756_v61  ;;  %v5740_v46 = vpack.c.bf16 %v2728_v19, %v2727_v9 }
 0x25e   : > { %v7465_v56 = vadd.f32 %v2105_v45, %v7320_v22 }
 0x25f   : > { %v1884_v17 = vpop.f32.mrb[158].mxu1  ;;  %5729 = vmatpush1.bf16.msra.mxu0 %v5728_v3  ;;  %5759 = vmatpush3.bf16.msra.mxu1 %v5756_v61  ;;  %v2745_v3 = vld [vmem:[#allocation3 + $0x2e0] sm:$0xff]  ;;  %v2730_v61 = vld [vmem:[#allocation3 + $0x268] sm:$0xff] }
 0x260   : > { %v2174_v57 = vadd.f32 %v2173_v62, %v7465_v56  ;;  %v2110_v60 = vadd.f32 %v7415_v23, %v1884_v17  ;;  %v1886_v15 = vpop.f32.mrb[159].mxu1  ;;  %5730 = vmatprep.subr.bf16.mxu0 %v9054_v16  ;;  %v2721_v23 = vld [vmem:[#allocation3 + $0x220] sm:$0xff]  ;;  %v2724_v62 = vld [vmem:[#allocation3 + $0x238] sm:$0xff] }
 0x261   : > { %v5731_v50 = vpack.c.bf16 %v2722_v32, %v2721_v23  ;;  %v5734_v45 = vpack.c.bf16 %v2724_v62, %v2723_v5  ;;  %v2725_v17 = vld [vmem:[#allocation3 + $0x240] sm:$0xff]  ;;  %v2744_v15 = vld [vmem:[#allocation3 + $0x2d8] sm:$0xff]  ;;  %v5772_v32 = vpack.c.bf16 %v2746_v0, %v2745_v3 }
 0x262   : > { %v7471_v22 = vadd.f32 %v2110_v60, %v7318_v47  ;;  %v2740_v47 = vld [vmem:[#allocation3 + $0x2b8] sm:$0xff]  ;;  %v5737_v41 = vpack.c.bf16 %v2726_v11, %v2725_v17  ;;  %v2743_v60 = vld [vmem:[#allocation3 + $0x2d0] sm:$0xff] }
 0x263   : > { %5732 = vmatpush1.bf16.msra.mxu0 %v5731_v50  ;;  %v5760_v59 = vpack.c.bf16 %v2740_v47, %v2739_v14  ;;  %v5768_v34 = vpack.c.bf16 %v2744_v15, %v2743_v60  ;;  %v2748_v14 = vld [vmem:[#allocation3 + $0x2f8] sm:$0xff]  ;;  %v2731_v47 = vld [vmem:[#allocation3 + $0x270] sm:$0xff] }
 0x264   : > { %v2175_v39 = vadd.f32 %v2174_v57, %v7471_v22  ;;  %5733 = vmatprep.subr.bf16.mxu0 %v9054_v16 }
 0x265   : > { %5761 = vmatprep.subr.bf16.mxu1 %v5760_v59 }
 0x266   : > { %v2176_v53 = vrot.slane %v2175_v39, 4  ;;  %5763 = vmatpush3.bf16.msra.mxu1 %v5760_v59 }
 0x267   : > { %5735 = vmatpush1.bf16.msra.mxu0 %v5734_v45  ;;  %5765 = vmatprep.subr.bf16.mxu1 %v5764_v21 }
 0x268   : > { %v2177_v55 = vadd.f32 %v2176_v53, %v2175_v39  ;;  %5736 = vmatprep.subr.bf16.mxu0 %v9054_v16  ;;  %v2729_v39 = vld [vmem:[#allocation3 + $0x260] sm:$0xff]  ;;  %v2747_v53 = vld [vmem:[#allocation3 + $0x2f0] sm:$0xff] }
 0x269   : > { %v5743_v50 = vpack.c.bf16 %v2730_v61, %v2729_v39  ;;  %v5776_v5 = vpack.c.bf16 %v2748_v14, %v2747_v53 }
 0x26a   : > { %v2178_v25 = vrot.slane %v2177_v55, 2  ;;  %5767 = vmatpush3.bf16.msra.mxu1 %v5764_v21  ;;  %v2588_v21 = vld [vmem:[#allocation3 + $0x100] sm:$0xff] }
 0x26b   : > { %5738 = vmatpush1.bf16.msra.mxu0 %v5737_v41  ;;  %5769 = vmatprep.subr.bf16.mxu1 %v5768_v34 }
 0x26c   : > { %v2179_v33 = vadd.f32 %v2178_v25, %v2177_v55  ;;  %5739 = vmatprep.subr.bf16.mxu0 %v9054_v16  ;;  %v2732_v55 = vld [vmem:[#allocation3 + $0x278] sm:$0xff] }
 0x26d   : > { %v5746_v62 = vpack.c.bf16 %v2732_v55, %v2731_v47 }
 0x26e   : > { %v2180_v57 = vrot.slane %v2179_v33, 1  ;;  %5771 = vmatpush3.bf16.msra.mxu1 %v5768_v34 }
 0x26f   : > { %5741 = vmatpush1.bf16.msra.mxu0 %v5740_v46  ;;  %5773 = vmatprep.subr.bf16.mxu1 %v5772_v32 }
 0x270   : > { %v2181_v23 = vadd.f32 %v2180_v57, %v2179_v33  ;;  %5742 = vmatprep.subr.bf16.mxu0 %v9054_v16 }
 0x272   : > { %v7479_v59 = vmul.f32 0.00390625, %v2181_v23  ;;  %5775 = vmatpush3.bf16.msra.mxu1 %v5772_v32 }
 0x273   : > { %5744 = vmatpush1.bf16.msra.mxu0 %v5743_v50  ;;  %5777 = vmatprep.subr.bf16.mxu1 %v5776_v5 }
 0x274   : > { %v7483_v45 = vsub.f32 %v7410_v36, %v7479_v59  ;;  %v7487_v25 = vsub.f32 %v7419_v54, %v7479_v59  ;;  %v7491_v44 = vsub.f32 %v7426_v2, %v7479_v59  ;;  %5745 = vmatprep.subr.bf16.mxu0 %v9054_v16  ;;  %v7496_v8 = vsub.f32 %v7431_v6, %v7479_v59 }
 0x275   : > { %v7500_v33 = vsub.f32 %v7436_v18, %v7479_v59  ;;  %v7504_v36 = vsub.f32 %v7441_v43, %v7479_v59  ;;  %v7508_v54 = vsub.f32 %v7447_v37, %v7479_v59  ;;  %v7512_v2 = vsub.f32 %v7453_v1, %v7479_v59 }
 0x276   : > { %v7516_v6 = vsub.f32 %v7459_v42, %v7479_v59  ;;  %v7520_v18 = vsub.f32 %v7465_v56, %v7479_v59  ;;  %v7524_v43 = vsub.f32 %v7471_v22, %v7479_v59  ;;  %v7528_v37 = vsub.f32 %v7326_v12, %v7479_v59  ;;  %5779 = vmatpush3.bf16.msra.mxu1 %v5776_v5  ;;  %v2589_v12 = vld [vmem:[#allocation3 + $0x108] sm:$0xff] }
 0x277   : > { %5747 = vmatpush1.bf16.msra.mxu0 %v5746_v62  ;;  %v7532_v1 = vsub.f32 %v7323_v35, %v7479_v59  ;;  %5780 = vmatprep.subr.bf16.mxu1 %v9054_v16  ;;  %v7537_v42 = vsub.f32 %v7334_v48, %v7479_v59  ;;  %v7545_v17 = vsub.f32 %v7329_v31, %v7479_v59 }
 0x278   : > { %v2216_v56 = vmul.f32 %v7528_v37, %v7528_v37  ;;  %v7549_v35 = vsub.f32 %v7341_v63, %v7479_v59  ;;  %v7553_v41 = vpack.c.bf16 %v2589_v12, %v2588_v21  ;;  %v7557_v57 = vsub.f32 %v7338_v7, %v7479_v59 }
 0x279   : > { %v2217_v22 = vmul.f32 %v7532_v1, %v7532_v1  ;;  %v2218_v48 = vmul.f32 %v7537_v42, %v7537_v42  ;;  %v2219_v60 = vmul.f32 %v7545_v17, %v7545_v17  ;;  %v7564_v31 = vsub.f32 %v7349_v29, %v7479_v59 }
 0x27a   : > { %5829 = vmatprep.subr.bf16.mxu0 %v7553_v41  ;;  %v2220_v63 = vmul.f32 %v7549_v35, %v7549_v35  ;;  %v7570_v34 = vsub.f32 %v7346_v20, %v7479_v59  ;;  %v2221_v7 = vmul.f32 %v7557_v57, %v7557_v57  ;;  %v7576_v3 = vsub.f32 %v7357_v49, %v7479_v59 }
 0x27b   : > { %v2248_v11 = vadd.f32 %v2217_v22, %v2216_v56  ;;  %v2222_v29 = vmul.f32 %v7564_v31, %v7564_v31  ;;  %v7582_v46 = vsub.f32 %v7354_v51, %v7479_v59  ;;  %v7588_v61 = vsub.f32 %v7365_v30, %v7479_v59 }
 0x27c   : > { %v2223_v20 = vmul.f32 %v7570_v34, %v7570_v34  ;;  %v2224_v49 = vmul.f32 %v7576_v3, %v7576_v3  ;;  %v7594_v32 = vsub.f32 %v7362_v27, %v7479_v59  ;;  %v7600_v53 = vsub.f32 %v7373_v13, %v7479_v59 }
 0x27d   : > { %v2249_v15 = vadd.f32 %v2248_v11, %v2218_v48  ;;  %v2225_v51 = vmul.f32 %v7582_v46, %v7582_v46  ;;  %v2226_v30 = vmul.f32 %v7588_v61, %v7588_v61  ;;  %v7606_v47 = vsub.f32 %v7370_v28, %v7479_v59 }
 0x27e   : > { %v2227_v27 = vmul.f32 %v7594_v32, %v7594_v32  ;;  %v7612_v5 = vsub.f32 %v7377_v10, %v7479_v59  ;;  %v2228_v13 = vmul.f32 %v7600_v53, %v7600_v53  ;;  %v7618_v56 = vsub.f32 %v7380_v4, %v7479_v59 }
 0x27f   : > { %v2250_v9 = vadd.f32 %v2249_v15, %v2219_v60  ;;  %v2229_v28 = vmul.f32 %v7606_v47, %v7606_v47  ;;  %v7624_v21 = vsub.f32 %v7384_v40, %v7479_v59  ;;  %v7630_v48 = vsub.f32 %v7388_v38, %v7479_v59 }
 0x280   : > { %v2230_v10 = vmul.f32 %v7612_v5, %v7612_v5  ;;  %v2231_v4 = vmul.f32 %v7618_v56, %v7618_v56  ;;  %v7636_v60 = vsub.f32 %v7392_v58, %v7479_v59 }
 0x281   : > { %v2251_v19 = vadd.f32 %v2250_v9, %v2220_v63  ;;  %v2232_v40 = vmul.f32 %v7624_v21, %v7624_v21  ;;  %v7642_v63 = vsub.f32 %v7396_v52, %v7479_v59  ;;  %v2233_v38 = vmul.f32 %v7630_v48, %v7630_v48 }
 0x282   : > { %v2234_v58 = vmul.f32 %v7636_v60, %v7636_v60 }
 0x283   : > { %v2252_v0 = vadd.f32 %v2251_v19, %v2221_v7  ;;  %v7648_v7 = vsub.f32 %v7403_v26, %v7479_v59  ;;  %v2238_v26 = vmul.f32 %v7487_v25, %v7487_v25 }
 0x285   : > { %v2253_v39 = vadd.f32 %v2252_v0, %v2222_v29  ;;  %v2235_v29 = vmul.f32 %v7642_v63, %v7642_v63  ;;  %v2236_v52 = vmul.f32 %v7648_v7, %v7648_v7 }
 0x287   : > { %v2254_v23 = vadd.f32 %v2253_v39, %v2223_v20  ;;  %v2237_v39 = vmul.f32 %v7483_v45, %v7483_v45 }
 0x289   : > { %v2255_v50 = vadd.f32 %v2254_v23, %v2224_v49  ;;  %v2239_v23 = vmul.f32 %v7491_v44, %v7491_v44 }
 0x28b   : > { %v2256_v14 = vadd.f32 %v2255_v50, %v2225_v51  ;;  %v2240_v50 = vmul.f32 %v7496_v8, %v7496_v8 }
 0x28d   : > { %v2257_v55 = vadd.f32 %v2256_v14, %v2226_v30  ;;  %v2241_v14 = vmul.f32 %v7500_v33, %v7500_v33 }
 0x28f   : > { %v2258_v62 = vadd.f32 %v2257_v55, %v2227_v27  ;;  %v2242_v55 = vmul.f32 %v7504_v36, %v7504_v36 }
 0x291   : > { %v2259_v22 = vadd.f32 %v2258_v62, %v2228_v13  ;;  %v2243_v62 = vmul.f32 %v7508_v54, %v7508_v54 }
 0x293   : > { %v2260_v12 = vadd.f32 %v2259_v22, %v2229_v28  ;;  %v2244_v22 = vmul.f32 %v7512_v2, %v7512_v2 }
 0x295   : > { %v2261_v11 = vadd.f32 %v2260_v12, %v2230_v10  ;;  %v2245_v12 = vmul.f32 %v7516_v6, %v7516_v6 }
 0x297   : > { %v2262_v15 = vadd.f32 %v2261_v11, %v2231_v4  ;;  %v2246_v11 = vmul.f32 %v7520_v18, %v7520_v18 }
 0x299   : > { %v2263_v9 = vadd.f32 %v2262_v15, %v2232_v40  ;;  %v2247_v15 = vmul.f32 %v7524_v43, %v7524_v43 }
 0x29b   : > { %v2264_v19 = vadd.f32 %v2263_v9, %v2233_v38 }
 0x29d   : > { %v2265_v0 = vadd.f32 %v2264_v19, %v2234_v58 }
 0x29f   : > { %v2266_v20 = vadd.f32 %v2265_v0, %v2235_v29 }
 0x2a1   : > { %v2267_v49 = vadd.f32 %v2266_v20, %v2236_v52 }
 0x2a3   : > { %v2268_v59 = vadd.f32 %v2267_v49, %v2237_v39 }
 0x2a5   : > { %v2269_v51 = vadd.f32 %v2268_v59, %v2238_v26 }
 0x2a7   : > { %v2270_v30 = vadd.f32 %v2269_v51, %v2239_v23 }
 0x2a9   : > { %v2271_v27 = vadd.f32 %v2270_v30, %v2240_v50 }
 0x2ab   : > { %v2272_v13 = vadd.f32 %v2271_v27, %v2241_v14 }
 0x2ad   : > { %v2273_v28 = vadd.f32 %v2272_v13, %v2242_v55 }
 0x2af   : > { %v2274_v10 = vadd.f32 %v2273_v28, %v2243_v62 }
 0x2b1   : > { %v2275_v4 = vadd.f32 %v2274_v10, %v2244_v22 }
 0x2b3   : > { %v2276_v40 = vadd.f32 %v2275_v4, %v2245_v12 }
 0x2b5   : > { %v2277_v38 = vadd.f32 %v2276_v40, %v2246_v11 }
 0x2b7   : > { %v2278_v9 = vadd.f32 %v2277_v38, %v2247_v15 }
 0x2b9   : > { %v2279_v58 = vrot.slane %v2278_v9, 4 }
 0x2bb   : > { %v2280_v19 = vadd.f32 %v2279_v58, %v2278_v9 }
 0x2bd   : > { %v2281_v29 = vrot.slane %v2280_v19, 2 }
 0x2bf   : > { %v2282_v0 = vadd.f32 %v2281_v29, %v2280_v19 }
 0x2c1   : > { %v2283_v52 = vrot.slane %v2282_v0, 1 }
 0x2c3   : > { %v2284_v20 = vadd.f32 %v2283_v52, %v2282_v0 }
 0x2c5   : > { %v2285_v39 = vmul.f32 0.00390625, %v2284_v20 }
 0x2c7   : > { %v2286_v49 = vadd.f32 1e-05, %v2285_v39 }
 0x2c9   : > { %5962 = vrsqrt.f32 %v2286_v49 }
 0x2d3   : > { %v5963_v26 = vpop.eup %5962 }
 0x2d4   : > { %v2319_v59 = vmul.f32 %v5963_v26, %v7524_v43  ;;  %v2288_v23 = vmul.f32 %v5963_v26, %v7528_v37  ;;  %v2289_v51 = vmul.f32 %v5963_v26, %v7532_v1  ;;  %v2290_v50 = vmul.f32 %v5963_v26, %v7537_v42 }
 0x2d5   : > { %v2291_v30 = vmul.f32 %v5963_v26, %v7545_v17  ;;  %v2292_v14 = vmul.f32 %v5963_v26, %v7549_v35  ;;  %v2293_v27 = vmul.f32 %v5963_v26, %v7557_v57  ;;  %v2294_v55 = vmul.f32 %v5963_v26, %v7564_v31 }
 0x2d6   : > { %v2351_v13 = vmax.f32 %v2319_v59, 0.0  ;;  %v7687_v62 = vmul.f32 %v5963_v26, %v7570_v34  ;;  %v7690_v43 = vmul.f32 %v5963_v26, %v7576_v3  ;;  %v7693_v37 = vmul.f32 %v5963_v26, %v7582_v46 }
 0x2d7   : > { %v7696_v1 = vmul.f32 %v5963_v26, %v7588_v61  ;;  %v7699_v42 = vmul.f32 %v5963_v26, %v7594_v32  ;;  %v7702_v17 = vmul.f32 %v5963_v26, %v7600_v53  ;;  %v7705_v35 = vmul.f32 %v5963_v26, %v7606_v47 }
 0x2d8   : > { %v7708_v57 = vmul.f32 %v5963_v26, %v7612_v5  ;;  %v7711_v31 = vmul.f32 %v5963_v26, %v7618_v56  ;;  %v7714_v34 = vmul.f32 %v5963_v26, %v7624_v21  ;;  %v7717_v3 = vmul.f32 %v5963_v26, %v7630_v48  ;;  %2383 = vst [vmem:[#allocation2 + $0x189] sm:$0xff] %v2351_v13 }
 0x2d9   : > { %v7720_v46 = vmul.f32 %v5963_v26, %v7636_v60  ;;  %v7723_v61 = vmul.f32 %v5963_v26, %v7642_v63  ;;  %v7726_v32 = vmul.f32 %v5963_v26, %v7648_v7  ;;  %v7729_v53 = vmul.f32 %v5963_v26, %v7483_v45 }
 0x2da   : > { %v7732_v47 = vmul.f32 %v5963_v26, %v7487_v25  ;;  %v7735_v5 = vmul.f32 %v5963_v26, %v7491_v44  ;;  %v7738_v56 = vmul.f32 %v5963_v26, %v7496_v8  ;;  %v7741_v21 = vmul.f32 %v5963_v26, %v7500_v33 }
 0x2db   : > { %v7744_v48 = vmul.f32 %v5963_v26, %v7504_v36  ;;  %v7747_v60 = vmul.f32 %v5963_v26, %v7508_v54  ;;  %v7750_v45 = vmul.f32 %v5963_v26, %v7512_v2  ;;  %v7753_v25 = vmul.f32 %v5963_v26, %v7516_v6 }
 0x2dc   : > { %v7756_v44 = vmul.f32 %v5963_v26, %v7520_v18  ;;  %v7758_v8 = vmax.f32 %v2288_v23, 0.0  ;;  %v7760_v63 = vmax.f32 %v2289_v51, 0.0  ;;  %v7762_v33 = vmax.f32 %v2290_v50, 0.0 }
 0x2dd   : > { %v7764_v36 = vmax.f32 %v2291_v30, 0.0  ;;  %v7766_v7 = vmax.f32 %v2292_v14, 0.0  ;;  %v7768_v54 = vmax.f32 %v2293_v27, 0.0  ;;  %v7770_v2 = vmax.f32 %v2294_v55, 0.0 }
 0x2de   : > { %v2327_v6 = vmax.f32 %v7687_v62, 0.0  ;;  %v9000_v28 = vmax.f32 %v7690_v43, 0.0  ;;  %v8999_v18 = vmax.f32 %v7693_v37, 0.0  ;;  %v8998_v22 = vmax.f32 %v7696_v1, 0.0  ;;  %2352 = vst [vmem:[#allocation2 + $0x19] sm:$0xff] %v7758_v8  ;;  %2353 = vst [vmem:[#allocation2 + $0x21] sm:$0xff] %v7760_v63  ;;  %2813 = vmatprep.mubr.f32.mxu0 %v7758_v8 }
 0x2df   : > { %2354 = vst [vmem:[#allocation2 + $0x31] sm:$0xff] %v7762_v33  ;;  %2384 = vst [vmem:[#allocation2 + $0x1] sm:$0xff] %v7762_v33  ;;  %v8997_v10 = vmax.f32 %v7699_v42, 0.0  ;;  %v8996_v12 = vmax.f32 %v7702_v17, 0.0  ;;  %v8995_v4 = vmax.f32 %v7705_v35, 0.0  ;;  %v8994_v11 = vmax.f32 %v7708_v57, 0.0 }
 0x2e0   : > { %2355 = vst [vmem:[#allocation2 + $0x39] sm:$0xff] %v7764_v36  ;;  %2356 = vst [vmem:[#allocation2 + $0x49] sm:$0xff] %v7766_v7  ;;  %v2440_v40 = vld [vmem:[#allocation2 + $0x18f] sm:$0x1]  ;;  %v8993_v15 = vmax.f32 %v7711_v31, 0.0  ;;  %v8992_v38 = vmax.f32 %v7714_v34, 0.0 }
 0x2e1   : > { %2357 = vst [vmem:[#allocation2 + $0x51] sm:$0xff] %v7768_v54  ;;  %2358 = vst [vmem:[#allocation2 + $0x61] sm:$0xff] %v7770_v2  ;;  %v8991_v9 = vmax.f32 %v7717_v3, 0.0  ;;  %v8990_v58 = vmax.f32 %v7720_v46, 0.0  ;;  %v8989_v19 = vmax.f32 %v7723_v61, 0.0  ;;  %v8988_v29 = vmax.f32 %v7726_v32, 0.0 }
 0x2e2   : > { %2385 = vst [vmem:[#allocation2 + $0x9] sm:$0xff] %v7764_v36  ;;  %2359 = vst [vmem:[#allocation2 + $0x69] sm:$0xff] %v2327_v6  ;;  %v8987_v0 = vmax.f32 %v7729_v53, 0.0  ;;  %v8986_v52 = vmax.f32 %v7732_v47, 0.0  ;;  %v8985_v20 = vmax.f32 %v7735_v5, 0.0  ;;  %v8984_v39 = vmax.f32 %v7738_v56, 0.0 }
 0x2e3   : > { %2360 = vst [vmem:[#allocation2 + $0x79] sm:$0xff] %v9000_v28  ;;  %2361 = vst [vmem:[#allocation2 + $0x81] sm:$0xff] %v8999_v18  ;;  %v8983_v49 = vmax.f32 %v7741_v21, 0.0  ;;  %v8982_v26 = vmax.f32 %v7744_v48, 0.0  ;;  %v2347_v59 = vmax.f32 %v7747_v60, 0.0  ;;  %v2348_v23 = vmax.f32 %v7750_v45, 0.0 }
 0x2e4   : > { %2362 = vst [vmem:[#allocation2 + $0x91] sm:$0xff] %v8998_v22  ;;  %2458 = vst [vmem:[#allocation2 + $0x191] sm:$0x1] %v2440_v40  ;;  %v2349_v51 = vmax.f32 %v7753_v25, 0.0  ;;  %v2350_v50 = vmax.f32 %v7756_v44, 0.0  ;;  %v2556_v45 = vld [vmem:[#allocation3] sm:$0xff] }
 0x2e5   : > { %2363 = vst [vmem:[#allocation2 + $0x99] sm:$0xff] %v8997_v10  ;;  %2364 = vst [vmem:[#allocation2 + $0xa9] sm:$0xff] %v8996_v12  ;;  %v7846_v30 = vld [vmem:[#allocation2 + $0x1a] sm:$0xff]  ;;  %v2425_v27 = vld [vmem:[#allocation2 + $0x27] sm:$0x1] }
 0x2e6   : > { %2365 = vst [vmem:[#allocation2 + $0xb1] sm:$0xff] %v8995_v4  ;;  %2366 = vst [vmem:[#allocation2 + $0xc1] sm:$0xff] %v8994_v11  ;;  %v2389_v14 = vld [vmem:[#allocation2 + $0x1a] sm:$0x1]  ;;  %5252 = vmatprep.mubr.f32.mxu1 %v7846_v30  ;;  %v2390_v13 = vld [vmem:[#allocation2 + $0x32] sm:$0x1] }
 0x2e7   : > { %2367 = vst [vmem:[#allocation2 + $0xc9] sm:$0xff] %v8993_v15  ;;  %2368 = vst [vmem:[#allocation2 + $0xd9] sm:$0xff] %v8992_v38  ;;  %v2426_v55 = vld [vmem:[#allocation2 + $0x3f] sm:$0x1]  ;;  %v2391_v40 = vld [vmem:[#allocation2 + $0x4a] sm:$0x1] }
 0x2e8   : > { %2369 = vst [vmem:[#allocation2 + $0xe1] sm:$0xff] %v8991_v9  ;;  %2370 = vst [vmem:[#allocation2 + $0xf1] sm:$0xff] %v8990_v58  ;;  %v2427_v60 = vld [vmem:[#allocation2 + $0x57] sm:$0x1]  ;;  %v2557_v44 = vld [vmem:[#allocation3 + $0x8] sm:$0xff] }
 0x2e9   : > { %2371 = vst [vmem:[#allocation2 + $0xf9] sm:$0xff] %v8989_v19  ;;  %2372 = vst [vmem:[#allocation2 + $0x109] sm:$0xff] %v8988_v29  ;;  %v2428_v25 = vld [vmem:[#allocation2 + $0x6f] sm:$0x1]  ;;  %v7882_v38 = vld [vmem:[#allocation2 + $0x38] sm:$0xff] }
 0x2ea   : > { %2373 = vst [vmem:[#allocation2 + $0x111] sm:$0xff] %v8987_v0  ;;  %2374 = vst [vmem:[#allocation2 + $0x121] sm:$0xff] %v8986_v52  ;;  %v2595_v29 = vld [vmem:[#allocation3 + $0x138] sm:$0xff] }
 0x2eb   : > { %2375 = vst [vmem:[#allocation2 + $0x129] sm:$0xff] %v8985_v20  ;;  %2376 = vst [vmem:[#allocation2 + $0x139] sm:$0xff] %v8984_v39  ;;  %v2571_v18 = vld [vmem:[#allocation3 + $0x78] sm:$0xff] }
 0x2ec   : > { %2377 = vst [vmem:[#allocation2 + $0x141] sm:$0xff] %v8983_v49  ;;  %2378 = vst [vmem:[#allocation2 + $0x151] sm:$0xff] %v8982_v26  ;;  %v2558_v26 = vld [vmem:[#allocation3 + $0x10] sm:$0xff]  ;;  %v2559_v49 = vld [vmem:[#allocation3 + $0x18] sm:$0xff] }
 0x2ed   : > { %2379 = vst [vmem:[#allocation2 + $0x159] sm:$0xff] %v2347_v59  ;;  %2380 = vst [vmem:[#allocation2 + $0x169] sm:$0xff] %v2348_v23  ;;  %v2429_v59 = vld [vmem:[#allocation2 + $0x87] sm:$0x1]  ;;  %v2395_v19 = vld [vmem:[#allocation2 + $0xaa] sm:$0x1] }
 0x2ee   : > { %2381 = vst [vmem:[#allocation2 + $0x171] sm:$0xff] %v2349_v51  ;;  %2382 = vst [vmem:[#allocation2 + $0x181] sm:$0xff] %v2350_v50  ;;  %v2430_v50 = vld [vmem:[#allocation2 + $0x9f] sm:$0x1]  ;;  %v7922_v28 = vld [vmem:[#allocation2 + $0xc2] sm:$0xff] }
 0x2ef   : > { %2386 = vst [vmem:[#allocation2 + $0x199] sm:$0xff] %v2348_v23  ;;  %2387 = vst [vmem:[#allocation2 + $0x1a1] sm:$0xff] %v2349_v51  ;;  %v2590_v23 = vld [vmem:[#allocation3 + $0x110] sm:$0xff]  ;;  %v2591_v51 = vld [vmem:[#allocation3 + $0x118] sm:$0xff] }
 0x2f0   : > { %2407 = vst [vmem:[#allocation2 + $0x18] sm:$0x1] %v2389_v14  ;;  %2443 = vst [vmem:[#allocation2 + $0x29] sm:$0x1] %v2425_v27  ;;  %v2392_v14 = vld [vmem:[#allocation2 + $0x62] sm:$0x1]  ;;  %v5832_v20 = vpack.c.bf16 %v2591_v51, %v2590_v23  ;;  %v5784_v23 = vpack.c.bf16 %v2559_v49, %v2558_v26 }
 0x2f1   : > { %2444 = vst [vmem:[#allocation2 + $0x41] sm:$0x1] %v2426_v55  ;;  %2408 = vst [vmem:[#allocation2 + $0x30] sm:$0x1] %v2390_v13  ;;  %v2431_v27 = vld [vmem:[#allocation2 + $0xb7] sm:$0x1]  ;;  %v5781_v55 = vpack.c.bf16 %v2557_v44, %v2556_v45 }
 0x2f2   : > { %2445 = vst [vmem:[#allocation2 + $0x59] sm:$0x1] %v2427_v60  ;;  %2446 = vst [vmem:[#allocation2 + $0x71] sm:$0x1] %v2428_v25  ;;  %v2432_v13 = vld [vmem:[#allocation2 + $0xcf] sm:$0x1] }
 0x2f3   : > { %2409 = vst [vmem:[#allocation2 + $0x48] sm:$0x1] %v2391_v40  ;;  %2447 = vst [vmem:[#allocation2 + $0x89] sm:$0x1] %v2429_v59  ;;  %v2592_v60 = vld [vmem:[#allocation3 + $0x120] sm:$0xff]  ;;  %v2593_v40 = vld [vmem:[#allocation3 + $0x128] sm:$0xff] }
 0x2f4   : > { %2448 = vst [vmem:[#allocation2 + $0xa1] sm:$0x1] %v2430_v50  ;;  %2410 = vst [vmem:[#allocation2 + $0x60] sm:$0x1] %v2392_v14  ;;  %v7855_v59 = vld [vmem:[#allocation2 + $0x32] sm:$0xff]  ;;  %v5836_v0 = vpack.c.bf16 %v2593_v40, %v2592_v60  ;;  %v2562_v26 = vld [vmem:[#allocation3 + $0x30] sm:$0xff] }
 0x2f5   : > { %2449 = vst [vmem:[#allocation2 + $0xb9] sm:$0x1] %v2431_v27  ;;  %2450 = vst [vmem:[#allocation2 + $0xd1] sm:$0x1] %v2432_v13  ;;  %v2393_v50 = vld [vmem:[#allocation2 + $0x7a] sm:$0x1] }
 0x2f6   : > { %v2433_v45 = vld [vmem:[#allocation2 + $0xe7] sm:$0x1]  ;;  %v2560_v44 = vld [vmem:[#allocation3 + $0x20] sm:$0xff]  ;;  %2411 = vst [vmem:[#allocation2 + $0x78] sm:$0x1] %v2393_v50  ;;  %v2561_v51 = vld [vmem:[#allocation3 + $0x28] sm:$0xff] }
 0x2f7   : > { %v7849_v39 = vld [vmem:[#allocation2 + $0x18] sm:$0xff]  ;;  %v7851_v25 = vld [vmem:[#allocation2 + $0x22] sm:$0xff]  ;;  %2451 = vst [vmem:[#allocation2 + $0xe9] sm:$0x1] %v2433_v45  ;;  %v2435_v49 = vld [vmem:[#allocation2 + $0x117] sm:$0x1]  ;;  %v5787_v60 = vpack.c.bf16 %v2561_v51, %v2560_v44 }
 0x2f8   : > { %2814 = vmatmul.mubr.f32.vlgmr.msra.gmra.mrb[128].mxu0 %v7849_v39  ;;  %5253 = vmatmul.mubr.f32.vlgmr.msra.gmra.mrb[160].mxu1 %v7851_v25  ;;  %v2434_v14 = vld [vmem:[#allocation2 + $0xff] sm:$0x1]  ;;  %v2594_v27 = vld [vmem:[#allocation3 + $0x130] sm:$0xff]  ;;  %2453 = vst [vmem:[#allocation2 + $0x119] sm:$0x1] %v2435_v49  ;;  %v7871_v50 = vld [vmem:[#allocation2 + $0x30] sm:$0xff] }
 0x2f9   : > { %2818 = vmatprep.mubr.f32.mxu0 %v7760_v63  ;;  %5255 = vmatprep.mubr.f32.mxu1 %v7855_v59  ;;  %v7860_v13 = vld [vmem:[#allocation2 + $0x20] sm:$0xff]  ;;  %2452 = vst [vmem:[#allocation2 + $0x101] sm:$0x1] %v2434_v14  ;;  %v2563_v40 = vld [vmem:[#allocation3 + $0x38] sm:$0xff]  ;;  %v7873_v14 = vld [vmem:[#allocation2 + $0x52] sm:$0xff]  ;;  %v5840_v9 = vpack.c.bf16 %v2595_v29, %v2594_v27 }
 0x2fa   : > { %5782 = vmatpush1.bf16.msra.mxu1 %v5781_v55  ;;  %5831 = vmatpush3.bf16.msra.mxu0 %v7553_v41  ;;  %v7862_v52 = vld [vmem:[#allocation2 + $0x3a] sm:$0xff]  ;;  %v7867_v55 = vld [vmem:[#allocation2 + $0x4a] sm:$0xff]  ;;  %v2394_v41 = vld [vmem:[#allocation2 + $0x92] sm:$0x1]  ;;  %2413 = vst [vmem:[#allocation2 + $0xa8] sm:$0x1] %v2395_v19  ;;  %v5790_v49 = vpack.c.bf16 %v2563_v40, %v2562_v26 }
 0x2fb   : > { %5783 = vmatprep.subr.bf16.mxu1 %v9054_v16  ;;  %5833 = vmatprep.subr.bf16.mxu0 %v5832_v20  ;;  %2412 = vst [vmem:[#allocation2 + $0x90] sm:$0x1] %v2394_v41  ;;  %v2436_v45 = vld [vmem:[#allocation2 + $0x12f] sm:$0x1]  ;;  %v2437_v58 = vld [vmem:[#allocation2 + $0x147] sm:$0x1] }
 0x2fc   : > { %2819 = vmatmul.mubr.f32.gmra.mrb[130].mxu0 %v7860_v13  ;;  %5256 = vmatmul.mubr.f32.gmra.mrb[162].mxu1 %v7862_v52  ;;  %2454 = vst [vmem:[#allocation2 + $0x131] sm:$0x1] %v2436_v45  ;;  %2455 = vst [vmem:[#allocation2 + $0x149] sm:$0x1] %v2437_v58  ;;  %v2596_v44 = vld [vmem:[#allocation3 + $0x140] sm:$0xff]  ;;  %v2565_v45 = vld [vmem:[#allocation3 + $0x48] sm:$0xff] }
 0x2fd   : > { %2823 = vmatprep.mubr.f32.mxu0 %v7762_v33  ;;  %5258 = vmatprep.mubr.f32.mxu1 %v7867_v55  ;;  %v2564_v51 = vld [vmem:[#allocation3 + $0x40] sm:$0xff]  ;;  %v2438_v41 = vld [vmem:[#allocation2 + $0x15f] sm:$0x1]  ;;  %v2396_v29 = vld [vmem:[#allocation2 + $0xc2] sm:$0x1] }
 0x2fe   : > { %5785 = vmatpush1.bf16.msra.mxu1 %v5784_v23  ;;  %5835 = vmatpush3.bf16.msra.mxu0 %v5832_v20  ;;  %v7878_v23 = vld [vmem:[#allocation2 + $0x62] sm:$0xff]  ;;  %v2597_v20 = vld [vmem:[#allocation3 + $0x148] sm:$0xff]  ;;  %2456 = vst [vmem:[#allocation2 + $0x161] sm:$0x1] %v2438_v41  ;;  %v2439_v27 = vld [vmem:[#allocation2 + $0x177] sm:$0x1] }
 0x2ff   : > { %5786 = vmatprep.subr.bf16.mxu1 %v9054_v16  ;;  %5837 = vmatprep.subr.bf16.mxu0 %v5836_v0  ;;  %v7884_v15 = vld [vmem:[#allocation2 + $0x6a] sm:$0xff]  ;;  %2414 = vst [vmem:[#allocation2 + $0xc0] sm:$0x1] %v2396_v29  ;;  %2457 = vst [vmem:[#allocation2 + $0x179] sm:$0x1] %v2439_v27  ;;  %v5844_v58 = vpack.c.bf16 %v2597_v20, %v2596_v44  ;;  %v2598_v19 = vld [vmem:[#allocation3 + $0x150] sm:$0xff]  ;;  %v5793_v29 = vpack.c.bf16 %v2565_v45, %v2564_v51 }
 0x300   : > { %2824 = vmatmul.mubr.f32.gmra.mrb[132].mxu0 %v7871_v50  ;;  %5259 = vmatmul.mubr.f32.gmra.mrb[164].mxu1 %v7873_v14  ;;  %v7889_v26 = vld [vmem:[#allocation2 + $0x7a] sm:$0xff]  ;;  %v2388_v41 = vld [vmem:[#allocation2 + $0x2] sm:$0x1]  ;;  %v2567_v27 = vld [vmem:[#allocation3 + $0x58] sm:$0xff] }
 0x301   : > { %2828 = vmatprep.mubr.f32.mxu0 %v7764_v36  ;;  %5261 = vmatprep.mubr.f32.mxu1 %v7878_v23  ;;  %v2566_v40 = vld [vmem:[#allocation3 + $0x50] sm:$0xff]  ;;  %2406 = vst [vmem:[#allocation2] sm:$0x1] %v2388_v41  ;;  %v2398_v44 = vld [vmem:[#allocation2 + $0xf2] sm:$0x1]  ;;  %v7893_v11 = vld [vmem:[#allocation2 + $0x48] sm:$0xff] }
 0x302   : > { %5788 = vmatpush1.bf16.msra.mxu1 %v5787_v60  ;;  %5839 = vmatpush3.bf16.msra.mxu0 %v5836_v0  ;;  %v2397_v0 = vld [vmem:[#allocation2 + $0xda] sm:$0x1]  ;;  %v2599_v60 = vld [vmem:[#allocation3 + $0x158] sm:$0xff]  ;;  %v2600_v20 = vld [vmem:[#allocation3 + $0x160] sm:$0xff]  ;;  %2416 = vst [vmem:[#allocation2 + $0xf0] sm:$0x1] %v2398_v44 }
 0x303   : > { %5789 = vmatprep.subr.bf16.mxu1 %v9054_v16  ;;  %5841 = vmatprep.subr.bf16.mxu0 %v5840_v9  ;;  %2415 = vst [vmem:[#allocation2 + $0xd8] sm:$0x1] %v2397_v0  ;;  %v7895_v4 = vld [vmem:[#allocation2 + $0x82] sm:$0xff]  ;;  %v2399_v12 = vld [vmem:[#allocation2 + $0x10a] sm:$0x1]  ;;  %v5848_v10 = vpack.c.bf16 %v2599_v60, %v2598_v19  ;;  %v7900_v51 = vld [vmem:[#allocation2 + $0x92] sm:$0xff]  ;;  %v5796_v0 = vpack.c.bf16 %v2567_v27, %v2566_v40 }
 0x304   : > { %2829 = vmatmul.mubr.f32.gmra.mrb[134].mxu0 %v7882_v38  ;;  %5262 = vmatmul.mubr.f32.gmra.mrb[166].mxu1 %v7884_v15  ;;  %2417 = vst [vmem:[#allocation2 + $0x108] sm:$0x1] %v2399_v12  ;;  %v2401_v45 = vld [vmem:[#allocation2 + $0x13a] sm:$0x1]  ;;  %v2568_v41 = vld [vmem:[#allocation3 + $0x60] sm:$0xff]  ;;  %v2602_v40 = vld [vmem:[#allocation3 + $0x170] sm:$0xff] }
 0x305   : > { %2833 = vmatprep.mubr.f32.mxu0 %v7766_v7  ;;  %5264 = vmatprep.mubr.f32.mxu1 %v7889_v26  ;;  %v2569_v44 = vld [vmem:[#allocation3 + $0x68] sm:$0xff]  ;;  %2419 = vst [vmem:[#allocation2 + $0x138] sm:$0x1] %v2401_v45  ;;  %v7904_v19 = vld [vmem:[#allocation2 + $0x50] sm:$0xff]  ;;  %v2570_v27 = vld [vmem:[#allocation3 + $0x70] sm:$0xff] }
 0x306   : > { %5791 = vmatpush1.bf16.msra.mxu1 %v5790_v49  ;;  %5843 = vmatpush3.bf16.msra.mxu0 %v5840_v9  ;;  %v2400_v9 = vld [vmem:[#allocation2 + $0x122] sm:$0x1]  ;;  %v2601_v49 = vld [vmem:[#allocation3 + $0x168] sm:$0xff]  ;;  %v2402_v22 = vld [vmem:[#allocation2 + $0x152] sm:$0x1] }
 0x307   : > { %5792 = vmatprep.subr.bf16.mxu1 %v9054_v16  ;;  %5845 = vmatprep.subr.bf16.mxu0 %v5844_v58  ;;  %2418 = vst [vmem:[#allocation2 + $0x120] sm:$0x1] %v2400_v9  ;;  %v7906_v60 = vld [vmem:[#allocation2 + $0x9a] sm:$0xff]  ;;  %v5852_v12 = vpack.c.bf16 %v2601_v49, %v2600_v20  ;;  %v7911_v9 = vld [vmem:[#allocation2 + $0xaa] sm:$0xff]  ;;  %2420 = vst [vmem:[#allocation2 + $0x150] sm:$0x1] %v2402_v22 }
 0x308   : > { %2834 = vmatmul.mubr.f32.gmra.mrb[136].mxu0 %v7893_v11  ;;  %5265 = vmatmul.mubr.f32.gmra.mrb[168].mxu1 %v7895_v4  ;;  %v2403_v45 = vld [vmem:[#allocation2 + $0x16a] sm:$0x1]  ;;  %v7915_v20 = vld [vmem:[#allocation2 + $0x60] sm:$0xff]  ;;  %v7917_v49 = vld [vmem:[#allocation2 + $0xb2] sm:$0xff] }
 0x309   : > { %2838 = vmatprep.mubr.f32.mxu0 %v7768_v54  ;;  %5267 = vmatprep.mubr.f32.mxu1 %v7900_v51  ;;  %2421 = vst [vmem:[#allocation2 + $0x168] sm:$0x1] %v2403_v45  ;;  %v7934_v62 = vld [vmem:[#allocation2 + $0xda] sm:$0xff]  ;;  %v7941_v45 = vld [vmem:[#allocation2 + $0xe2] sm:$0xff]  ;;  %v7959_v24 = vld [vmem:[#allocation2 + $0x10a] sm:$0xff] }
 0x30a   : > { %5794 = vmatpush1.bf16.msra.mxu1 %v5793_v29  ;;  %5847 = vmatpush3.bf16.msra.mxu0 %v5844_v58  ;;  %v2603_v29 = vld [vmem:[#allocation3 + $0x178] sm:$0xff]  ;;  %v5799_v58 = vpack.c.bf16 %v2569_v44, %v2568_v41  ;;  %v2572_v41 = vld [vmem:[#allocation3 + $0x80] sm:$0xff]  ;;  %9056 = vst [vmem:[#allocation39_spill] sm:$0xff] %v7934_v62  ;;  %9058 = vst [vmem:[#allocation40_spill] sm:$0xff] %v7941_v45 }
 0x30b   : > { %5795 = vmatprep.subr.bf16.mxu1 %v9054_v16  ;;  %5849 = vmatprep.subr.bf16.mxu0 %v5848_v10  ;;  %v5856_v22 = vpack.c.bf16 %v2603_v29, %v2602_v40  ;;  %v7927_v44 = vld [vmem:[#allocation2 + $0x68] sm:$0xff]  ;;  %v2573_v29 = vld [vmem:[#allocation3 + $0x88] sm:$0xff]  ;;  %9062 = vst [vmem:[#allocation43_spill] sm:$0xff] %v7959_v24 }
 0x30c   : > { %2839 = vmatmul.mubr.f32.gmra.mrb[138].mxu0 %v7904_v19  ;;  %5268 = vmatmul.mubr.f32.gmra.mrb[170].mxu1 %v7906_v60  ;;  %v7929_v40 = vld [vmem:[#allocation2 + $0xca] sm:$0xff] }
 0x30d   : > { %2843 = vmatprep.mubr.f32.mxu0 %v7770_v2  ;;  %5270 = vmatprep.mubr.f32.mxu1 %v7911_v9  ;;  %9055 = vst [vmem:[#allocation38_spill] sm:$0xff] %v7929_v40 }
 0x30e   : > { %5797 = vmatpush1.bf16.msra.mxu1 %v5796_v0  ;;  %5851 = vmatpush3.bf16.msra.mxu0 %v5848_v10  ;;  %v2404_v10 = vld [vmem:[#allocation2 + $0x182] sm:$0x1]  ;;  %v5802_v0 = vpack.c.bf16 %v2571_v18, %v2570_v27  ;;  %v9057_v18 = vmax.f32 %v7690_v43, 0.0  ;;  %v7939_v27 = vld [vmem:[#allocation2 + $0x78] sm:$0xff] }
 0x30f   : > { %5798 = vmatprep.subr.bf16.mxu1 %v9054_v16  ;;  %5853 = vmatprep.subr.bf16.mxu0 %v5852_v12  ;;  %2422 = vst [vmem:[#allocation2 + $0x180] sm:$0x1] %v2404_v10  ;;  %v2575_v10 = vld [vmem:[#allocation3 + $0x98] sm:$0xff]  ;;  %v7947_v43 = vld [vmem:[#allocation2 + $0xf2] sm:$0xff] }
 0x310   : > { %2844 = vmatmul.mubr.f32.gmra.mrb[140].mxu0 %v7915_v20  ;;  %5271 = vmatmul.mubr.f32.gmra.mrb[172].mxu1 %v7917_v49  ;;  %9059 = vst [vmem:[#allocation41_spill] sm:$0xff] %v7947_v43 }
 0x311   : > { %2848 = vmatprep.mubr.f32.mxu0 %v2327_v6  ;;  %5273 = vmatprep.mubr.f32.mxu1 %v7922_v28  ;;  %v2424_v6 = vld [vmem:[#allocation2 + $0xf] sm:$0x1] }
 0x312   : > { %5800 = vmatpush1.bf16.msra.mxu1 %v5799_v58  ;;  %5855 = vmatpush3.bf16.msra.mxu0 %v5852_v12  ;;  %2442 = vst [vmem:[#allocation2 + $0x11] sm:$0x1] %v2424_v6  ;;  %v5805_v12 = vpack.c.bf16 %v2573_v29, %v2572_v41  ;;  %v2574_v58 = vld [vmem:[#allocation3 + $0x90] sm:$0xff]  ;;  %v2576_v41 = vld [vmem:[#allocation3 + $0xa0] sm:$0xff] }
 0x313   : > { %5801 = vmatprep.subr.bf16.mxu1 %v9054_v16  ;;  %5857 = vmatprep.subr.bf16.mxu0 %v5856_v22  ;;  %v7952_v29 = vld [vmem:[#allocation2 + $0x80] sm:$0xff] }
 0x314   : > { %2849 = vmatmul.mubr.f32.gmra.mrb[142].mxu0 %v7927_v44  ;;  %5274 = vmatmul.mubr.f32.gmra.mrb[174].mxu1 %v7929_v40  ;;  %v7954_v6 = vld [vmem:[#allocation2 + $0xfa] sm:$0xff]  ;;  %v9078_v40 = vmax.f32 %v7714_v34, 0.0  ;;  %v2441_v34 = vld [vmem:[#allocation2 + $0x1a7] sm:$0x1] }
 0x315   : > { %2853 = vmatprep.mubr.f32.mxu0 %v9057_v18  ;;  %5276 = vmatprep.mubr.f32.mxu1 %v7934_v62  ;;  %9061 = vst [vmem:[#allocation42_spill] sm:$0xff] %v7954_v6  ;;  %v2577_v18 = vld [vmem:[#allocation3 + $0xa8] sm:$0xff]  ;;  %v3780_v62 = vld [vmem:[#allocation3 + $0x410] sm:$0xff]  ;;  %2459 = vst [vmem:[#allocation2 + $0x1a9] sm:$0x1] %v2441_v34  ;;  %v9082_v34 = vmax.f32 %v7726_v32, 0.0 }
 0x316   : > { %5803 = vmatpush1.bf16.msra.mxu1 %v5802_v0  ;;  %5859 = vmatpush3.bf16.msra.mxu0 %v5856_v22  ;;  %v9060_v0 = vmax.f32 %v7693_v37, 0.0  ;;  %v5808_v22 = vpack.c.bf16 %v2575_v10, %v2574_v58  ;;  %v9063_v37 = vmax.f32 %v7696_v1, 0.0  ;;  %v2578_v58 = vld [vmem:[#allocation3 + $0xb0] sm:$0xff]  ;;  %v7964_v10 = vld [vmem:[#allocation2 + $0x90] sm:$0xff]  ;;  %v9066_v1 = vmax.f32 %v7699_v42, 0.0 }
 0x317   : > { %5804 = vmatprep.subr.bf16.mxu1 %v9054_v16  ;;  %5860 = vmatprep.subr.bf16.mxu0 %v9054_v16  ;;  %v9069_v42 = vmax.f32 %v7702_v17, 0.0  ;;  %v9072_v17 = vmax.f32 %v7705_v35, 0.0  ;;  %v9075_v35 = vmax.f32 %v7708_v57, 0.0  ;;  %v3779_v57 = vld [vmem:[#allocation3 + $0x408] sm:$0xff]  ;;  %v8061_v32 = vld [vmem:[#allocation2 + $0x110] sm:$0xff] }
 0x318   : > { %2854 = vmatmul.mubr.f32.gmra.mrb[144].mxu0 %v7939_v27  ;;  %5277 = vmatmul.mubr.f32.gmra.mrb[176].mxu1 %v7941_v45  ;;  %v3778_v45 = vld [vmem:[#allocation3 + $0x400] sm:$0xff] }
 0x319   : > { %2858 = vmatprep.mubr.f32.mxu0 %v9060_v0  ;;  %5279 = vmatprep.mubr.f32.mxu1 %v7947_v43  ;;  %v7966_v0 = vld [vmem:[#allocation2 + $0x112] sm:$0xff]  ;;  %v2579_v43 = vld [vmem:[#allocation3 + $0xb8] sm:$0xff] }
 0x31a   : > { %5806 = vmatpush1.bf16.msra.mxu1 %v5805_v12  ;;  %v5811_v12 = vpack.c.bf16 %v2577_v18, %v2576_v41  ;;  %9064 = vst [vmem:[#allocation44_spill] sm:$0xff] %v7966_v0  ;;  %v2580_v41 = vld [vmem:[#allocation3 + $0xc0] sm:$0xff]  ;;  %v7976_v18 = vld [vmem:[#allocation2 + $0x98] sm:$0xff] }
 0x31b   : > { %5807 = vmatprep.subr.bf16.mxu1 %v9054_v16 }
 0x31c   : > { %2859 = vmatmul.mubr.f32.gmra.mrb[146].mxu0 %v7952_v29  ;;  %5280 = vmatmul.mubr.f32.gmra.mrb[178].mxu1 %v7954_v6  ;;  %v7971_v6 = vld [vmem:[#allocation2 + $0x122] sm:$0xff] }
 0x31d   : > { %2863 = vmatprep.mubr.f32.mxu0 %v9063_v37  ;;  %5282 = vmatprep.mubr.f32.mxu1 %v7959_v24  ;;  %9065 = vst [vmem:[#allocation45_spill] sm:$0xff] %v7971_v6  ;;  %v7978_v37 = vld [vmem:[#allocation2 + $0x12a] sm:$0xff]  ;;  %v2581_v24 = vld [vmem:[#allocation3 + $0xc8] sm:$0xff] }
 0x31e   : > { %5809 = vmatpush1.bf16.msra.mxu1 %v5808_v22  ;;  %v5814_v22 = vpack.c.bf16 %v2579_v43, %v2578_v58  ;;  %9067 = vst [vmem:[#allocation46_spill] sm:$0xff] %v7978_v37  ;;  %v5817_v43 = vpack.c.bf16 %v2581_v24, %v2580_v41  ;;  %v7988_v58 = vld [vmem:[#allocation2 + $0xa8] sm:$0xff]  ;;  %v8000_v41 = vld [vmem:[#allocation2 + $0xb0] sm:$0xff] }
 0x31f   : > { %5810 = vmatprep.subr.bf16.mxu1 %v9054_v16 }
 0x320   : > { %2864 = vmatmul.mubr.f32.gmra.mrb[148].mxu0 %v7964_v10  ;;  %5283 = vmatmul.mubr.f32.gmra.mrb[180].mxu1 %v7966_v0  ;;  %v7983_v0 = vld [vmem:[#allocation2 + $0x13a] sm:$0xff] }
 0x321   : > { %2868 = vmatprep.mubr.f32.mxu0 %v9066_v1  ;;  %5285 = vmatprep.mubr.f32.mxu1 %v7971_v6  ;;  %9068 = vst [vmem:[#allocation47_spill] sm:$0xff] %v7983_v0  ;;  %v7990_v1 = vld [vmem:[#allocation2 + $0x142] sm:$0xff] }
 0x322   : > { %5812 = vmatpush1.bf16.msra.mxu1 %v5811_v12  ;;  %v2582_v12 = vld [vmem:[#allocation3 + $0xd0] sm:$0xff]  ;;  %9070 = vst [vmem:[#allocation48_spill] sm:$0xff] %v7990_v1  ;;  %v2583_v6 = vld [vmem:[#allocation3 + $0xd8] sm:$0xff] }
 0x323   : > { %5813 = vmatprep.subr.bf16.mxu1 %v9054_v16  ;;  %v5820_v24 = vpack.c.bf16 %v2583_v6, %v2582_v12  ;;  %v8012_v12 = vld [vmem:[#allocation2 + $0xc0] sm:$0xff] }
 0x324   : > { %2869 = vmatmul.mubr.f32.gmra.mrb[150].mxu0 %v7976_v18  ;;  %5286 = vmatmul.mubr.f32.gmra.mrb[182].mxu1 %v7978_v37  ;;  %v7995_v37 = vld [vmem:[#allocation2 + $0x152] sm:$0xff] }
 0x325   : > { %2873 = vmatprep.mubr.f32.mxu0 %v9069_v42  ;;  %5288 = vmatprep.mubr.f32.mxu1 %v7983_v0  ;;  %9071 = vst [vmem:[#allocation49_spill] sm:$0xff] %v7995_v37  ;;  %v8002_v42 = vld [vmem:[#allocation2 + $0x15a] sm:$0xff] }
 0x326   : > { %5815 = vmatpush1.bf16.msra.mxu1 %v5814_v22  ;;  %v2584_v22 = vld [vmem:[#allocation3 + $0xe0] sm:$0xff]  ;;  %9073 = vst [vmem:[#allocation50_spill] sm:$0xff] %v8002_v42  ;;  %v2585_v0 = vld [vmem:[#allocation3 + $0xe8] sm:$0xff] }
 0x327   : > { %5816 = vmatprep.subr.bf16.mxu1 %v9054_v16  ;;  %v5823_v6 = vpack.c.bf16 %v2585_v0, %v2584_v22  ;;  %v2699_v22 = vld [vmem:[#allocation2 + $0x18a] sm:$0xff] }
 0x328   : > { %2874 = vmatmul.mubr.f32.gmra.mrb[152].mxu0 %v7988_v58  ;;  %5289 = vmatmul.mubr.f32.gmra.mrb[184].mxu1 %v7990_v1  ;;  %v8007_v1 = vld [vmem:[#allocation2 + $0x16a] sm:$0xff] }
 0x329   : > { %2878 = vmatprep.mubr.f32.mxu0 %v9072_v17  ;;  %5291 = vmatprep.mubr.f32.mxu1 %v7995_v37  ;;  %9074 = vst [vmem:[#allocation51_spill] sm:$0xff] %v8007_v1  ;;  %v8014_v17 = vld [vmem:[#allocation2 + $0x172] sm:$0xff]  ;;  %v2587_v37 = vld [vmem:[#allocation3 + $0xf8] sm:$0xff] }
 0x32a   : > { %5818 = vmatpush1.bf16.msra.mxu1 %v5817_v43  ;;  %v2586_v43 = vld [vmem:[#allocation3 + $0xf0] sm:$0xff]  ;;  %9076 = vst [vmem:[#allocation52_spill] sm:$0xff] %v8014_v17 }
 0x32b   : > { %5819 = vmatprep.subr.bf16.mxu1 %v9054_v16  ;;  %v5826_v0 = vpack.c.bf16 %v2587_v37, %v2586_v43  ;;  %v9079_v43 = vmax.f32 %v7717_v3, 0.0  ;;  %v8040_v3 = vld [vmem:[#allocation2 + $0xf0] sm:$0xff] }
 0x32c   : > { %2879 = vmatmul.mubr.f32.gmra.mrb[154].mxu0 %v8000_v41  ;;  %5292 = vmatmul.mubr.f32.gmra.mrb[186].mxu1 %v8002_v42  ;;  %v2698_v42 = vld [vmem:[#allocation2 + $0x182] sm:$0xff] }
 0x32d   : > { %2883 = vmatprep.mubr.f32.mxu0 %v9075_v35  ;;  %5294 = vmatprep.mubr.f32.mxu1 %v8007_v1  ;;  %v9077_v35 = vmax.f32 %v7711_v31, 0.0  ;;  %v5908_v1 = vpack.c.bf16 %v3779_v57, %v3778_v45  ;;  %v8028_v31 = vld [vmem:[#allocation2 + $0xd8] sm:$0xff] }
 0x32e   : > { %5821 = vmatpush1.bf16.msra.mxu1 %v5820_v24  ;;  %v8021_v24 = vld [vmem:[#allocation2 + $0xc8] sm:$0xff]  ;;  %v3783_v45 = vld [vmem:[#allocation3 + $0x428] sm:$0xff] }
 0x32f   : > { %5822 = vmatprep.subr.bf16.mxu1 %v9054_v16 }
 0x330   : > { %2884 = vmatmul.mubr.f32.gmra.mrb[156].mxu0 %v8012_v12  ;;  %5295 = vmatmul.mubr.f32.gmra.mrb[188].mxu1 %v8014_v17  ;;  %v3781_v17 = vld [vmem:[#allocation3 + $0x418] sm:$0xff] }
 0x331   : > { %2888 = vmatprep.mubr.f32.mxu0 %v9077_v35  ;;  %5297 = vmatprep.mubr.f32.mxu1 %v2698_v42  ;;  %v5912_v37 = vpack.c.bf16 %v3781_v17, %v3780_v62  ;;  %v2460_v42 = vld [vmem:[#allocation2] sm:$0xff]  ;;  %v2461_v62 = vld [vmem:[#allocation2 + $0x8] sm:$0xff] }
 0x332   : > { %5824 = vmatpush1.bf16.msra.mxu1 %v5823_v6  ;;  %v3782_v6 = vld [vmem:[#allocation3 + $0x420] sm:$0xff]  ;;  %v3784_v17 = vld [vmem:[#allocation3 + $0x430] sm:$0xff]  ;;  %v3785_v35 = vld [vmem:[#allocation3 + $0x438] sm:$0xff] }
 0x333   : > { %5825 = vmatprep.subr.bf16.mxu1 %v9054_v16  ;;  %v5916_v57 = vpack.c.bf16 %v3783_v45, %v3782_v6  ;;  %v2405_v6 = vld [vmem:[#allocation2 + $0x19a] sm:$0x1]  ;;  %v9081_v45 = vmax.f32 %v7723_v61, 0.0  ;;  %v8054_v61 = vld [vmem:[#allocation2 + $0x108] sm:$0xff] }
 0x334   : > { %2889 = vmatmul.mubr.f32.gmra.mrb[158].mxu0 %v8021_v24  ;;  %5298 = vmatmul.mubr.f32.gmra.mrb[190].mxu1 %v2699_v22  ;;  %v3786_v22 = vld [vmem:[#allocation3 + $0x440] sm:$0xff]  ;;  %2423 = vst [vmem:[#allocation2 + $0x198] sm:$0x1] %v2405_v6 }
 0x335   : > { %2893 = vmatprep.mubr.f32.mxu0 %v9078_v40  ;;  %3263 = vmatprep.mubr.f32.mxu1 %v7762_v33  ;;  %v8034_v40 = vld [vmem:[#allocation2 + $0xe0] sm:$0xff]  ;;  %v8134_v6 = vld [vmem:[#allocation2 + $0xa9] sm:$0xff] }
 0x336   : > { %5827 = vmatpush1.bf16.msra.mxu1 %v5826_v0  ;;  %v9080_v0 = vmax.f32 %v7720_v46, 0.0  ;;  %v8047_v46 = vld [vmem:[#allocation2 + $0xf8] sm:$0xff] }
 0x337   : > { %5909 = vmatprep.subr.bf16.mxu1 %v5908_v1 }
 0x338   : > { %2894 = vmatmul.mubr.f32.gmra.mrb[160].mxu0 %v8028_v31 }
 0x339   : > { %3264 = vmatmul.mubr.f32.vlgmr.msra.gmra.mrb[192].mxu1 %v2460_v42  ;;  %2898 = vmatprep.mubr.f32.mxu0 %v9079_v43  ;;  %v3787_v42 = vld [vmem:[#allocation3 + $0x448] sm:$0xff]  ;;  %v3789_v43 = vld [vmem:[#allocation3 + $0x458] sm:$0xff] }
 0x33a   : > { %3268 = vmatprep.mubr.f32.mxu1 %v7764_v36  ;;  %5911 = vmatpush3.bf16.msra.mxu1 %v5908_v1  ;;  %v5920_v1 = vpack.c.bf16 %v3785_v35, %v3784_v17  ;;  %v3793_v17 = vld [vmem:[#allocation3 + $0x478] sm:$0xff]  ;;  %v9084_v35 = vmax.f32 %v7732_v47, 0.0  ;;  %v9086_v47 = vmax.f32 %v7738_v56, 0.0  ;;  %v9088_v56 = vmax.f32 %v7744_v48, 0.0  ;;  %v8110_v48 = vld [vmem:[#allocation2 + $0x158] sm:$0xff] }
 0x33b   : > { %5913 = vmatprep.subr.bf16.mxu1 %v5912_v37 }
 0x33c   : > { %2899 = vmatmul.mubr.f32.gmra.mrb[162].mxu0 %v8034_v40 }
 0x33d   : > { %3269 = vmatmul.mubr.f32.gmra.mrb[194].mxu1 %v2461_v62  ;;  %2903 = vmatprep.mubr.f32.mxu0 %v9080_v0  ;;  %v9083_v62 = vmax.f32 %v7729_v53, 0.0  ;;  %v8068_v53 = vld [vmem:[#allocation2 + $0x120] sm:$0xff]  ;;  %v8117_v0 = vld [vmem:[#allocation2 + $0x91] sm:$0xff] }
 0x33e   : > { %3273 = vmatprep.mubr.f32.mxu1 %v7758_v8  ;;  %5915 = vmatpush3.bf16.msra.mxu1 %v5912_v37  ;;  %v5924_v8 = vpack.c.bf16 %v3787_v42, %v3786_v22  ;;  %v3788_v37 = vld [vmem:[#allocation3 + $0x450] sm:$0xff] }
 0x33f   : > { %5917 = vmatprep.subr.bf16.mxu1 %v5916_v57  ;;  %v8127_v22 = vld [vmem:[#allocation2 + $0x99] sm:$0xff]  ;;  %v2666_v42 = vld [vmem:[#allocation2 + $0x181] sm:$0xff] }
 0x340   : > { %2904 = vmatmul.mubr.f32.gmra.mrb[164].mxu0 %v8040_v3 }
 0x341   : > { %3274 = vmatmul.mubr.f32.gmra.mrb[196].mxu1 %v7849_v39  ;;  %2908 = vmatprep.mubr.f32.mxu0 %v9081_v45  ;;  %v3790_v39 = vld [vmem:[#allocation3 + $0x460] sm:$0xff]  ;;  %v2634_v45 = vld [vmem:[#allocation2 + $0x180] sm:$0xff] }
 0x342   : > { %3278 = vmatprep.mubr.f32.mxu1 %v7760_v63  ;;  %5919 = vmatpush3.bf16.msra.mxu1 %v5916_v57  ;;  %v5928_v63 = vpack.c.bf16 %v3789_v43, %v3788_v37  ;;  %v3791_v57 = vld [vmem:[#allocation3 + $0x468] sm:$0xff]  ;;  %v2635_v37 = vld [vmem:[#allocation2 + $0x188] sm:$0xff]  ;;  %v3746_v43 = vld [vmem:[#allocation3 + $0x300] sm:$0xff] }
 0x343   : > { %5921 = vmatprep.subr.bf16.mxu1 %v5920_v1 }
 0x344   : > { %2909 = vmatmul.mubr.f32.gmra.mrb[166].mxu0 %v8047_v46 }
 0x345   : > { %3279 = vmatmul.mubr.f32.gmra.mrb[198].mxu1 %v7860_v13  ;;  %2913 = vmatprep.mubr.f32.mxu0 %v9082_v34  ;;  %v3792_v13 = vld [vmem:[#allocation3 + $0x470] sm:$0xff]  ;;  %v3747_v34 = vld [vmem:[#allocation3 + $0x308] sm:$0xff] }
 0x346   : > { %3283 = vmatprep.mubr.f32.mxu1 %v7762_v33  ;;  %5923 = vmatpush3.bf16.msra.mxu1 %v5920_v1  ;;  %v5932_v33 = vpack.c.bf16 %v3791_v57, %v3790_v39  ;;  %v8123_v1 = vld [vmem:[#allocation2 + $0x171] sm:$0xff]  ;;  %v5861_v39 = vpack.c.bf16 %v3747_v34, %v3746_v43  ;;  %v9091_v34 = vld [vmem:[#allocation40_spill] sm:$0xff] }
 0x347   : > { %5925 = vmatprep.subr.bf16.mxu1 %v5924_v8  ;;  %v2525_v57 = vld [vmem:[#allocation2 + $0xa] sm:$0xff]  ;;  %v3767_v43 = vld [vmem:[#allocation3 + $0x3a8] sm:$0xff] }
 0x348   : > { %2914 = vmatmul.mubr.f32.gmra.mrb[168].mxu0 %v8054_v61 }
 0x349   : > { %3284 = vmatmul.mubr.f32.gmra.mrb[200].mxu1 %v7871_v50  ;;  %2918 = vmatprep.mubr.f32.mxu0 %v9083_v62  ;;  %v9085_v50 = vmax.f32 %v7735_v5, 0.0  ;;  %v9087_v5 = vmax.f32 %v7741_v21, 0.0  ;;  %v8103_v21 = vld [vmem:[#allocation2 + $0x159] sm:$0xff]  ;;  %v3749_v62 = vld [vmem:[#allocation3 + $0x318] sm:$0xff] }
 0x34a   : > { %3288 = vmatprep.mubr.f32.mxu1 %v7764_v36  ;;  %5927 = vmatpush3.bf16.msra.mxu1 %v5924_v8  ;;  %v5936_v36 = vpack.c.bf16 %v3793_v17, %v3792_v13  ;;  %v8138_v8 = vld [vmem:[#allocation2 + $0xb1] sm:$0xff] }
 0x34b   : > { %5929 = vmatprep.subr.bf16.mxu1 %v5928_v63  ;;  %v3750_v13 = vld [vmem:[#allocation3 + $0x320] sm:$0xff]  ;;  %v3751_v17 = vld [vmem:[#allocation3 + $0x328] sm:$0xff] }
 0x34c   : > { %2919 = vmatmul.mubr.f32.gmra.mrb[170].mxu0 %v8061_v32 }
 0x34d   : > { %3289 = vmatmul.mubr.f32.gmra.mrb[202].mxu1 %v7882_v38  ;;  %2923 = vmatprep.mubr.f32.mxu0 %v9084_v35  ;;  %v8075_v38 = vld [vmem:[#allocation2 + $0x128] sm:$0xff]  ;;  %v8153_v35 = vld [vmem:[#allocation2 + $0xd9] sm:$0xff] }
 0x34e   : > { %3293 = vmatprep.mubr.f32.mxu1 %v7766_v7  ;;  %5931 = vmatpush3.bf16.msra.mxu1 %v5928_v63  ;;  %v8082_v7 = vld [vmem:[#allocation2 + $0x138] sm:$0xff]  ;;  %v8142_v63 = vld [vmem:[#allocation2 + $0xc1] sm:$0xff] }
 0x34f   : > { %5933 = vmatprep.subr.bf16.mxu1 %v5932_v33 }
 0x350   : > { %2924 = vmatmul.mubr.f32.gmra.mrb[172].mxu0 %v8068_v53 }
 0x351   : > { %3294 = vmatmul.mubr.f32.gmra.mrb[204].mxu1 %v7893_v11  ;;  %2928 = vmatprep.mubr.f32.mxu0 %v9085_v50  ;;  %v8091_v11 = vld [vmem:[#allocation2 + $0x140] sm:$0xff] }
 0x352   : > { %3298 = vmatprep.mubr.f32.mxu1 %v7768_v54  ;;  %5935 = vmatpush3.bf16.msra.mxu1 %v5932_v33  ;;  %v8088_v54 = vld [vmem:[#allocation2 + $0x69] sm:$0xff]  ;;  %v8160_v50 = vld [vmem:[#allocation2 + $0xe1] sm:$0xff] }
 0x353   : > { %5937 = vmatprep.subr.bf16.mxu1 %v5936_v36  ;;  %v8146_v33 = vld [vmem:[#allocation2 + $0xc9] sm:$0xff] }
 0x354   : > { %2929 = vmatmul.mubr.f32.gmra.mrb[174].mxu0 %v8075_v38 }
 0x355   : > { %3299 = vmatmul.mubr.f32.gmra.mrb[206].mxu1 %v7904_v19  ;;  %2933 = vmatprep.mubr.f32.mxu0 %v9086_v47  ;;  %v8100_v19 = vld [vmem:[#allocation2 + $0x150] sm:$0xff] }
 0x356   : > { %3303 = vmatprep.mubr.f32.mxu1 %v7770_v2  ;;  %5939 = vmatpush3.bf16.msra.mxu1 %v5936_v36  ;;  %v8097_v2 = vld [vmem:[#allocation2 + $0x79] sm:$0xff]  ;;  %v3753_v36 = vld [vmem:[#allocation3 + $0x338] sm:$0xff]  ;;  %v8167_v47 = vld [vmem:[#allocation2 + $0xf1] sm:$0xff] }
 0x358   : > { %2934 = vmatmul.mubr.f32.gmra.mrb[176].mxu0 %v8082_v7 }
 0x359   : > { %3304 = vmatmul.mubr.f32.gmra.mrb[208].mxu1 %v7915_v20  ;;  %2938 = vmatprep.mubr.f32.mxu0 %v9087_v5  ;;  %v8107_v20 = vld [vmem:[#allocation2 + $0x81] sm:$0xff]  ;;  %v8174_v5 = vld [vmem:[#allocation2 + $0xf9] sm:$0xff] }
 0x35a   : > { %3308 = vmatprep.mubr.f32.mxu1 %v8088_v54 }
 0x35c   : > { %2939 = vmatmul.mubr.f32.gmra.mrb[178].mxu0 %v8091_v11 }
 0x35d   : > { %3309 = vmatmul.mubr.f32.gmra.mrb[210].mxu1 %v7927_v44  ;;  %2943 = vmatprep.mubr.f32.mxu0 %v9088_v56  ;;  %v8113_v44 = vld [vmem:[#allocation2 + $0x169] sm:$0xff] }
 0x35e   : > { %3313 = vmatprep.mubr.f32.mxu1 %v8097_v2  ;;  %v8181_v56 = vld [vmem:[#allocation2 + $0x109] sm:$0xff] }
 0x360   : > { %2944 = vmatmul.mubr.f32.gmra.mrb[180].mxu0 %v8100_v19 }
 0x361   : > { %3314 = vmatmul.mubr.f32.gmra.mrb[212].mxu1 %v7939_v27  ;;  %2948 = vmatprep.mubr.f32.mxu0 %v8103_v21  ;;  %v8120_v27 = vld [vmem:[#allocation2 + $0x168] sm:$0xff] }
 0x362   : > { %3318 = vmatprep.mubr.f32.mxu1 %v8107_v20 }
 0x364   : > { %2949 = vmatmul.mubr.f32.gmra.mrb[182].mxu0 %v8110_v48 }
 0x365   : > { %3319 = vmatmul.mubr.f32.gmra.mrb[214].mxu1 %v7952_v29  ;;  %2953 = vmatprep.mubr.f32.mxu0 %v8113_v44  ;;  %v8130_v29 = vld [vmem:[#allocation2 + $0x170] sm:$0xff] }
 0x366   : > { %3323 = vmatprep.mubr.f32.mxu1 %v8117_v0 }
 0x368   : > { %2954 = vmatmul.mubr.f32.gmra.mrb[184].mxu0 %v8120_v27 }
 0x369   : > { %3324 = vmatmul.mubr.f32.gmra.mrb[216].mxu1 %v7964_v10  ;;  %2958 = vmatprep.mubr.f32.mxu0 %v8123_v1  ;;  %v2667_v10 = vld [vmem:[#allocation2 + $0x189] sm:$0xff] }
 0x36a   : > { %3328 = vmatprep.mubr.f32.mxu1 %v8127_v22 }
 0x36c   : > { %2959 = vmatmul.mubr.f32.gmra.mrb[186].mxu0 %v8130_v29 }
 0x36d   : > { %3329 = vmatmul.mubr.f32.gmra.mrb[218].mxu1 %v7976_v18  ;;  %2963 = vmatprep.mubr.f32.mxu0 %v2666_v42  ;;  %v2524_v18 = vld [vmem:[#allocation2 + $0x2] sm:$0xff]  ;;  %v8188_v42 = vld [vmem:[#allocation2 + $0x111] sm:$0xff] }
 0x36e   : > { %3333 = vmatprep.mubr.f32.mxu1 %v8134_v6 }
 0x370   : > { %2964 = vmatmul.mubr.f32.gmra.mrb[188].mxu0 %v2634_v45  ;;  %v8195_v45 = vld [vmem:[#allocation2 + $0x121] sm:$0xff] }
 0x371   : > { %3334 = vmatmul.mubr.f32.gmra.mrb[220].mxu1 %v7988_v58  ;;  %2968 = vmatprep.mubr.f32.mxu0 %v2667_v10  ;;  %v3748_v58 = vld [vmem:[#allocation3 + $0x310] sm:$0xff]  ;;  %v9089_v10 = vld [vmem:[#allocation38_spill] sm:$0xff] }
 0x372   : > { %3338 = vmatprep.mubr.f32.mxu1 %v8138_v8 }
 0x374   : > { %2969 = vmatmul.mubr.f32.gmra.mrb[190].mxu0 %v2635_v37  ;;  %v8202_v37 = vld [vmem:[#allocation2 + $0x129] sm:$0xff] }
 0x375   : > { %3339 = vmatmul.mubr.f32.gmra.mrb[222].mxu1 %v8000_v41  ;;  %5332 = vmatprep.mubr.f32.mxu0 %v2524_v18  ;;  %v5864_v41 = vpack.c.bf16 %v3749_v62, %v3748_v58  ;;  %v8209_v18 = vld [vmem:[#allocation2 + $0x139] sm:$0xff]  ;;  %v3769_v58 = vld [vmem:[#allocation3 + $0x3b8] sm:$0xff]  ;;  %v9093_v62 = vld [vmem:[#allocation42_spill] sm:$0xff] }
 0x376   : > { %3343 = vmatprep.mubr.f32.mxu1 %v8142_v63 }
 0x378   : > { %5333 = vmatmul.mubr.f32.vlgmr.msra.gmra.mrb[192].mxu0 %v2525_v57  ;;  %v3768_v57 = vld [vmem:[#allocation3 + $0x3b0] sm:$0xff] }
 0x379   : > { %3344 = vmatmul.mubr.f32.gmra.mrb[224].mxu1 %v8012_v12  ;;  %5335 = vmatprep.mubr.f32.mxu0 %v7846_v30  ;;  %v5867_v30 = vpack.c.bf16 %v3751_v17, %v3750_v13  ;;  %v3752_v12 = vld [vmem:[#allocation3 + $0x330] sm:$0xff]  ;;  %v9094_v13 = vld [vmem:[#allocation43_spill] sm:$0xff]  ;;  %v3770_v17 = vld [vmem:[#allocation3 + $0x3c0] sm:$0xff] }
 0x37a   : > { %3348 = vmatprep.mubr.f32.mxu1 %v8146_v33  ;;  %5862 = vmatpush1.bf16.msra.mxu0 %v5861_v39  ;;  %v9092_v39 = vld [vmem:[#allocation41_spill] sm:$0xff] }
 0x37b   : > { %5863 = vmatprep.subr.bf16.mxu0 %v9054_v16 }
 0x37c   : > { %5336 = vmatmul.mubr.f32.gmra.mrb[194].mxu0 %v7851_v25  ;;  %v5870_v25 = vpack.c.bf16 %v3753_v36, %v3752_v12  ;;  %v9095_v12 = vld [vmem:[#allocation44_spill] sm:$0xff]  ;;  %v8223_v36 = vld [vmem:[#allocation2 + $0x151] sm:$0xff] }
 0x37d   : > { %3349 = vmatmul.mubr.f32.gmra.mrb[226].mxu1 %v8021_v24  ;;  %5338 = vmatprep.mubr.f32.mxu0 %v7855_v59  ;;  %v3754_v59 = vld [vmem:[#allocation3 + $0x340] sm:$0xff]  ;;  %v3755_v24 = vld [vmem:[#allocation3 + $0x348] sm:$0xff] }
 0x37e   : > { %3353 = vmatprep.mubr.f32.mxu1 %v8153_v35  ;;  %5865 = vmatpush1.bf16.msra.mxu0 %v5864_v41  ;;  %v8216_v41 = vld [vmem:[#allocation2 + $0x141] sm:$0xff] }
 0x37f   : > { %5866 = vmatprep.subr.bf16.mxu0 %v9054_v16 }
 0x380   : > { %5339 = vmatmul.mubr.f32.gmra.mrb[196].mxu0 %v7862_v52  ;;  %v5873_v52 = vpack.c.bf16 %v3755_v24, %v3754_v59  ;;  %v3772_v59 = vld [vmem:[#allocation3 + $0x3d0] sm:$0xff]  ;;  %v3773_v24 = vld [vmem:[#allocation3 + $0x3d8] sm:$0xff] }
 0x381   : > { %3354 = vmatmul.mubr.f32.gmra.mrb[228].mxu1 %v8028_v31  ;;  %5341 = vmatprep.mubr.f32.mxu0 %v7867_v55  ;;  %v3756_v55 = vld [vmem:[#allocation3 + $0x350] sm:$0xff]  ;;  %v3757_v31 = vld [vmem:[#allocation3 + $0x358] sm:$0xff] }
 0x382   : > { %3358 = vmatprep.mubr.f32.mxu1 %v8160_v50  ;;  %5868 = vmatpush1.bf16.msra.mxu0 %v5867_v30  ;;  %v3771_v30 = vld [vmem:[#allocation3 + $0x3c8] sm:$0xff] }
 0x383   : > { %5869 = vmatprep.subr.bf16.mxu0 %v9054_v16 }
 0x384   : > { %5342 = vmatmul.mubr.f32.gmra.mrb[198].mxu0 %v7873_v14  ;;  %v5876_v14 = vpack.c.bf16 %v3757_v31, %v3756_v55  ;;  %v9098_v55 = vld [vmem:[#allocation47_spill] sm:$0xff]  ;;  %v3774_v31 = vld [vmem:[#allocation3 + $0x3e0] sm:$0xff] }
 0x385   : > { %3359 = vmatmul.mubr.f32.gmra.mrb[230].mxu1 %v8034_v40  ;;  %5344 = vmatprep.mubr.f32.mxu0 %v7878_v23  ;;  %v3758_v23 = vld [vmem:[#allocation3 + $0x360] sm:$0xff]  ;;  %v3759_v40 = vld [vmem:[#allocation3 + $0x368] sm:$0xff] }
 0x386   : > { %3363 = vmatprep.mubr.f32.mxu1 %v8167_v47  ;;  %5871 = vmatpush1.bf16.msra.mxu0 %v5870_v25  ;;  %v9096_v25 = vld [vmem:[#allocation45_spill] sm:$0xff] }
 0x387   : > { %5872 = vmatprep.subr.bf16.mxu0 %v9054_v16 }
 0x388   : > { %5345 = vmatmul.mubr.f32.gmra.mrb[200].mxu0 %v7884_v15  ;;  %v5879_v15 = vpack.c.bf16 %v3759_v40, %v3758_v23  ;;  %v9099_v23 = vld [vmem:[#allocation48_spill] sm:$0xff]  ;;  %v9100_v40 = vld [vmem:[#allocation49_spill] sm:$0xff] }
 0x389   : > { %3364 = vmatmul.mubr.f32.gmra.mrb[232].mxu1 %v8040_v3  ;;  %5347 = vmatprep.mubr.f32.mxu0 %v7889_v26  ;;  %v3760_v26 = vld [vmem:[#allocation3 + $0x370] sm:$0xff]  ;;  %v3761_v3 = vld [vmem:[#allocation3 + $0x378] sm:$0xff] }
 0x38a   : > { %3368 = vmatprep.mubr.f32.mxu1 %v8174_v5  ;;  %5874 = vmatpush1.bf16.msra.mxu0 %v5873_v52  ;;  %v9097_v52 = vld [vmem:[#allocation46_spill] sm:$0xff] }
 0x38b   : > { %5875 = vmatprep.subr.bf16.mxu0 %v9054_v16 }
 0x38c   : > { %5348 = vmatmul.mubr.f32.gmra.mrb[202].mxu0 %v7895_v4  ;;  %v5882_v4 = vpack.c.bf16 %v3761_v3, %v3760_v26  ;;  %v9101_v26 = vld [vmem:[#allocation50_spill] sm:$0xff]  ;;  %v9102_v3 = vld [vmem:[#allocation51_spill] sm:$0xff] }
 0x38d   : > { %3369 = vmatmul.mubr.f32.gmra.mrb[234].mxu1 %v8047_v46  ;;  %5350 = vmatprep.mubr.f32.mxu0 %v7900_v51  ;;  %v3762_v51 = vld [vmem:[#allocation3 + $0x380] sm:$0xff]  ;;  %v3763_v46 = vld [vmem:[#allocation3 + $0x388] sm:$0xff] }
 0x38e   : > { %3373 = vmatprep.mubr.f32.mxu1 %v8181_v56  ;;  %5877 = vmatpush1.bf16.msra.mxu0 %v5876_v14  ;;  %v3775_v14 = vld [vmem:[#allocation3 + $0x3e8] sm:$0xff] }
 0x38f   : > { %5878 = vmatprep.subr.bf16.mxu0 %v9054_v16 }
 0x390   : > { %5351 = vmatmul.mubr.f32.gmra.mrb[204].mxu0 %v7906_v60  ;;  %v5885_v60 = vpack.c.bf16 %v3763_v46, %v3762_v51  ;;  %v3713_v51 = vld [vmem:[#allocation2 + $0x32] sm:$0xff] }
 0x391   : > { %3374 = vmatmul.mubr.f32.gmra.mrb[236].mxu1 %v8054_v61  ;;  %5353 = vmatprep.mubr.f32.mxu0 %v7911_v9  ;;  %v3764_v9 = vld [vmem:[#allocation3 + $0x390] sm:$0xff]  ;;  %v3765_v61 = vld [vmem:[#allocation3 + $0x398] sm:$0xff]  ;;  %v3649_v46 = vld [vmem:[#allocation2 + $0x30] sm:$0xff] }
 0x392   : > { %3378 = vmatprep.mubr.f32.mxu1 %v8188_v42  ;;  %5880 = vmatpush1.bf16.msra.mxu0 %v5879_v15  ;;  %v3776_v15 = vld [vmem:[#allocation3 + $0x3f0] sm:$0xff] }
 0x393   : > { %5881 = vmatprep.subr.bf16.mxu0 %v9054_v16 }
 0x394   : > { %5354 = vmatmul.mubr.f32.gmra.mrb[206].mxu0 %v7917_v49  ;;  %v9090_v49 = vld [vmem:[#allocation39_spill] sm:$0xff] }
 0x395   : > { %3379 = vmatmul.mubr.f32.gmra.mrb[238].mxu1 %v8061_v32  ;;  %5356 = vmatprep.mubr.f32.mxu0 %v7922_v28  ;;  %v5888_v28 = vpack.c.bf16 %v3765_v61, %v3764_v9  ;;  %v3766_v32 = vld [vmem:[#allocation3 + $0x3a0] sm:$0xff] }
 0x396   : > { %3383 = vmatprep.mubr.f32.mxu1 %v8195_v45  ;;  %5883 = vmatpush1.bf16.msra.mxu0 %v5882_v4  ;;  %v9103_v4 = vld [vmem:[#allocation52_spill] sm:$0xff]  ;;  %v3715_v9 = vld [vmem:[#allocation2 + $0x4a] sm:$0xff]  ;;  %v3716_v61 = vld [vmem:[#allocation2 + $0x52] sm:$0xff] }
 0x397   : > { %5884 = vmatprep.subr.bf16.mxu0 %v9054_v16 }
 0x398   : > { %5357 = vmatmul.mubr.f32.gmra.mrb[208].mxu0 %v9089_v10  ;;  %v3717_v10 = vld [vmem:[#allocation2 + $0x62] sm:$0xff] }
 0x399   : > { %3384 = vmatmul.mubr.f32.gmra.mrb[240].mxu1 %v8068_v53  ;;  %5359 = vmatprep.mubr.f32.mxu0 %v9090_v49  ;;  %v5891_v53 = vpack.c.bf16 %v3767_v43, %v3766_v32  ;;  %v3718_v49 = vld [vmem:[#allocation2 + $0x6a] sm:$0xff]  ;;  %v3719_v32 = vld [vmem:[#allocation2 + $0x7a] sm:$0xff] }
 0x39a   : > { %3388 = vmatprep.mubr.f32.mxu1 %v8202_v37  ;;  %5886 = vmatpush1.bf16.msra.mxu0 %v5885_v60  ;;  %v3714_v60 = vld [vmem:[#allocation2 + $0x3a] sm:$0xff]  ;;  %v3652_v43 = vld [vmem:[#allocation2 + $0x50] sm:$0xff] }
 0x39b   : > { %5887 = vmatprep.subr.bf16.mxu0 %v9054_v16 }
 0x39c   : > { %5360 = vmatmul.mubr.f32.gmra.mrb[210].mxu0 %v9091_v34  ;;  %v3720_v34 = vld [vmem:[#allocation2 + $0x82] sm:$0xff] }
 0x39d   : > { %3389 = vmatmul.mubr.f32.gmra.mrb[242].mxu1 %v8075_v38  ;;  %5362 = vmatprep.mubr.f32.mxu0 %v9092_v39  ;;  %v5894_v38 = vpack.c.bf16 %v3769_v58, %v3768_v57  ;;  %v3685_v39 = vld [vmem:[#allocation2 + $0x61] sm:$0xff] }
 0x39e   : > { %3393 = vmatprep.mubr.f32.mxu1 %v8209_v18  ;;  %5889 = vmatpush1.bf16.msra.mxu0 %v5888_v28  ;;  %v3684_v28 = vld [vmem:[#allocation2 + $0x51] sm:$0xff]  ;;  %v3653_v57 = vld [vmem:[#allocation2 + $0x60] sm:$0xff] }
 0x39f   : > { %5890 = vmatprep.subr.bf16.mxu0 %v9054_v16  ;;  %v3722_v58 = vld [vmem:[#allocation2 + $0x9a] sm:$0xff] }
 0x3a0   : > { %5363 = vmatmul.mubr.f32.gmra.mrb[212].mxu0 %v9093_v62  ;;  %v3723_v62 = vld [vmem:[#allocation2 + $0xaa] sm:$0xff] }
 0x3a1   : > { %3394 = vmatmul.mubr.f32.gmra.mrb[244].mxu1 %v8082_v7  ;;  %5365 = vmatprep.mubr.f32.mxu0 %v9094_v13  ;;  %v5897_v7 = vpack.c.bf16 %v3771_v30, %v3770_v17 }
 0x3a2   : > { %3398 = vmatprep.mubr.f32.mxu1 %v8216_v41  ;;  %5892 = vmatpush1.bf16.msra.mxu0 %v5891_v53  ;;  %v3721_v53 = vld [vmem:[#allocation2 + $0x92] sm:$0xff] }
 0x3a3   : > { %5893 = vmatprep.subr.bf16.mxu0 %v9054_v16 }
 0x3a4   : > { %5366 = vmatmul.mubr.f32.gmra.mrb[214].mxu0 %v9095_v12  ;;  %v3654_v12 = vld [vmem:[#allocation2 + $0x68] sm:$0xff] }
 0x3a5   : > { %3399 = vmatmul.mubr.f32.gmra.mrb[246].mxu1 %v8091_v11  ;;  %5368 = vmatprep.mubr.f32.mxu0 %v9096_v25  ;;  %v5900_v11 = vpack.c.bf16 %v3773_v24, %v3772_v59  ;;  %v3724_v25 = vld [vmem:[#allocation2 + $0xb2] sm:$0xff]  ;;  %v3725_v59 = vld [vmem:[#allocation2 + $0xc2] sm:$0xff] }
 0x3a6   : > { %3403 = vmatprep.mubr.f32.mxu1 %v8223_v36  ;;  %5895 = vmatpush1.bf16.msra.mxu0 %v5894_v38 }
 0x3a7   : > { %5896 = vmatprep.subr.bf16.mxu0 %v9054_v16 }
 0x3a8   : > { %5369 = vmatmul.mubr.f32.gmra.mrb[216].mxu0 %v9097_v52 }
 0x3a9   : > { %3404 = vmatmul.mubr.f32.gmra.mrb[248].mxu1 %v8100_v19  ;;  %5371 = vmatprep.mubr.f32.mxu0 %v9098_v55  ;;  %v5903_v19 = vpack.c.bf16 %v3775_v14, %v3774_v31  ;;  %v3655_v31 = vld [vmem:[#allocation2 + $0x78] sm:$0xff]  ;;  %v3726_v14 = vld [vmem:[#allocation2 + $0xca] sm:$0xff] }
 0x3aa   : > { %3408 = vmatprep.mubr.f32.mxu1 %v8103_v21  ;;  %5898 = vmatpush1.bf16.msra.mxu0 %v5897_v7  ;;  %v3777_v21 = vld [vmem:[#allocation3 + $0x3f8] sm:$0xff] }
 0x3ab   : > { %5899 = vmatprep.subr.bf16.mxu0 %v9054_v16 }
 0x3ac   : > { %5372 = vmatmul.mubr.f32.gmra.mrb[218].mxu0 %v9099_v23  ;;  %v3727_v23 = vld [vmem:[#allocation2 + $0xda] sm:$0xff] }
 0x3ad   : > { %3409 = vmatmul.mubr.f32.gmra.mrb[250].mxu1 %v8110_v48  ;;  %5374 = vmatprep.mubr.f32.mxu0 %v9100_v40  ;;  %v5906_v48 = vpack.c.bf16 %v3777_v21, %v3776_v15 }
 0x3ae   : > { %3413 = vmatprep.mubr.f32.mxu1 %v8113_v44  ;;  %5901 = vmatpush1.bf16.msra.mxu0 %v5900_v11  ;;  %v3681_v44 = vld [vmem:[#allocation2 + $0x31] sm:$0xff] }
 0x3af   : > { %5902 = vmatprep.subr.bf16.mxu0 %v9054_v16 }
 0x3b0   : > { %5375 = vmatmul.mubr.f32.gmra.mrb[220].mxu0 %v9101_v26  ;;  %v3656_v26 = vld [vmem:[#allocation2 + $0x80] sm:$0xff] }
 0x3b1   : > { %3414 = vmatmul.mubr.f32.gmra.mrb[252].mxu1 %v8120_v27  ;;  %5377 = vmatprep.mubr.f32.mxu0 %v9102_v3  ;;  %v3682_v27 = vld [vmem:[#allocation2 + $0x39] sm:$0xff]  ;;  %v3728_v3 = vld [vmem:[#allocation2 + $0xe2] sm:$0xff] }
 0x3b2   : > { %3418 = vmatprep.mubr.f32.mxu1 %v8123_v1  ;;  %5904 = vmatpush1.bf16.msra.mxu0 %v5903_v19  ;;  %v3650_v1 = vld [vmem:[#allocation2 + $0x38] sm:$0xff] }
 0x3b3   : > { %5905 = vmatprep.subr.bf16.mxu0 %v9054_v16  ;;  %v3683_v16 = vld [vmem:[#allocation2 + $0x49] sm:$0xff] }
 0x3b4   : > { %5378 = vmatmul.mubr.f32.gmra.mrb[222].mxu0 %v9103_v4 }
 0x3b5   : > { %3419 = vmatmul.mubr.f32.gmra.mrb[254].mxu1 %v8130_v29  ;;  %3858 = vmatprep.mubr.f32.mxu0 %v3681_v44  ;;  %v3651_v29 = vld [vmem:[#allocation2 + $0x48] sm:$0xff] }
 0x3b6   : > { %5907 = vmatpush1.bf16.msra.mxu0 %v5906_v48  ;;  %5412 = vmatprep.mubr.f32.mxu1 %v3713_v51  ;;  %v3729_v48 = vld [vmem:[#allocation2 + $0xf2] sm:$0xff] }
 0x3b9   : > { %3859 = vmatmul.mubr.f32.vlgmr.msra.gmra.mrb[224].mxu0 %v3649_v46  ;;  %5413 = vmatmul.mubr.f32.vlgmr.msra.gmra.mrb[0].mxu1 %v3714_v60  ;;  %v3657_v60 = vld [vmem:[#allocation2 + $0x90] sm:$0xff] }
 0x3ba   : > { %3863 = vmatprep.mubr.f32.mxu0 %v3682_v27  ;;  %5415 = vmatprep.mubr.f32.mxu1 %v3715_v9  ;;  %v3730_v27 = vld [vmem:[#allocation2 + $0xfa] sm:$0xff]  ;;  %v3731_v9 = vld [vmem:[#allocation2 + $0x10a] sm:$0xff] }
 0x3bd   : > { %3864 = vmatmul.mubr.f32.gmra.mrb[226].mxu0 %v3650_v1  ;;  %5416 = vmatmul.mubr.f32.gmra.mrb[2].mxu1 %v3716_v61 }
 0x3be   : > { %3868 = vmatprep.mubr.f32.mxu0 %v3683_v16  ;;  %5418 = vmatprep.mubr.f32.mxu1 %v3717_v10 }
 0x3c1   : > { %3869 = vmatmul.mubr.f32.gmra.mrb[228].mxu0 %v3651_v29  ;;  %5419 = vmatmul.mubr.f32.gmra.mrb[4].mxu1 %v3718_v49  ;;  %v3658_v29 = vld [vmem:[#allocation2 + $0x98] sm:$0xff] }
 0x3c2   : > { %3873 = vmatprep.mubr.f32.mxu0 %v3684_v28  ;;  %5421 = vmatprep.mubr.f32.mxu1 %v3719_v32  ;;  %v3732_v49 = vld [vmem:[#allocation2 + $0x112] sm:$0xff]  ;;  %v3733_v28 = vld [vmem:[#allocation2 + $0x122] sm:$0xff] }
 0x3c5   : > { %3874 = vmatmul.mubr.f32.gmra.mrb[230].mxu0 %v3652_v43  ;;  %5422 = vmatmul.mubr.f32.gmra.mrb[6].mxu1 %v3720_v34 }
 0x3c6   : > { %3878 = vmatprep.mubr.f32.mxu0 %v3685_v39  ;;  %5424 = vmatprep.mubr.f32.mxu1 %v3721_v53  ;;  %v3659_v53 = vld [vmem:[#allocation2 + $0xa8] sm:$0xff] }
 0x3c9   : > { %3879 = vmatmul.mubr.f32.gmra.mrb[232].mxu0 %v3653_v57  ;;  %5425 = vmatmul.mubr.f32.gmra.mrb[8].mxu1 %v3722_v58  ;;  %v3734_v57 = vld [vmem:[#allocation2 + $0x12a] sm:$0xff]  ;;  %v3735_v58 = vld [vmem:[#allocation2 + $0x13a] sm:$0xff] }
 0x3ca   : > { %3883 = vmatprep.mubr.f32.mxu0 %v8088_v54  ;;  %5427 = vmatprep.mubr.f32.mxu1 %v3723_v62 }
 0x3cb   : > { %v2815_v13 = vpop.f32.mrb[128].mxu0  ;;  %v5254_v38 = vpop.f32.mrb[160].mxu1 }
 0x3cc   : > { %v2817_v17 = vpop.f32.mrb[129].mxu0  ;;  %v3040_v30 = vpop.f32.mrb[161].mxu1 }
 0x3cd   : > { %v8246_v7 = vadd.f32 %v3040_v30, %v2815_v13  ;;  %3884 = vmatmul.mubr.f32.gmra.mrb[234].mxu0 %v3654_v12  ;;  %5428 = vmatmul.mubr.f32.gmra.mrb[10].mxu1 %v3724_v25  ;;  %v3660_v30 = vld [vmem:[#allocation2 + $0xb0] sm:$0xff]  ;;  %v3736_v12 = vld [vmem:[#allocation2 + $0x142] sm:$0xff] }
 0x3ce   : > { %3888 = vmatprep.mubr.f32.mxu0 %v8097_v2  ;;  %5430 = vmatprep.mubr.f32.mxu1 %v3725_v59  ;;  %v3737_v25 = vld [vmem:[#allocation2 + $0x152] sm:$0xff] }
 0x3cf   : > { %v2820_v24 = vpop.f32.mrb[130].mxu0  ;;  %v5257_v52 = vpop.f32.mrb[162].mxu1 }
 0x3d0   : > { %v8249_v55 = vadd.f32 %v5254_v38, %v2820_v24  ;;  %v2822_v54 = vpop.f32.mrb[131].mxu0  ;;  %v3050_v11 = vpop.f32.mrb[163].mxu1 }
 0x3d1   : > { %3889 = vmatmul.mubr.f32.gmra.mrb[236].mxu0 %v3655_v31  ;;  %5431 = vmatmul.mubr.f32.gmra.mrb[12].mxu1 %v3726_v14  ;;  %v3738_v31 = vld [vmem:[#allocation2 + $0x15a] sm:$0xff]  ;;  %v3739_v14 = vld [vmem:[#allocation2 + $0x16a] sm:$0xff] }
 0x3d2   : > { %3893 = vmatprep.mubr.f32.mxu0 %v8107_v20  ;;  %5433 = vmatprep.mubr.f32.mxu1 %v3727_v23 }
 0x3d3   : > { %v2825_v40 = vpop.f32.mrb[132].mxu0  ;;  %v5260_v19 = vpop.f32.mrb[164].mxu1 }
 0x3d4   : > { %v8252_v15 = vadd.f32 %v3050_v11, %v2825_v40  ;;  %v2827_v2 = vpop.f32.mrb[133].mxu0  ;;  %v3060_v21 = vpop.f32.mrb[165].mxu1  ;;  %v3661_v11 = vld [vmem:[#allocation2 + $0xc0] sm:$0xff] }
 0x3d5   : > { %3894 = vmatmul.mubr.f32.gmra.mrb[238].mxu0 %v3656_v26  ;;  %5434 = vmatmul.mubr.f32.gmra.mrb[14].mxu1 %v3728_v3  ;;  %v3740_v26 = vld [vmem:[#allocation2 + $0x172] sm:$0xff]  ;;  %v3741_v3 = vld [vmem:[#allocation2 + $0x182] sm:$0xff] }
 0x3d6   : > { %3898 = vmatprep.mubr.f32.mxu0 %v8117_v0  ;;  %5436 = vmatprep.mubr.f32.mxu1 %v3729_v48 }
 0x3d7   : > { %v2830_v4 = vpop.f32.mrb[134].mxu0  ;;  %v5263_v44 = vpop.f32.mrb[166].mxu1 }
 0x3d8   : > { %v8255_v51 = vadd.f32 %v5257_v52, %v2830_v4  ;;  %v2832_v20 = vpop.f32.mrb[135].mxu0  ;;  %v3070_v46 = vpop.f32.mrb[167].mxu1 }
 0x3d9   : > { %3899 = vmatmul.mubr.f32.gmra.mrb[240].mxu0 %v3657_v60  ;;  %5437 = vmatmul.mubr.f32.gmra.mrb[16].mxu1 %v3730_v27  ;;  %v3742_v60 = vld [vmem:[#allocation2 + $0x18a] sm:$0xff]  ;;  %v3743_v27 = vld [vmem:[#allocation2 + $0x19a] sm:$0xff] }
 0x3da   : > { %3903 = vmatprep.mubr.f32.mxu0 %v8127_v22  ;;  %5439 = vmatprep.mubr.f32.mxu1 %v3731_v9 }
 0x3db   : > { %v2835_v1 = vpop.f32.mrb[136].mxu0  ;;  %v5266_v61 = vpop.f32.mrb[168].mxu1 }
 0x3dc   : > { %v8258_v16 = vadd.f32 %v3060_v21, %v2835_v1  ;;  %v2837_v0 = vpop.f32.mrb[137].mxu0  ;;  %v3080_v10 = vpop.f32.mrb[169].mxu1  ;;  %v3662_v21 = vld [vmem:[#allocation2 + $0xc8] sm:$0xff] }
 0x3dd   : > { %3904 = vmatmul.mubr.f32.gmra.mrb[242].mxu0 %v3658_v29  ;;  %5440 = vmatmul.mubr.f32.gmra.mrb[18].mxu1 %v3732_v49  ;;  %v3744_v29 = vld [vmem:[#allocation2 + $0x1a2] sm:$0xff] }
 0x3de   : > { %3908 = vmatprep.mubr.f32.mxu0 %v8134_v6  ;;  %5442 = vmatprep.mubr.f32.mxu1 %v3733_v28 }
 0x3df   : > { %v2840_v32 = vpop.f32.mrb[138].mxu0  ;;  %v8261_v43 = vpop.f32.mrb[170].mxu1 }
 0x3e0   : > { %v8263_v34 = vadd.f32 %v5260_v19, %v2840_v32  ;;  %v2842_v22 = vpop.f32.mrb[139].mxu0  ;;  %v3090_v39 = vpop.f32.mrb[171].mxu1 }
 0x3e1   : > { %3909 = vmatmul.mubr.f32.gmra.mrb[244].mxu0 %v3659_v53  ;;  %5443 = vmatmul.mubr.f32.gmra.mrb[20].mxu1 %v3734_v57 }
 0x3e2   : > { %3913 = vmatprep.mubr.f32.mxu0 %v8138_v8  ;;  %5445 = vmatprep.mubr.f32.mxu1 %v3735_v58 }
 0x3e3   : > { %v2845_v62 = vpop.f32.mrb[140].mxu0  ;;  %v8266_v13 = vpop.f32.mrb[172].mxu1 }
 0x3e4   : > { %v8268_v6 = vadd.f32 %v3070_v46, %v2845_v62  ;;  %v2847_v38 = vpop.f32.mrb[141].mxu0  ;;  %v8270_v17 = vpop.f32.mrb[173].mxu1  ;;  %v3663_v46 = vld [vmem:[#allocation2 + $0xd8] sm:$0xff] }
 0x3e5   : > { %3914 = vmatmul.mubr.f32.gmra.mrb[246].mxu0 %v3660_v30  ;;  %5446 = vmatmul.mubr.f32.gmra.mrb[22].mxu1 %v3736_v12  ;;  %v3666_v38 = vld [vmem:[#allocation2 + $0xf8] sm:$0xff] }
 0x3e6   : > { %3918 = vmatprep.mubr.f32.mxu0 %v8142_v63  ;;  %5448 = vmatprep.mubr.f32.mxu1 %v3737_v25 }
 0x3e7   : > { %v2850_v59 = vpop.f32.mrb[142].mxu0  ;;  %v8273_v24 = vpop.f32.mrb[174].mxu1 }
 0x3e8   : > { %v8275_v8 = vadd.f32 %v5263_v44, %v2850_v59  ;;  %v2852_v52 = vpop.f32.mrb[143].mxu0  ;;  %v8277_v54 = vpop.f32.mrb[175].mxu1  ;;  %v3667_v59 = vld [vmem:[#allocation2 + $0x108] sm:$0xff] }
 0x3e9   : > { %3919 = vmatmul.mubr.f32.gmra.mrb[248].mxu0 %v3661_v11  ;;  %5449 = vmatmul.mubr.f32.gmra.mrb[24].mxu1 %v3738_v31 }
 0x3ea   : > { %3923 = vmatprep.mubr.f32.mxu0 %v8146_v33  ;;  %5451 = vmatprep.mubr.f32.mxu1 %v3739_v14  ;;  %v3668_v14 = vld [vmem:[#allocation2 + $0x110] sm:$0xff] }
 0x3eb   : > { %v2855_v23 = vpop.f32.mrb[144].mxu0  ;;  %v8280_v40 = vpop.f32.mrb[176].mxu1 }
 0x3ec   : > { %v8282_v63 = vadd.f32 %v3080_v10, %v2855_v23  ;;  %v2857_v19 = vpop.f32.mrb[145].mxu0  ;;  %v8284_v2 = vpop.f32.mrb[177].mxu1 }
 0x3ed   : > { %3924 = vmatmul.mubr.f32.gmra.mrb[250].mxu0 %v3662_v21  ;;  %5452 = vmatmul.mubr.f32.gmra.mrb[26].mxu1 %v3740_v26  ;;  %v3669_v26 = vld [vmem:[#allocation2 + $0x120] sm:$0xff] }
 0x3ee   : > { %3928 = vmatprep.mubr.f32.mxu0 %v8153_v35  ;;  %5454 = vmatprep.mubr.f32.mxu1 %v3741_v3 }
 0x3ef   : > { %v2860_v48 = vpop.f32.mrb[146].mxu0  ;;  %v8287_v4 = vpop.f32.mrb[178].mxu1 }
 0x3f0   : > { %v8289_v33 = vadd.f32 %v5266_v61, %v2860_v48  ;;  %v2862_v44 = vpop.f32.mrb[147].mxu0  ;;  %v8291_v20 = vpop.f32.mrb[179].mxu1  ;;  %v3664_v61 = vld [vmem:[#allocation2 + $0xe0] sm:$0xff] }
 0x3f1   : > { %3929 = vmatmul.mubr.f32.gmra.mrb[252].mxu0 %v3663_v46  ;;  %5455 = vmatmul.mubr.f32.gmra.mrb[28].mxu1 %v3742_v60 }
 0x3f2   : > { %3933 = vmatprep.mubr.f32.mxu0 %v8160_v50  ;;  %5457 = vmatprep.mubr.f32.mxu1 %v3743_v27 }
 0x3f3   : > { %v2865_v9 = vpop.f32.mrb[148].mxu0  ;;  %v8294_v1 = vpop.f32.mrb[180].mxu1 }
 0x3f4   : > { %v8296_v35 = vadd.f32 %v3090_v39, %v2865_v9  ;;  %v2867_v0 = vpop.f32.mrb[149].mxu0  ;;  %v8298_v10 = vpop.f32.mrb[181].mxu1  ;;  %v3665_v39 = vld [vmem:[#allocation2 + $0xf0] sm:$0xff] }
 0x3f5   : > { %3934 = vmatmul.mubr.f32.gmra.mrb[254].mxu0 %v3664_v61  ;;  %5458 = vmatmul.mubr.f32.gmra.mrb[30].mxu1 %v3744_v29  ;;  %v3671_v0 = vld [vmem:[#allocation2 + $0x138] sm:$0xff] }
 0x3f6   : > { %3938 = vmatprep.mubr.f32.mxu0 %v8167_v47 }
 0x3f7   : > { %v2870_v49 = vpop.f32.mrb[150].mxu0  ;;  %v8301_v28 = vpop.f32.mrb[182].mxu1 }
 0x3f8   : > { %v8304_v50 = vadd.f32 %v8261_v43, %v2870_v49  ;;  %v2872_v32 = vpop.f32.mrb[151].mxu0  ;;  %v8306_v22 = vpop.f32.mrb[183].mxu1 }
 0x3f9   : > { %3939 = vmatmul.mubr.f32.gmra.mrb[0].mxu0 %v3665_v39  ;;  %v3672_v32 = vld [vmem:[#allocation2 + $0x140] sm:$0xff] }
 0x3fa   : > { %3943 = vmatprep.mubr.f32.mxu0 %v8174_v5 }
 0x3fb   : > { %v2875_v53 = vpop.f32.mrb[152].mxu0  ;;  %v8309_v57 = vpop.f32.mrb[184].mxu1 }
 0x3fc   : > { %v8312_v58 = vadd.f32 %v8270_v17, %v2875_v53  ;;  %v2877_v47 = vpop.f32.mrb[153].mxu0  ;;  %v8314_v62 = vpop.f32.mrb[185].mxu1 }
 0x3fd   : > { %3944 = vmatmul.mubr.f32.gmra.mrb[2].mxu0 %v3666_v38  ;;  %v3673_v38 = vld [vmem:[#allocation2 + $0x150] sm:$0xff] }
 0x3fe   : > { %3948 = vmatprep.mubr.f32.mxu0 %v8181_v56 }
 0x3ff   : > { %v2880_v43 = vpop.f32.mrb[154].mxu0  ;;  %v8317_v30 = vpop.f32.mrb[186].mxu1 }
 0x400   : > { %v8320_v12 = vadd.f32 %v8266_v13, %v2880_v43  ;;  %v2882_v5 = vpop.f32.mrb[155].mxu0  ;;  %v8322_v25 = vpop.f32.mrb[187].mxu1 }
 0x401   : > { %3949 = vmatmul.mubr.f32.gmra.mrb[4].mxu0 %v3667_v59  ;;  %v3706_v5 = vld [vmem:[#allocation2 + $0x159] sm:$0xff] }
 0x402   : > { %3953 = vmatprep.mubr.f32.mxu0 %v8188_v42 }
 0x403   : > { %v2885_v17 = vpop.f32.mrb[156].mxu0  ;;  %v8325_v52 = vpop.f32.mrb[188].mxu1 }
 0x404   : > { %v8328_v11 = vadd.f32 %v8277_v54, %v2885_v17  ;;  %v2887_v56 = vpop.f32.mrb[157].mxu0  ;;  %v8330_v31 = vpop.f32.mrb[189].mxu1 }
 0x405   : > { %3954 = vmatmul.mubr.f32.gmra.mrb[6].mxu0 %v3668_v14  ;;  %v3674_v56 = vld [vmem:[#allocation2 + $0x158] sm:$0xff] }
 0x406   : > { %3958 = vmatprep.mubr.f32.mxu0 %v8195_v45  ;;  %v3670_v45 = vld [vmem:[#allocation2 + $0x128] sm:$0xff] }
 0x407   : > { %v2890_v13 = vpop.f32.mrb[158].mxu0  ;;  %v8333_v23 = vpop.f32.mrb[190].mxu1 }
 0x408   : > { %v8336_v19 = vadd.f32 %v8273_v24, %v2890_v13  ;;  %v2892_v42 = vpop.f32.mrb[159].mxu0  ;;  %v8338_v21 = vpop.f32.mrb[191].mxu1  ;;  %v3707_v13 = vld [vmem:[#allocation2 + $0x169] sm:$0xff] }
 0x409   : > { %3959 = vmatmul.mubr.f32.gmra.mrb[8].mxu0 %v3669_v26 }
 0x40a   : > { %3963 = vmatprep.mubr.f32.mxu0 %v8202_v37 }
 0x40b   : > { %v2895_v54 = vpop.f32.mrb[160].mxu0 }
 0x40c   : > { %v8342_v3 = vadd.f32 %v8284_v2, %v2895_v54  ;;  %v3265_v48 = vpop.f32.mrb[192].mxu1  ;;  %v2897_v44 = vpop.f32.mrb[161].mxu0 }
 0x40d   : > { %v8345_v46 = vadd.f32 %v3265_v48, %v8246_v7  ;;  %v3267_v60 = vpop.f32.mrb[193].mxu1  ;;  %3964 = vmatmul.mubr.f32.gmra.mrb[10].mxu0 %v3670_v45  ;;  %v3675_v48 = vld [vmem:[#allocation2 + $0x168] sm:$0xff]  ;;  %v3708_v45 = vld [vmem:[#allocation2 + $0x171] sm:$0xff] }
 0x40e   : > { %3968 = vmatprep.mubr.f32.mxu0 %v8209_v18 }
 0x40f   : > { %v2900_v24 = vpop.f32.mrb[162].mxu0 }
 0x410   : > { %v8349_v27 = vadd.f32 %v8280_v40, %v2900_v24  ;;  %v3270_v9 = vpop.f32.mrb[194].mxu1  ;;  %v2902_v37 = vpop.f32.mrb[163].mxu0 }
 0x411   : > { %v8352_v2 = vadd.f32 %v3270_v9, %v8249_v55  ;;  %v3272_v61 = vpop.f32.mrb[195].mxu1  ;;  %3969 = vmatmul.mubr.f32.gmra.mrb[12].mxu0 %v3671_v0  ;;  %v3676_v37 = vld [vmem:[#allocation2 + $0x170] sm:$0xff] }
 0x412   : > { %3973 = vmatprep.mubr.f32.mxu0 %v8216_v41  ;;  %v3709_v61 = vld [vmem:[#allocation2 + $0x181] sm:$0xff] }
 0x413   : > { %v2905_v7 = vpop.f32.mrb[164].mxu0 }
 0x414   : > { %v8356_v29 = vadd.f32 %v8291_v20, %v2905_v7  ;;  %v3275_v49 = vpop.f32.mrb[196].mxu1  ;;  %v2907_v18 = vpop.f32.mrb[165].mxu0 }
 0x415   : > { %v8359_v40 = vadd.f32 %v3275_v49, %v8252_v15  ;;  %v3277_v39 = vpop.f32.mrb[197].mxu1  ;;  %3974 = vmatmul.mubr.f32.gmra.mrb[14].mxu0 %v3672_v32  ;;  %v3677_v32 = vld [vmem:[#allocation2 + $0x180] sm:$0xff] }
 0x416   : > { %3978 = vmatprep.mubr.f32.mxu0 %v8223_v36 }
 0x417   : > { %v2910_v55 = vpop.f32.mrb[166].mxu0 }
 0x418   : > { %v8363_v53 = vadd.f32 %v8287_v4, %v2910_v55  ;;  %v3280_v47 = vpop.f32.mrb[198].mxu1  ;;  %v2912_v41 = vpop.f32.mrb[167].mxu0  ;;  %v3710_v55 = vld [vmem:[#allocation2 + $0x189] sm:$0xff] }
 0x419   : > { %v8366_v20 = vadd.f32 %v3280_v47, %v8255_v51  ;;  %v3282_v43 = vpop.f32.mrb[199].mxu1  ;;  %3979 = vmatmul.mubr.f32.gmra.mrb[16].mxu0 %v3673_v38 }
 0x41a   : > { %3983 = vmatprep.mubr.f32.mxu0 %v3706_v5  ;;  %v3678_v43 = vld [vmem:[#allocation2 + $0x188] sm:$0xff] }
 0x41b   : > { %v2915_v15 = vpop.f32.mrb[168].mxu0 }
 0x41c   : > { %v8369_v59 = vadd.f32 %v8298_v10, %v2915_v15  ;;  %v3285_v17 = vpop.f32.mrb[200].mxu1  ;;  %v2917_v36 = vpop.f32.mrb[169].mxu0  ;;  %v3711_v15 = vld [vmem:[#allocation2 + $0x199] sm:$0xff] }
 0x41d   : > { %v8372_v4 = vadd.f32 %v3285_v17, %v8258_v16  ;;  %v3287_v14 = vpop.f32.mrb[201].mxu1  ;;  %3984 = vmatmul.mubr.f32.gmra.mrb[18].mxu0 %v3674_v56 }
 0x41e   : > { %3988 = vmatprep.mubr.f32.mxu0 %v3707_v13  ;;  %v3679_v14 = vld [vmem:[#allocation2 + $0x198] sm:$0xff] }
 0x41f   : > { %v2920_v51 = vpop.f32.mrb[170].mxu0 }
 0x420   : > { %v8375_v42 = vadd.f32 %v8294_v1, %v2920_v51  ;;  %v3290_v26 = vpop.f32.mrb[202].mxu1  ;;  %v2922_v54 = vpop.f32.mrb[171].mxu0  ;;  %v3712_v51 = vld [vmem:[#allocation2 + $0x1a1] sm:$0xff] }
 0x421   : > { %v8378_v10 = vadd.f32 %v3290_v26, %v8263_v34  ;;  %v3292_v44 = vpop.f32.mrb[203].mxu1  ;;  %3989 = vmatmul.mubr.f32.gmra.mrb[20].mxu0 %v3675_v48 }
 0x422   : > { %3993 = vmatprep.mubr.f32.mxu0 %v3708_v45  ;;  %v3680_v44 = vld [vmem:[#allocation2 + $0x1a0] sm:$0xff] }
 0x423   : > { %v2925_v16 = vpop.f32.mrb[172].mxu0 }
 0x424   : > { %v8381_v60 = vadd.f32 %v8306_v22, %v2925_v16  ;;  %v3295_v24 = vpop.f32.mrb[204].mxu1  ;;  %v2927_v9 = vpop.f32.mrb[173].mxu0 }
 0x425   : > { %v8384_v1 = vadd.f32 %v3295_v24, %v8268_v6  ;;  %v3297_v0 = vpop.f32.mrb[205].mxu1  ;;  %3994 = vmatmul.mubr.f32.gmra.mrb[22].mxu0 %v3676_v37 }
 0x426   : > { %3998 = vmatprep.mubr.f32.mxu0 %v3709_v61 }
 0x427   : > { %v2930_v34 = vpop.f32.mrb[174].mxu0 }
 0x428   : > { %v8387_v7 = vadd.f32 %v8301_v28, %v2930_v34  ;;  %v3300_v49 = vpop.f32.mrb[206].mxu1  ;;  %v2932_v18 = vpop.f32.mrb[175].mxu0 }
 0x429   : > { %v8390_v22 = vadd.f32 %v3300_v49, %v8275_v8  ;;  %v3302_v39 = vpop.f32.mrb[207].mxu1  ;;  %3999 = vmatmul.mubr.f32.gmra.mrb[24].mxu0 %v3677_v32 }
 0x42a   : > { %4003 = vmatprep.mubr.f32.mxu0 %v3710_v55 }
 0x42b   : > { %v2935_v6 = vpop.f32.mrb[176].mxu0 }
 0x42c   : > { %v8393_v47 = vadd.f32 %v8314_v62, %v2935_v6  ;;  %v3305_v41 = vpop.f32.mrb[208].mxu1  ;;  %v2937_v38 = vpop.f32.mrb[177].mxu0 }
 0x42d   : > { %v8396_v28 = vadd.f32 %v3305_v41, %v8282_v63  ;;  %v3307_v5 = vpop.f32.mrb[209].mxu1  ;;  %4004 = vmatmul.mubr.f32.gmra.mrb[26].mxu0 %v3678_v43 }
 0x42e   : > { %4008 = vmatprep.mubr.f32.mxu0 %v3711_v15 }
 0x42f   : > { %v2940_v8 = vpop.f32.mrb[178].mxu0 }
 0x430   : > { %v8399_v17 = vadd.f32 %v8309_v57, %v2940_v8  ;;  %v3310_v36 = vpop.f32.mrb[210].mxu1  ;;  %v2942_v56 = vpop.f32.mrb[179].mxu0 }
 0x431   : > { %v8402_v62 = vadd.f32 %v3310_v36, %v8289_v33  ;;  %v3312_v13 = vpop.f32.mrb[211].mxu1  ;;  %4009 = vmatmul.mubr.f32.gmra.mrb[28].mxu0 %v3679_v14 }
 0x432   : > { %4013 = vmatprep.mubr.f32.mxu0 %v3712_v51 }
 0x433   : > { %v2945_v63 = vpop.f32.mrb[180].mxu0 }
 0x434   : > { %v8405_v26 = vadd.f32 %v8322_v25, %v2945_v63  ;;  %v3315_v54 = vpop.f32.mrb[212].mxu1  ;;  %v2947_v48 = vpop.f32.mrb[181].mxu0 }
 0x435   : > { %v8408_v57 = vadd.f32 %v3315_v54, %v8296_v35  ;;  %v3317_v45 = vpop.f32.mrb[213].mxu1  ;;  %4014 = vmatmul.mubr.f32.gmra.mrb[30].mxu0 %v3680_v44 }
 0x437   : > { %v2950_v16 = vpop.f32.mrb[182].mxu0 }
 0x438   : > { %v8411_v33 = vadd.f32 %v8317_v30, %v2950_v16  ;;  %v3320_v24 = vpop.f32.mrb[214].mxu1  ;;  %v2952_v9 = vpop.f32.mrb[183].mxu0 }
 0x439   : > { %v8414_v37 = vadd.f32 %v3320_v24, %v8304_v50  ;;  %v3322_v0 = vpop.f32.mrb[215].mxu1 }
 0x43b   : > { %v2955_v25 = vpop.f32.mrb[184].mxu0 }
 0x43c   : > { %v8417_v61 = vadd.f32 %v8330_v31, %v2955_v25  ;;  %v3325_v34 = vpop.f32.mrb[216].mxu1  ;;  %v2957_v49 = vpop.f32.mrb[185].mxu0 }
 0x43d   : > { %v8420_v35 = vadd.f32 %v3325_v34, %v8312_v58  ;;  %v3327_v18 = vpop.f32.mrb[217].mxu1 }
 0x43f   : > { %v2960_v32 = vpop.f32.mrb[186].mxu0 }
 0x440   : > { %v8423_v30 = vadd.f32 %v8325_v52, %v2960_v32  ;;  %v3330_v39 = vpop.f32.mrb[218].mxu1  ;;  %v2962_v55 = vpop.f32.mrb[187].mxu0 }
 0x441   : > { %v3331_v50 = vadd.f32 %v3330_v39, %v8320_v12  ;;  %v3332_v6 = vpop.f32.mrb[219].mxu1 }
 0x443   : > { %v2965_v41 = vpop.f32.mrb[188].mxu0 }
 0x444   : > { %v8427_v38 = vadd.f32 %v8338_v21, %v2965_v41  ;;  %v3335_v31 = vpop.f32.mrb[220].mxu1  ;;  %v2967_v43 = vpop.f32.mrb[189].mxu0 }
 0x445   : > { %v8430_v5 = vadd.f32 %v3335_v31, %v8328_v11  ;;  %v3337_v58 = vpop.f32.mrb[221].mxu1 }
 0x447   : > { %v2970_v15 = vpop.f32.mrb[190].mxu0 }
 0x448   : > { %v8433_v8 = vadd.f32 %v8333_v23, %v2970_v15  ;;  %v3340_v52 = vpop.f32.mrb[222].mxu1  ;;  %v2972_v36 = vpop.f32.mrb[191].mxu0 }
 0x449   : > { %v3341_v56 = vadd.f32 %v3340_v52, %v8336_v19  ;;  %v3342_v12 = vpop.f32.mrb[223].mxu1 }
 0x44b   : > { %v5334_v14 = vpop.f32.mrb[192].mxu0 }
 0x44c   : > { %v3345_v13 = vpop.f32.mrb[224].mxu1  ;;  %v8437_v21 = vadd.f32 %v5334_v14, %v8352_v2  ;;  %v3490_v51 = vpop.f32.mrb[193].mxu0 }
 0x44d   : > { %v3346_v63 = vadd.f32 %v3345_v13, %v8342_v3  ;;  %v3347_v11 = vpop.f32.mrb[225].mxu1  ;;  %v8441_v54 = vadd.f32 %v3490_v51, %v8345_v46 }
 0x44f   : > { %v5337_v48 = vpop.f32.mrb[194].mxu0 }
 0x450   : > { %v3350_v23 = vpop.f32.mrb[226].mxu1  ;;  %v8444_v44 = vadd.f32 %v5337_v48, %v8366_v20  ;;  %v3500_v45 = vpop.f32.mrb[195].mxu0 }
 0x451   : > { %v3351_v19 = vadd.f32 %v3350_v23, %v8349_v27  ;;  %v3352_v16 = vpop.f32.mrb[227].mxu1  ;;  %v8448_v24 = vadd.f32 %v3500_v45, %v8359_v40 }
 0x453   : > { %v5340_v2 = vpop.f32.mrb[196].mxu0 }
 0x454   : > { %v3355_v9 = vpop.f32.mrb[228].mxu1  ;;  %v8451_v3 = vadd.f32 %v5340_v2, %v8378_v10  ;;  %v3510_v0 = vpop.f32.mrb[197].mxu0 }
 0x455   : > { %v3356_v46 = vadd.f32 %v3355_v9, %v8356_v29  ;;  %v3357_v25 = vpop.f32.mrb[229].mxu1  ;;  %v8455_v34 = vadd.f32 %v3510_v0, %v8372_v4 }
 0x457   : > { %v5343_v20 = vpop.f32.mrb[198].mxu0 }
 0x458   : > { %v3360_v49 = vpop.f32.mrb[230].mxu1  ;;  %v8458_v27 = vadd.f32 %v5343_v20, %v8390_v22  ;;  %v3520_v18 = vpop.f32.mrb[199].mxu0 }
 0x459   : > { %v3361_v40 = vadd.f32 %v3360_v49, %v8363_v53  ;;  %v3362_v32 = vpop.f32.mrb[231].mxu1  ;;  %v8462_v39 = vadd.f32 %v3520_v18, %v8384_v1 }
 0x45b   : > { %v5346_v10 = vpop.f32.mrb[200].mxu0 }
 0x45c   : > { %v3365_v55 = vpop.f32.mrb[232].mxu1  ;;  %v8465_v29 = vadd.f32 %v5346_v10, %v8402_v62  ;;  %v3530_v6 = vpop.f32.mrb[201].mxu0 }
 0x45d   : > { %v3366_v4 = vadd.f32 %v3365_v55, %v8369_v59  ;;  %v3367_v41 = vpop.f32.mrb[233].mxu1  ;;  %v8469_v31 = vadd.f32 %v3530_v6, %v8396_v28 }
 0x45f   : > { %v5349_v22 = vpop.f32.mrb[202].mxu0 }
 0x460   : > { %v3370_v43 = vpop.f32.mrb[234].mxu1  ;;  %v8472_v53 = vadd.f32 %v5349_v22, %v8414_v37  ;;  %v3540_v58 = vpop.f32.mrb[203].mxu0 }
 0x461   : > { %v3371_v1 = vadd.f32 %v3370_v43, %v8375_v42  ;;  %v3372_v15 = vpop.f32.mrb[235].mxu1  ;;  %v8476_v52 = vadd.f32 %v3540_v58, %v8408_v57 }
 0x463   : > { %v5352_v62 = vpop.f32.mrb[204].mxu0 }
 0x464   : > { %v3375_v36 = vpop.f32.mrb[236].mxu1  ;;  %v8478_v12 = vadd.f32 %v5352_v62, %v3331_v50  ;;  %v3550_v59 = vpop.f32.mrb[205].mxu0 }
 0x465   : > { %v3376_v28 = vadd.f32 %v3375_v36, %v8381_v60  ;;  %v3377_v14 = vpop.f32.mrb[237].mxu1  ;;  %v8482_v13 = vadd.f32 %v3550_v59, %v8420_v35 }
 0x467   : > { %v5355_v37 = vpop.f32.mrb[206].mxu0 }
 0x468   : > { %v3380_v51 = vpop.f32.mrb[238].mxu1  ;;  %v8484_v11 = vadd.f32 %v5355_v37, %v3341_v56  ;;  %v3560_v42 = vpop.f32.mrb[207].mxu0 }
 0x469   : > { %v3381_v48 = vadd.f32 %v3380_v51, %v8387_v7  ;;  %v3382_v57 = vpop.f32.mrb[239].mxu1  ;;  %v8488_v23 = vadd.f32 %v3560_v42, %v8430_v5 }
 0x46b   : > { %v5358_v50 = vpop.f32.mrb[208].mxu0 }
 0x46c   : > { %v3385_v45 = vpop.f32.mrb[240].mxu1  ;;  %v8490_v16 = vadd.f32 %v5358_v50, %v3351_v19  ;;  %v3570_v60 = vpop.f32.mrb[209].mxu0 }
 0x46d   : > { %v3386_v2 = vadd.f32 %v3385_v45, %v8393_v47  ;;  %v3387_v35 = vpop.f32.mrb[241].mxu1  ;;  %v8493_v9 = vadd.f32 %v3570_v60, %v3346_v63 }
 0x46f   : > { %v5361_v0 = vpop.f32.mrb[210].mxu0 }
 0x470   : > { %v3390_v56 = vpop.f32.mrb[242].mxu1  ;;  %v8495_v25 = vadd.f32 %v5361_v0, %v3361_v40  ;;  %v3580_v20 = vpop.f32.mrb[211].mxu0 }
 0x471   : > { %v3391_v7 = vadd.f32 %v3390_v56, %v8399_v17  ;;  %v3392_v49 = vpop.f32.mrb[243].mxu1  ;;  %v8498_v5 = vadd.f32 %v3580_v20, %v3356_v46 }
 0x473   : > { %v5364_v18 = vpop.f32.mrb[212].mxu0 }
 0x474   : > { %v3395_v32 = vpop.f32.mrb[244].mxu1  ;;  %v8500_v19 = vadd.f32 %v5364_v18, %v3371_v1  ;;  %v3590_v10 = vpop.f32.mrb[213].mxu0 }
 0x475   : > { %v3396_v47 = vadd.f32 %v3395_v32, %v8405_v26  ;;  %v3397_v55 = vpop.f32.mrb[245].mxu1  ;;  %v8503_v63 = vadd.f32 %v3590_v10, %v3366_v4 }
 0x477   : > { %v5367_v6 = vpop.f32.mrb[214].mxu0 }
 0x478   : > { %v3400_v41 = vpop.f32.mrb[246].mxu1  ;;  %v8505_v40 = vadd.f32 %v5367_v6, %v3381_v48  ;;  %v3600_v22 = vpop.f32.mrb[215].mxu0 }
 0x479   : > { %v3401_v17 = vadd.f32 %v3400_v41, %v8411_v33  ;;  %v3402_v43 = vpop.f32.mrb[247].mxu1  ;;  %v8508_v46 = vadd.f32 %v3600_v22, %v3376_v28 }
 0x47b   : > { %v5370_v58 = vpop.f32.mrb[216].mxu0 }
 0x47c   : > { %v3405_v15 = vpop.f32.mrb[248].mxu1  ;;  %v8510_v1 = vadd.f32 %v5370_v58, %v3391_v7  ;;  %v3610_v62 = vpop.f32.mrb[217].mxu0 }
 0x47d   : > { %v3406_v26 = vadd.f32 %v3405_v15, %v8417_v61  ;;  %v3407_v36 = vpop.f32.mrb[249].mxu1  ;;  %v8513_v4 = vadd.f32 %v3610_v62, %v3386_v2 }
 0x47f   : > { %v5373_v59 = vpop.f32.mrb[218].mxu0 }
 0x480   : > { %v3410_v14 = vpop.f32.mrb[250].mxu1  ;;  %v8515_v37 = vadd.f32 %v5373_v59, %v3401_v17  ;;  %v3620_v51 = vpop.f32.mrb[219].mxu0 }
 0x481   : > { %v3411_v33 = vadd.f32 %v3410_v14, %v8423_v30  ;;  %v3412_v42 = vpop.f32.mrb[251].mxu1  ;;  %v8518_v28 = vadd.f32 %v3620_v51, %v3396_v47 }
 0x483   : > { %v5376_v48 = vpop.f32.mrb[220].mxu0 }
 0x484   : > { %v3415_v57 = vpop.f32.mrb[252].mxu1  ;;  %v8520_v50 = vadd.f32 %v5376_v48, %v3411_v33  ;;  %v3630_v45 = vpop.f32.mrb[221].mxu0 }
 0x485   : > { %v3416_v61 = vadd.f32 %v3415_v57, %v8427_v38  ;;  %v3417_v60 = vpop.f32.mrb[253].mxu1  ;;  %v8523_v2 = vadd.f32 %v3630_v45, %v3406_v26 }
 0x487   : > { %v5379_v35 = vpop.f32.mrb[222].mxu0 }
 0x488   : > { %v3420_v0 = vpop.f32.mrb[254].mxu1  ;;  %v3640_v56 = vpop.f32.mrb[223].mxu0 }
 0x489   : > { %v3421_v20 = vadd.f32 %v3420_v0, %v8433_v8  ;;  %v3422_v7 = vpop.f32.mrb[255].mxu1  ;;  %v8526_v30 = vadd.f32 %v3640_v56, %v3416_v61 }
 0x48b   : > { %v8528_v49 = vadd.f32 %v5379_v35, %v3421_v20 }
 0x48c   : > { %v3860_v18 = vpop.f32.mrb[224].mxu0  ;;  %v5414_v32 = vpop.f32.mrb[0].mxu1 }
 0x48d   : > { %v3862_v10 = vpop.f32.mrb[225].mxu0  ;;  %v4085_v47 = vpop.f32.mrb[1].mxu1 }
 0x48e   : > { %v4086_v55 = vadd.f32 %v4085_v47, %v3860_v18 }
 0x490   : > { %v8531_v38 = vadd.f32 %v4086_v55, %v8441_v54  ;;  %v3865_v6 = vpop.f32.mrb[226].mxu0  ;;  %v5417_v41 = vpop.f32.mrb[2].mxu1 }
 0x491   : > { %v4091_v22 = vadd.f32 %v5414_v32, %v3865_v6  ;;  %v3867_v17 = vpop.f32.mrb[227].mxu0  ;;  %v4095_v43 = vpop.f32.mrb[3].mxu1 }
 0x493   : > { %v8534_v8 = vadd.f32 %v4091_v22, %v8437_v21 }
 0x494   : > { %v3870_v58 = vpop.f32.mrb[228].mxu0  ;;  %v5420_v15 = vpop.f32.mrb[4].mxu1 }
 0x495   : > { %v4096_v62 = vadd.f32 %v4095_v43, %v3870_v58  ;;  %v3872_v26 = vpop.f32.mrb[229].mxu0  ;;  %v4105_v36 = vpop.f32.mrb[5].mxu1 }
 0x497   : > { %v8537_v59 = vadd.f32 %v4096_v62, %v8448_v24 }
 0x498   : > { %v3875_v14 = vpop.f32.mrb[230].mxu0  ;;  %v5423_v51 = vpop.f32.mrb[6].mxu1 }
 0x499   : > { %v4101_v54 = vadd.f32 %v5417_v41, %v3875_v14  ;;  %v3877_v33 = vpop.f32.mrb[231].mxu0  ;;  %v4115_v42 = vpop.f32.mrb[7].mxu1 }
 0x49b   : > { %v8540_v48 = vadd.f32 %v4101_v54, %v8444_v44 }
 0x49c   : > { %v3880_v57 = vpop.f32.mrb[232].mxu0  ;;  %v5426_v45 = vpop.f32.mrb[8].mxu1 }
 0x49d   : > { %v4106_v21 = vadd.f32 %v4105_v36, %v3880_v57  ;;  %v3882_v61 = vpop.f32.mrb[233].mxu0  ;;  %v4125_v60 = vpop.f32.mrb[9].mxu1 }
 0x49f   : > { %v8543_v35 = vadd.f32 %v4106_v21, %v8455_v34 }
 0x4a0   : > { %v3885_v0 = vpop.f32.mrb[234].mxu0  ;;  %v5429_v56 = vpop.f32.mrb[10].mxu1 }
 0x4a1   : > { %v4111_v24 = vadd.f32 %v5420_v15, %v3885_v0  ;;  %v3887_v20 = vpop.f32.mrb[235].mxu0  ;;  %v4135_v7 = vpop.f32.mrb[11].mxu1 }
 0x4a3   : > { %v8546_v18 = vadd.f32 %v4111_v24, %v8451_v3 }
 0x4a4   : > { %v3890_v32 = vpop.f32.mrb[236].mxu0  ;;  %v5432_v10 = vpop.f32.mrb[12].mxu1 }
 0x4a5   : > { %v4116_v44 = vadd.f32 %v4115_v42, %v3890_v32  ;;  %v3892_v47 = vpop.f32.mrb[237].mxu0  ;;  %v4145_v55 = vpop.f32.mrb[13].mxu1 }
 0x4a7   : > { %v8549_v6 = vadd.f32 %v4116_v44, %v8462_v39 }
 0x4a8   : > { %v3895_v41 = vpop.f32.mrb[238].mxu0  ;;  %v5435_v22 = vpop.f32.mrb[14].mxu1 }
 0x4a9   : > { %v4121_v34 = vadd.f32 %v5423_v51, %v3895_v41  ;;  %v3897_v17 = vpop.f32.mrb[239].mxu0  ;;  %v4155_v43 = vpop.f32.mrb[15].mxu1 }
 0x4ab   : > { %v8552_v58 = vadd.f32 %v4121_v34, %v8458_v27 }
 0x4ac   : > { %v3900_v15 = vpop.f32.mrb[240].mxu0  ;;  %v5438_v62 = vpop.f32.mrb[16].mxu1 }
 0x4ad   : > { %v4126_v3 = vadd.f32 %v4125_v60, %v3900_v15  ;;  %v3902_v26 = vpop.f32.mrb[241].mxu0  ;;  %v4165_v36 = vpop.f32.mrb[17].mxu1 }
 0x4af   : > { %v8555_v14 = vadd.f32 %v4126_v3, %v8469_v31 }
 0x4b0   : > { %v3905_v54 = vpop.f32.mrb[242].mxu0  ;;  %v8557_v33 = vpop.f32.mrb[18].mxu1 }
 0x4b1   : > { %v4131_v39 = vadd.f32 %v5426_v45, %v3905_v54  ;;  %v3907_v42 = vpop.f32.mrb[243].mxu0  ;;  %v4175_v57 = vpop.f32.mrb[19].mxu1 }
 0x4b3   : > { %v8560_v51 = vadd.f32 %v4131_v39, %v8465_v29 }
 0x4b4   : > { %v3910_v21 = vpop.f32.mrb[244].mxu0  ;;  %v8562_v27 = vpop.f32.mrb[20].mxu1 }
 0x4b5   : > { %v4136_v61 = vadd.f32 %v4135_v7, %v3910_v21  ;;  %v3912_v0 = vpop.f32.mrb[245].mxu0  ;;  %v8564_v60 = vpop.f32.mrb[21].mxu1 }
 0x4b7   : > { %v8567_v24 = vadd.f32 %v4136_v61, %v8476_v52  ;;  %v4276_v52 = vadd.f32 %v8534_v8, %v8531_v38 }
 0x4b8   : > { %v3915_v31 = vpop.f32.mrb[246].mxu0  ;;  %v8569_v20 = vpop.f32.mrb[22].mxu1 }
 0x4b9   : > { %v4141_v32 = vadd.f32 %v5429_v56, %v3915_v31  ;;  %v3917_v45 = vpop.f32.mrb[247].mxu0  ;;  %v8571_v44 = vpop.f32.mrb[23].mxu1  ;;  %v4277_v26 = vadd.f32 %v4276_v52, %v8537_v59 }
 0x4bb   : > { %v8574_v29 = vadd.f32 %v4141_v32, %v8472_v53 }
 0x4bc   : > { %v3920_v47 = vpop.f32.mrb[248].mxu0  ;;  %v8576_v41 = vpop.f32.mrb[24].mxu1 }
 0x4bd   : > { %v4146_v7 = vadd.f32 %v4145_v55, %v3920_v47  ;;  %v3922_v34 = vpop.f32.mrb[249].mxu0  ;;  %v8578_v17 = vpop.f32.mrb[25].mxu1  ;;  %v4278_v55 = vadd.f32 %v4277_v26, %v8540_v48 }
 0x4bf   : > { %v8583_v15 = vadd.f32 %v4146_v7, %v8482_v13  ;;  %v4279_v13 = vadd.f32 %v4278_v55, %v8543_v35 }
 0x4c0   : > { %v3925_v56 = vpop.f32.mrb[250].mxu0  ;;  %v8585_v3 = vpop.f32.mrb[26].mxu1 }
 0x4c1   : > { %v4151_v53 = vadd.f32 %v5432_v10, %v3925_v56  ;;  %v3927_v54 = vpop.f32.mrb[251].mxu0  ;;  %v8588_v39 = vpop.f32.mrb[27].mxu1  ;;  %v4280_v45 = vadd.f32 %v4279_v13, %v8546_v18 }
 0x4c3   : > { %v8592_v42 = vadd.f32 %v4151_v53, %v8478_v12  ;;  %v4281_v12 = vadd.f32 %v4280_v45, %v8549_v6 }
 0x4c4   : > { %v3930_v21 = vpop.f32.mrb[252].mxu0  ;;  %v8594_v61 = vpop.f32.mrb[28].mxu1 }
 0x4c5   : > { %v4156_v0 = vadd.f32 %v4155_v43, %v3930_v21  ;;  %v3932_v31 = vpop.f32.mrb[253].mxu0  ;;  %v8597_v32 = vpop.f32.mrb[29].mxu1  ;;  %v4282_v26 = vadd.f32 %v4281_v12, %v8552_v58 }
 0x4c7   : > { %v8601_v10 = vadd.f32 %v4156_v0, %v8488_v23  ;;  %v4283_v54 = vadd.f32 %v4282_v26, %v8555_v14 }
 0x4c8   : > { %v3935_v47 = vpop.f32.mrb[254].mxu0  ;;  %v8603_v7 = vpop.f32.mrb[30].mxu1 }
 0x4c9   : > { %v4161_v34 = vadd.f32 %v5435_v22, %v3935_v47  ;;  %v3937_v52 = vpop.f32.mrb[255].mxu0  ;;  %v8606_v56 = vpop.f32.mrb[31].mxu1  ;;  %v4284_v21 = vadd.f32 %v4283_v54, %v8560_v51 }
 0x4cb   : > { %v8610_v43 = vadd.f32 %v4161_v34, %v8484_v11  ;;  %v4285_v22 = vadd.f32 %v4284_v21, %v8567_v24 }
 0x4cc   : > { %v3940_v53 = vpop.f32.mrb[0].mxu0 }
 0x4cd   : > { %v4166_v55 = vadd.f32 %v4165_v36, %v3940_v53  ;;  %v3942_v23 = vpop.f32.mrb[1].mxu0  ;;  %v4286_v47 = vadd.f32 %v4285_v22, %v8574_v29 }
 0x4cf   : > { %v8615_v13 = vadd.f32 %v4166_v55, %v8493_v9  ;;  %v4287_v34 = vadd.f32 %v4286_v47, %v8583_v15 }
 0x4d0   : > { %v3945_v0 = vpop.f32.mrb[2].mxu0 }
 0x4d1   : > { %v4171_v31 = vadd.f32 %v5438_v62, %v3945_v0  ;;  %v3947_v45 = vpop.f32.mrb[3].mxu0  ;;  %v4288_v26 = vadd.f32 %v4287_v34, %v8592_v42 }
 0x4d3   : > { %v8620_v11 = vadd.f32 %v4171_v31, %v8490_v16  ;;  %v4289_v54 = vadd.f32 %v4288_v26, %v8601_v10 }
 0x4d4   : > { %v3950_v12 = vpop.f32.mrb[4].mxu0 }
 0x4d5   : > { %v4176_v36 = vadd.f32 %v4175_v57, %v3950_v12  ;;  %v3952_v52 = vpop.f32.mrb[5].mxu0  ;;  %v4290_v23 = vadd.f32 %v4289_v54, %v8610_v43 }
 0x4d7   : > { %v8625_v9 = vadd.f32 %v4176_v36, %v8498_v5  ;;  %v4291_v57 = vadd.f32 %v4290_v23, %v8615_v13 }
 0x4d8   : > { %v3955_v53 = vpop.f32.mrb[6].mxu0 }
 0x4d9   : > { %v4181_v62 = vadd.f32 %v8557_v33, %v3955_v53  ;;  %v3957_v55 = vpop.f32.mrb[7].mxu0  ;;  %v4292_v5 = vadd.f32 %v4291_v57, %v8620_v11 }
 0x4db   : > { %v8631_v16 = vadd.f32 %v4181_v62, %v8495_v25  ;;  %v4293_v33 = vadd.f32 %v4292_v5, %v8625_v9 }
 0x4dc   : > { %v3960_v21 = vpop.f32.mrb[8].mxu0 }
 0x4dd   : > { %v4186_v0 = vadd.f32 %v8564_v60, %v3960_v21  ;;  %v3962_v22 = vpop.f32.mrb[9].mxu0  ;;  %v4294_v25 = vadd.f32 %v4293_v33, %v8631_v16 }
 0x4df   : > { %v8637_v31 = vadd.f32 %v4186_v0, %v8503_v63 }
 0x4e0   : > { %v3965_v45 = vpop.f32.mrb[10].mxu0 }
 0x4e1   : > { %v4191_v47 = vadd.f32 %v8562_v27, %v3965_v45  ;;  %v3967_v12 = vpop.f32.mrb[11].mxu0  ;;  %v4295_v52 = vadd.f32 %v4294_v25, %v8637_v31 }
 0x4e3   : > { %v4265_v34 = vadd.f32 %v4191_v47, %v8500_v19 }
 0x4e4   : > { %v3970_v36 = vpop.f32.mrb[12].mxu0 }
 0x4e5   : > { %v4196_v60 = vadd.f32 %v8571_v44, %v3970_v36  ;;  %v3972_v26 = vpop.f32.mrb[13].mxu0  ;;  %v4296_v53 = vadd.f32 %v4295_v52, %v4265_v34 }
 0x4e7   : > { %v4266_v63 = vadd.f32 %v4196_v60, %v8508_v46 }
 0x4e8   : > { %v3975_v54 = vpop.f32.mrb[14].mxu0 }
 0x4e9   : > { %v4297_v62 = vadd.f32 %v4296_v53, %v4266_v63  ;;  %v4201_v55 = vadd.f32 %v8569_v20, %v3975_v54  ;;  %v3977_v23 = vpop.f32.mrb[15].mxu0 }
 0x4eb   : > { %v4267_v27 = vadd.f32 %v4201_v55, %v8505_v40 }
 0x4ec   : > { %v3980_v21 = vpop.f32.mrb[16].mxu0 }
 0x4ed   : > { %v4298_v57 = vadd.f32 %v4297_v62, %v4267_v27  ;;  %v4206_v19 = vadd.f32 %v8578_v17, %v3980_v21  ;;  %v3982_v0 = vpop.f32.mrb[17].mxu0 }
 0x4ef   : > { %v4268_v22 = vadd.f32 %v4206_v19, %v8513_v4 }
 0x4f0   : > { %v3985_v5 = vpop.f32.mrb[18].mxu0 }
 0x4f1   : > { %v4299_v44 = vadd.f32 %v4298_v57, %v4268_v22  ;;  %v4211_v45 = vadd.f32 %v8576_v41, %v3985_v5  ;;  %v3987_v33 = vpop.f32.mrb[19].mxu0 }
 0x4f3   : > { %v4269_v46 = vadd.f32 %v4211_v45, %v8510_v1 }
 0x4f4   : > { %v3990_v47 = vpop.f32.mrb[20].mxu0 }
 0x4f5   : > { %v4300_v12 = vadd.f32 %v4299_v44, %v4269_v46  ;;  %v4216_v20 = vadd.f32 %v8588_v39, %v3990_v47  ;;  %v3992_v25 = vpop.f32.mrb[21].mxu0 }
 0x4f7   : > { %v4270_v40 = vadd.f32 %v4216_v20, %v8518_v28 }
 0x4f8   : > { %v3995_v36 = vpop.f32.mrb[22].mxu0 }
 0x4f9   : > { %v4301_v52 = vadd.f32 %v4300_v12, %v4270_v40  ;;  %v4221_v17 = vadd.f32 %v8585_v3, %v3995_v36  ;;  %v3997_v60 = vpop.f32.mrb[23].mxu0 }
 0x4fb   : > { %v4271_v4 = vadd.f32 %v4221_v17, %v8515_v37 }
 0x4fc   : > { %v4000_v26 = vpop.f32.mrb[24].mxu0 }
 0x4fd   : > { %v4302_v53 = vadd.f32 %v4301_v52, %v4271_v4  ;;  %v4226_v41 = vadd.f32 %v8597_v32, %v4000_v26  ;;  %v4002_v54 = vpop.f32.mrb[25].mxu0 }
 0x4ff   : > { %v4272_v1 = vadd.f32 %v4226_v41, %v8523_v2 }
 0x500   : > { %v4005_v62 = vpop.f32.mrb[26].mxu0 }
 0x501   : > { %v4303_v55 = vadd.f32 %v4302_v53, %v4272_v1  ;;  %v4231_v39 = vadd.f32 %v8594_v61, %v4005_v62  ;;  %v4007_v23 = vpop.f32.mrb[27].mxu0 }
 0x503   : > { %v4273_v28 = vadd.f32 %v4231_v39, %v8520_v50 }
 0x504   : > { %v4010_v21 = vpop.f32.mrb[28].mxu0 }
 0x505   : > { %v4304_v57 = vadd.f32 %v4303_v55, %v4273_v28  ;;  %v4236_v3 = vadd.f32 %v8606_v56, %v4010_v21  ;;  %v4012_v19 = vpop.f32.mrb[29].mxu0 }
 0x507   : > { %v4274_v37 = vadd.f32 %v4236_v3, %v8526_v30 }
 0x508   : > { %v4015_v0 = vpop.f32.mrb[30].mxu0 }
 0x509   : > { %v4305_v5 = vadd.f32 %v4304_v57, %v4274_v37  ;;  %v4241_v32 = vadd.f32 %v8603_v7, %v4015_v0  ;;  %v4017_v44 = vpop.f32.mrb[31].mxu0 }
 0x50b   : > { %v4275_v2 = vadd.f32 %v4241_v32, %v8528_v49 }
 0x50d   : > { %v4306_v45 = vadd.f32 %v4305_v5, %v4275_v2 }
 0x50f   : > { %v4307_v33 = vrot.slane %v4306_v45, 4 }
 0x511   : > { %v4308_v61 = vadd.f32 %v4307_v33, %v4306_v45 }
 0x513   : > { %v4309_v47 = vrot.slane %v4308_v61, 2 }
 0x515   : > { %v4310_v12 = vadd.f32 %v4309_v47, %v4308_v61 }
 0x517   : > { %v4311_v50 = vrot.slane %v4310_v12, 1 }
 0x519   : > { %v4312_v20 = vadd.f32 %v4311_v50, %v4310_v12 }
 0x51b   : > { %v8664_v25 = vmul.f32 0.00390625, %v4312_v20 }
 0x51d   : > { %v8667_v56 = vsub.f32 %v4265_v34, %v8664_v25  ;;  %v8670_v30 = vsub.f32 %v4266_v63, %v8664_v25  ;;  %v8673_v7 = vsub.f32 %v4267_v27, %v8664_v25  ;;  %v8676_v49 = vsub.f32 %v4268_v22, %v8664_v25 }
 0x51e   : > { %v8679_v36 = vsub.f32 %v4269_v46, %v8664_v25  ;;  %v8682_v52 = vsub.f32 %v4270_v40, %v8664_v25  ;;  %v8685_v17 = vsub.f32 %v4271_v4, %v8664_v25  ;;  %v8688_v34 = vsub.f32 %v4272_v1, %v8664_v25 }
 0x51f   : > { %v8691_v63 = vsub.f32 %v4273_v28, %v8664_v25  ;;  %v8694_v27 = vsub.f32 %v4274_v37, %v8664_v25  ;;  %v8697_v22 = vsub.f32 %v4275_v2, %v8664_v25  ;;  %v8701_v46 = vsub.f32 %v8531_v38, %v8664_v25 }
 0x520   : > { %v8705_v40 = vsub.f32 %v8534_v8, %v8664_v25  ;;  %v8709_v60 = vsub.f32 %v8537_v59, %v8664_v25  ;;  %v8717_v53 = vsub.f32 %v8540_v48, %v8664_v25  ;;  %v8721_v38 = vsub.f32 %v8543_v35, %v8664_v25 }
 0x521   : > { %v4346_v4 = vmul.f32 %v8701_v46, %v8701_v46  ;;  %v8727_v59 = vsub.f32 %v8546_v18, %v8664_v25  ;;  %v8733_v48 = vsub.f32 %v8549_v6, %v8664_v25  ;;  %v8739_v55 = vsub.f32 %v8552_v58, %v8664_v25 }
 0x522   : > { %v4347_v26 = vmul.f32 %v8705_v40, %v8705_v40  ;;  %v4348_v8 = vmul.f32 %v8709_v60, %v8709_v60  ;;  %v4349_v54 = vmul.f32 %v8717_v53, %v8717_v53  ;;  %v4350_v35 = vmul.f32 %v8721_v38, %v8721_v38 }
 0x523   : > { %v4351_v18 = vmul.f32 %v8727_v59, %v8727_v59  ;;  %v8745_v23 = vsub.f32 %v8555_v14, %v8664_v25  ;;  %v4352_v6 = vmul.f32 %v8733_v48, %v8733_v48  ;;  %v8751_v21 = vsub.f32 %v8560_v51, %v8664_v25 }
 0x524   : > { %v4378_v41 = vadd.f32 %v4347_v26, %v4346_v4  ;;  %v4353_v58 = vmul.f32 %v8739_v55, %v8739_v55  ;;  %v8757_v3 = vsub.f32 %v8567_v24, %v8664_v25  ;;  %v8763_v37 = vsub.f32 %v8574_v29, %v8664_v25 }
 0x525   : > { %v4354_v14 = vmul.f32 %v8745_v23, %v8745_v23  ;;  %v4355_v51 = vmul.f32 %v8751_v21, %v8751_v21  ;;  %v8769_v5 = vsub.f32 %v8583_v15, %v8664_v25  ;;  %v8775_v44 = vsub.f32 %v8592_v42, %v8664_v25 }
 0x526   : > { %v4379_v1 = vadd.f32 %v4378_v41, %v4348_v8  ;;  %v4356_v24 = vmul.f32 %v8757_v3, %v8757_v3  ;;  %v4357_v29 = vmul.f32 %v8763_v37, %v8763_v37  ;;  %v8781_v45 = vsub.f32 %v8601_v10, %v8664_v25 }
 0x527   : > { %v4358_v15 = vmul.f32 %v8769_v5, %v8769_v5  ;;  %v8787_v61 = vsub.f32 %v8610_v43, %v8664_v25  ;;  %v4359_v42 = vmul.f32 %v8775_v44, %v8775_v44  ;;  %v8793_v12 = vsub.f32 %v8615_v13, %v8664_v25 }
 0x528   : > { %v4380_v62 = vadd.f32 %v4379_v1, %v4349_v54  ;;  %v4360_v10 = vmul.f32 %v8781_v45, %v8781_v45  ;;  %v8799_v20 = vsub.f32 %v8620_v11, %v8664_v25  ;;  %v8805_v26 = vsub.f32 %v8625_v9, %v8664_v25 }
 0x529   : > { %v4361_v43 = vmul.f32 %v8787_v61, %v8787_v61  ;;  %v4362_v13 = vmul.f32 %v8793_v12, %v8793_v12  ;;  %v4333_v41 = vsub.f32 %v8631_v16, %v8664_v25  ;;  %v4334_v1 = vsub.f32 %v8637_v31, %v8664_v25 }
 0x52a   : > { %v4381_v39 = vadd.f32 %v4380_v62, %v4350_v35  ;;  %v4363_v54 = vmul.f32 %v8799_v20, %v8799_v20  ;;  %v4364_v35 = vmul.f32 %v8805_v26, %v8805_v26  ;;  %v4368_v16 = vmul.f32 %v8670_v30, %v8670_v30 }
 0x52b   : > { %v4365_v9 = vmul.f32 %v4333_v41, %v4333_v41  ;;  %v4370_v25 = vmul.f32 %v8676_v49, %v8676_v49 }
 0x52c   : > { %v4382_v28 = vadd.f32 %v4381_v39, %v4351_v18  ;;  %v4366_v39 = vmul.f32 %v4334_v1, %v4334_v1 }
 0x52e   : > { %v4383_v57 = vadd.f32 %v4382_v28, %v4352_v6  ;;  %v4367_v28 = vmul.f32 %v8667_v56, %v8667_v56 }
 0x530   : > { %v4384_v19 = vadd.f32 %v4383_v57, %v4353_v58 }
 0x532   : > { %v4385_v0 = vadd.f32 %v4384_v19, %v4354_v14  ;;  %v4369_v14 = vmul.f32 %v8673_v7, %v8673_v7 }
 0x534   : > { %v4386_v32 = vadd.f32 %v4385_v0, %v4355_v51  ;;  %v4371_v51 = vmul.f32 %v8679_v36, %v8679_v36 }
 0x536   : > { %v4387_v2 = vadd.f32 %v4386_v32, %v4356_v24  ;;  %v4372_v24 = vmul.f32 %v8682_v52, %v8682_v52 }
 0x538   : > { %v4388_v33 = vadd.f32 %v4387_v2, %v4357_v29  ;;  %v4373_v29 = vmul.f32 %v8685_v17, %v8685_v17 }
 0x53a   : > { %v4389_v47 = vadd.f32 %v4388_v33, %v4358_v15  ;;  %v4374_v15 = vmul.f32 %v8688_v34, %v8688_v34 }
 0x53c   : > { %v4390_v50 = vadd.f32 %v4389_v47, %v4359_v42  ;;  %v4375_v42 = vmul.f32 %v8691_v63, %v8691_v63 }
 0x53e   : > { %v4391_v4 = vadd.f32 %v4390_v50, %v4360_v10  ;;  %v4376_v10 = vmul.f32 %v8694_v27, %v8694_v27 }
 0x540   : > { %v4392_v8 = vadd.f32 %v4391_v4, %v4361_v43  ;;  %v4377_v43 = vmul.f32 %v8697_v22, %v8697_v22 }
 0x542   : > { %v4393_v11 = vadd.f32 %v4392_v8, %v4362_v13 }
 0x544   : > { %v4394_v62 = vadd.f32 %v4393_v11, %v4363_v54 }
 0x546   : > { %v4395_v18 = vadd.f32 %v4394_v62, %v4364_v35 }
 0x548   : > { %v4396_v6 = vadd.f32 %v4395_v18, %v4365_v9 }
 0x54a   : > { %v4397_v58 = vadd.f32 %v4396_v6, %v4366_v39 }
 0x54c   : > { %v4398_v57 = vadd.f32 %v4397_v58, %v4367_v28 }
 0x54e   : > { %v4399_v31 = vadd.f32 %v4398_v57, %v4368_v16 }
 0x550   : > { %v4400_v19 = vadd.f32 %v4399_v31, %v4369_v14 }
 0x552   : > { %v4401_v0 = vadd.f32 %v4400_v19, %v4370_v25 }
 0x554   : > { %v4402_v32 = vadd.f32 %v4401_v0, %v4371_v51 }
 0x556   : > { %v4403_v2 = vadd.f32 %v4402_v32, %v4372_v24 }
 0x558   : > { %v4404_v33 = vadd.f32 %v4403_v2, %v4373_v29  ;;  %v9108_v29 = vld [vmem:[#allocation10_spill] sm:$0xff]  ;;  %v9109_v2 = vld [vmem:[#allocation11_spill] sm:$0xff] }
 0x55a   : > { %v4405_v47 = vadd.f32 %v4404_v33, %v4374_v15  ;;  %v9110_v15 = vld [vmem:[#allocation12_spill] sm:$0xff]  ;;  %v9111_v33 = vld [vmem:[#allocation13_spill] sm:$0xff] }
 0x55c   : > { %v4406_v50 = vadd.f32 %v4405_v47, %v4375_v42  ;;  %v9112_v42 = vld [vmem:[#allocation14_spill] sm:$0xff] }
 0x55e   : > { %v4407_v4 = vadd.f32 %v4406_v50, %v4376_v10  ;;  %v9113_v10 = vld [vmem:[#allocation15_spill] sm:$0xff] }
 0x560   : > { %v4408_v13 = vadd.f32 %v4407_v4, %v4377_v43  ;;  %v9114_v43 = vld [vmem:[#allocation16_spill] sm:$0xff] }
 0x562   : > { %v4409_v8 = vrot.slane %v4408_v13, 4 }
 0x564   : > { %v4410_v54 = vadd.f32 %v4409_v8, %v4408_v13  ;;  %v9115_v13 = vld [vmem:[#allocation17_spill] sm:$0xff] }
 0x566   : > { %v4411_v11 = vrot.slane %v4410_v54, 2 }
 0x568   : > { %v4412_v35 = vadd.f32 %v4411_v11, %v4410_v54  ;;  %v9116_v54 = vld [vmem:[#allocation18_spill] sm:$0xff] }
 0x56a   : > { %v4413_v62 = vrot.slane %v4412_v35, 1 }
 0x56c   : > { %v4414_v9 = vadd.f32 %v4413_v62, %v4412_v35  ;;  %v9117_v35 = vld [vmem:[#allocation19_spill] sm:$0xff] }
 0x56e   : > { %v4415_v18 = vmul.f32 0.00390625, %v4414_v9  ;;  %v9118_v9 = vld [vmem:[#allocation20_spill] sm:$0xff] }
 0x570   : > { %v4416_v39 = vadd.f32 1e-05, %v4415_v18 }
 0x572   : > { %5964 = vrsqrt.f32 %v4416_v39  ;;  %v9119_v39 = vld [vmem:[#allocation36_spill] sm:$0xff] }
 0x57c   : > { %v5965_v6 = vpop.eup %5964 }
 0x57d   : > { %v4418_v28 = vmul.f32 %v5965_v6, %v8701_v46  ;;  %v4419_v58 = vmul.f32 %v5965_v6, %v8705_v40  ;;  %v4420_v16 = vmul.f32 %v5965_v6, %v8709_v60  ;;  %v4421_v57 = vmul.f32 %v5965_v6, %v8717_v53 }
 0x57e   : > { %v4422_v14 = vmul.f32 %v5965_v6, %v8721_v38  ;;  %v4423_v31 = vmul.f32 %v5965_v6, %v8727_v59  ;;  %v4424_v25 = vmul.f32 %v5965_v6, %v8733_v48  ;;  %v4425_v19 = vmul.f32 %v5965_v6, %v8739_v55 }
 0x57f   : > { %v4426_v51 = vmul.f32 %v5965_v6, %v8745_v23  ;;  %v4427_v0 = vmul.f32 %v5965_v6, %v8751_v21  ;;  %v4428_v46 = vmul.f32 %v5965_v6, %v8757_v3  ;;  %v4429_v40 = vmul.f32 %v5965_v6, %v8763_v37 }
 0x580   : > { %v4430_v60 = vmul.f32 %v5965_v6, %v8769_v5  ;;  %v4431_v53 = vmul.f32 %v5965_v6, %v8775_v44  ;;  %v4432_v38 = vmul.f32 %v5965_v6, %v8781_v45  ;;  %v4433_v59 = vmul.f32 %v5965_v6, %v8787_v61 }
 0x581   : > { %v4434_v48 = vmul.f32 %v5965_v6, %v8793_v12  ;;  %v4435_v55 = vmul.f32 %v5965_v6, %v8799_v20  ;;  %v4436_v23 = vmul.f32 %v5965_v6, %v8805_v26  ;;  %v4437_v21 = vmul.f32 %v5965_v6, %v4333_v41  ;;  %v9106_v26 = vld [vmem:[#allocation8_spill] sm:$0xff] }
 0x582   : > { %v4438_v24 = vmul.f32 %v5965_v6, %v4334_v1  ;;  %v4439_v3 = vmul.f32 %v5965_v6, %v8667_v56  ;;  %v4440_v37 = vmul.f32 %v5965_v6, %v8670_v30  ;;  %v4441_v5 = vmul.f32 %v5965_v6, %v8673_v7  ;;  %v9107_v1 = vld [vmem:[#allocation9_spill] sm:$0xff] }
 0x583   : > { %v4442_v44 = vmul.f32 %v5965_v6, %v8676_v49  ;;  %v4443_v45 = vmul.f32 %v5965_v6, %v8679_v36  ;;  %v4444_v61 = vmul.f32 %v5965_v6, %v8682_v52  ;;  %v4445_v12 = vmul.f32 %v5965_v6, %v8685_v17  ;;  %v9104_v36 = vld [vmem:[#allocation6_spill] sm:$0xff]  ;;  %v9105_v17 = vld [vmem:[#allocation7_spill] sm:$0xff] }
 0x584   : > { %v4446_v56 = vmul.f32 %v5965_v6, %v8688_v34  ;;  %v4447_v30 = vmul.f32 %v5965_v6, %v8691_v63  ;;  %v4448_v7 = vmul.f32 %v5965_v6, %v8694_v27  ;;  %v4449_v49 = vmul.f32 %v5965_v6, %v8697_v22 }
 0x585   : > { %v4450_v52 = vadd.f32 %v4418_v28, %v9104_v36  ;;  %v4451_v20 = vadd.f32 %v4419_v58, %v9105_v17  ;;  %v4452_v41 = vadd.f32 %v4420_v16, %v9106_v26  ;;  %v4453_v32 = vadd.f32 %v4421_v57, %v9107_v1  ;;  %v9120_v28 = vld [vmem:[#allocation21_spill] sm:$0xff]  ;;  %v9121_v16 = vld [vmem:[#allocation22_spill] sm:$0xff]  ;;  %v9131_v36 = vld [vmem:[#allocation32_spill] sm:$0xff] }
 0x586   : > { %v4454_v34 = vadd.f32 %v4422_v14, %v9108_v29  ;;  %v4455_v63 = vadd.f32 %v4423_v31, %v9109_v2  ;;  %v4456_v27 = vadd.f32 %v4424_v25, %v9110_v15  ;;  %v4457_v22 = vadd.f32 %v4425_v19, %v9111_v33  ;;  %v9122_v14 = vld [vmem:[#allocation23_spill] sm:$0xff]  ;;  %v9123_v25 = vld [vmem:[#allocation24_spill] sm:$0xff] }
 0x587   : > { %v4458_v47 = vadd.f32 %v4426_v51, %v9112_v42  ;;  %v4459_v50 = vadd.f32 %v4427_v0, %v9113_v10  ;;  %v4460_v4 = vadd.f32 %v4428_v46, %v9114_v43  ;;  %v4461_v8 = vadd.f32 %v4429_v40, %v9115_v13  ;;  %4482 = vst [vmem:[%s8870_s10] sm:$0xff] %v4450_v52  ;;  %v9124_v51 = vld [vmem:[#allocation25_spill] sm:$0xff]  ;;  %v9125_v46 = vld [vmem:[#allocation26_spill] sm:$0xff]  ;;  %v9135_v26 = vld [vmem:[#allocation35_spill] sm:$0xff] }
 0x588   : > { %4483 = vst [vmem:[%s8870_s10 + $0x8] sm:$0xff] %v4451_v20  ;;  %4484 = vst [vmem:[%s8870_s10 + $0x10] sm:$0xff] %v4452_v41  ;;  %v4462_v11 = vadd.f32 %v4430_v60, %v9116_v54  ;;  %v4463_v62 = vadd.f32 %v4431_v53, %v9117_v35  ;;  %v4464_v18 = vadd.f32 %v4432_v38, %v9118_v9  ;;  %v9126_v60 = vld [vmem:[#allocation27_spill] sm:$0xff]  ;;  %v9127_v38 = vld [vmem:[#allocation28_spill] sm:$0xff] }
 0x589   : > { %4485 = vst [vmem:[%s8870_s10 + $0x18] sm:$0xff] %v4453_v32  ;;  %v4465_v6 = vadd.f32 %v9119_v39, %v4433_v59  ;;  %4486 = vst [vmem:[%s8870_s10 + $0x20] sm:$0xff] %v4454_v34  ;;  %v4466_v58 = vadd.f32 %v4434_v48, %v9120_v28  ;;  %v4467_v57 = vadd.f32 %v4435_v55, %v9121_v16  ;;  %v9128_v48 = vld [vmem:[#allocation29_spill] sm:$0xff] }
 0x58a   : > { %4487 = vst [vmem:[%s8870_s10 + $0x28] sm:$0xff] %v4455_v63  ;;  %4488 = vst [vmem:[%s8870_s10 + $0x30] sm:$0xff] %v4456_v27  ;;  %v4468_v31 = vadd.f32 %v4436_v23, %v9122_v14  ;;  %v4469_v19 = vadd.f32 %v4437_v21, %v9123_v25  ;;  %v4470_v0 = vadd.f32 %v4438_v24, %v9124_v51  ;;  %v9129_v23 = vld [vmem:[#allocation30_spill] sm:$0xff]  ;;  %v9130_v24 = vld [vmem:[#allocation31_spill] sm:$0xff] }
 0x58b   : > { %4489 = vst [vmem:[%s8870_s10 + $0x38] sm:$0xff] %v4457_v22  ;;  %4490 = vst [vmem:[%s8870_s10 + $0x40] sm:$0xff] %v4458_v47  ;;  %v4471_v40 = vadd.f32 %v4439_v3, %v9125_v46  ;;  %v4472_v53 = vadd.f32 %v4440_v37, %v9126_v60  ;;  %v4473_v59 = vadd.f32 %v4441_v5, %v9127_v38  ;;  %v9132_v5 = vld [vmem:[#allocation37_spill] sm:$0xff] }
 0x58c   : > { %4491 = vst [vmem:[%s8870_s10 + $0x48] sm:$0xff] %v4459_v50  ;;  %4492 = vst [vmem:[%s8870_s10 + $0x50] sm:$0xff] %v4460_v4  ;;  %v4474_v55 = vadd.f32 %v4442_v44, %v9128_v48  ;;  %v4475_v21 = vadd.f32 %v4443_v45, %v9129_v23  ;;  %v4476_v3 = vadd.f32 %v4444_v61, %v9130_v24  ;;  %v9133_v52 = vld [vmem:[#allocation33_spill] sm:$0xff]  ;;  %v9134_v45 = vld [vmem:[#allocation34_spill] sm:$0xff] }
 0x58d   : > { %4493 = vst [vmem:[%s8870_s10 + $0x58] sm:$0xff] %v4461_v8  ;;  %4494 = vst [vmem:[%s8870_s10 + $0x60] sm:$0xff] %v4462_v11  ;;  %v4477_v37 = vadd.f32 %v4445_v12, %v9131_v36  ;;  %v4478_v44 = vadd.f32 %v9132_v5, %v4446_v56  ;;  %v4479_v17 = vadd.f32 %v4447_v30, %v9133_v52 }
 0x58e   : > { %4495 = vst [vmem:[%s8870_s10 + $0x68] sm:$0xff] %v4463_v62  ;;  %4496 = vst [vmem:[%s8870_s10 + $0x70] sm:$0xff] %v4464_v18  ;;  %v4480_v20 = vadd.f32 %v4448_v7, %v9134_v45  ;;  %v4481_v61 = vadd.f32 %v4449_v49, %v9135_v26 }
 0x58f   : > { %4497 = vst [vmem:[%s8870_s10 + $0x78] sm:$0xff] %v4465_v6  ;;  %4498 = vst [vmem:[%s8870_s10 + $0x80] sm:$0xff] %v4466_v58 }
 0x590   : > { %4499 = vst [vmem:[%s8870_s10 + $0x88] sm:$0xff] %v4467_v57  ;;  %4500 = vst [vmem:[%s8870_s10 + $0x90] sm:$0xff] %v4468_v31 }
 0x591   : > { %4501 = vst [vmem:[%s8870_s10 + $0x98] sm:$0xff] %v4469_v19  ;;  %4502 = vst [vmem:[%s8870_s10 + $0xa0] sm:$0xff] %v4470_v0 }
 0x592   : > { %4503 = vst [vmem:[%s8870_s10 + $0xa8] sm:$0xff] %v4471_v40  ;;  %4504 = vst [vmem:[%s8870_s10 + $0xb0] sm:$0xff] %v4472_v53 }
 0x593   : > { %4505 = vst [vmem:[%s8870_s10 + $0xb8] sm:$0xff] %v4473_v59  ;;  %4506 = vst [vmem:[%s8870_s10 + $0xc0] sm:$0xff] %v4474_v55 }
 0x594   : > { %4507 = vst [vmem:[%s8870_s10 + $0xc8] sm:$0xff] %v4475_v21  ;;  %4508 = vst [vmem:[%s8870_s10 + $0xd0] sm:$0xff] %v4476_v3 }
 0x595   : > { %4509 = vst [vmem:[%s8870_s10 + $0xd8] sm:$0xff] %v4477_v37  ;;  %4510 = vst [vmem:[%s8870_s10 + $0xe0] sm:$0xff] %v4478_v44 }
 0x596   : > { %4511 = vst [vmem:[%s8870_s10 + $0xe8] sm:$0xff] %v4479_v17  ;;  %4512 = vst [vmem:[%s8870_s10 + $0xf0] sm:$0xff] %v4480_v20 }
 0x597   : > { %4513 = vst [vmem:[%s8870_s10 + $0xf8] sm:$0xff] %v4481_v61 }
 0x598 PF: > { %s14_s12 = sadd.s32 1, %s6006_s12  }
 0x599   : > { %p11_p3 = scmp.ge.s32.totalorder %s14_s12, 4  }
 0x59b   :  { %13 = sbr.rel (!%p11_p3) target bundleno = 1 (0x1), region = 74 }
 0x5a2   :  { %4535 = vsyncpa [#allocation4], 1 }
 0x5a3   :  { %4537 = vsyncpa [#allocation4 + $0x1], 1 }

</bundles_post_ra>
